<compile_context>
chip_gen: v7x
topology: tpu7x:2x2x1
jax: 0.10.0
libtpu: 0.0.40
codegen_flags: <defaults>
</compile_context>

<pallas_src>
import functools

import jax
import jax.numpy as jnp
from jax.experimental import pallas as pl
from jax.experimental.pallas import tpu as pltpu


def _unpixel_shuffle_kernel(x_ref, o_ref, *, scale, in_h):
    """Permute one (batch, channel) slab.

    x_ref block: (1, 1, s, s, s, in_d, in_h, in_w)   logical (a, b2, c2, dd, hh, ww)
    o_ref block: (1, 1, s, in_d, in_w, s*s*in_h)     logical (b2, dd, ww, [a, c2, hh])
    required:    o[b2, dd, ww, (a*s + c2)*in_h + hh] = x[a, b2, c2, dd, hh, ww]
    """
    s = scale
    for a in range(s):
        for c2 in range(s):
            # Direct ref slice (no full-block materialization): (b2, dd, hh, ww).
            blk = x_ref[0, 0, a, :, c2, :, :, :]
            # One batched last-two-dims transpose (XLU): (b2, dd, ww, hh).
            t = jnp.swapaxes(blk, -1, -2)
            # One dense slice-store per (a, c2): fills in_h contiguous lanes of the
            # flattened (a, c2, hh) output lane axis for every (b2, dd, ww) at once.
            o_ref[0, 0, :, :, :, pl.ds((a * s + c2) * in_h, in_h)] = t


def _unpixel_shuffle_kernel_unrolled(x_ref, o_ref, *, scale, in_h, in_d):
    """Fallback kernel using only 2-D transposes (same block/writeback layout).

    Only used if Mosaic on the running jaxlib cannot lower the batched rank-4
    last-two-dims transpose. Fully unrolled: s**3 * in_d small ops per grid step.
    """
    s = scale
    for a in range(s):
        for c2 in range(s):
            lane0 = (a * s + c2) * in_h
            for b2 in range(s):
                for dd in range(in_d):
                    tile = x_ref[0, 0, a, b2, c2, dd, :, :]          # (in_h, in_w)
                    o_ref[0, 0, b2, dd, :, pl.ds(lane0, in_h)] = tile.T


def unpixel_shuffle(x, scale, *, use_batched_transpose=True):
    B, C, OD, OH, OW = x.shape
    s = int(scale)
    if OD % s or OH % s or OW % s:
        raise ValueError(f"spatial dims {(OD, OH, OW)} must be divisible by scale={s}")
    in_d, in_h, in_w = OD // s, OH // s, OW // s
    n_out = C * s ** 3

    # view glue: == torch .contiguous().view(B, C, s, s, s, in_d, in_h, in_w)
    x8 = x.reshape(B, C, s, s, s, in_d, in_h, in_w)

    if use_batched_transpose:
        kernel = functools.partial(_unpixel_shuffle_kernel, scale=s, in_h=in_h)
    else:
        kernel = functools.partial(
            _unpixel_shuffle_kernel_unrolled, scale=s, in_h=in_h, in_d=in_d
        )

    # Output declared with (a, c2, hh) flattened into one trailing lane axis. Both
    # blocks cover the full trailing dims of one (b, c) slab, so each grid step is
    # one contiguous HBM read + one contiguous HBM writeback.
    #
    # VMEM budget note (v7x: 64 MiB physical / 32 MiB default scoped): each step
    # double-buffers one s^3*in_d*in_h*in_w slab in and out; for very large spatial
    # shapes add a grid axis over `a` (splitting the input block) and/or raise
    # vmem_limit_bytes via pltpu.CompilerParams.
    out6 = pl.pallas_call(
        kernel,
        out_shape=jax.ShapeDtypeStruct((B, C, s, in_d, in_w, s * s * in_h), x.dtype),
        grid=(B, C),
        in_specs=[
            pl.BlockSpec(
                (1, 1, s, s, s, in_d, in_h, in_w),
                lambda b, c: (b, c, 0, 0, 0, 0, 0, 0),
            )
        ],
        out_specs=pl.BlockSpec(
            (1, 1, s, in_d, in_w, s * s * in_h),
            lambda b, c: (b, c, 0, 0, 0, 0),
        ),
        compiler_params=pltpu.CompilerParams(
            dimension_semantics=("parallel", "parallel"),
        ),
    )(x8)

    # view glue: == final torch .view(B, nOut, in_d, in_h, in_w); out6 is the permuted
    # contiguous buffer with its last three axes (a, c2, hh) already merged.
    return out6.reshape(B, n_out, in_d, in_h, in_w)


def unpixel_shuffle_ref(x, scale):
    """Pure-JAX reference, literal transcription of the torch forward."""
    B, C, OD, OH, OW = x.shape
    s = scale
    in_d, in_h, in_w = OD // s, OH // s, OW // s
    v = x.reshape(B, C, s, s, s, in_d, in_h, in_w)
    v = jnp.transpose(v, (0, 1, 3, 5, 7, 2, 4, 6))
    return v.reshape(B, C * s ** 3, in_d, in_h, in_w)


if __name__ == "__main__":
    key = jax.random.PRNGKey(0)
    scale = 2
    # small NCDHW input: batch=2, channels=2, D=H=W=16 (divisible by scale)
    x = jax.random.normal(key, (2, 2, 16, 16, 16), dtype=jnp.float32)

    try:
        out = jax.block_until_ready(unpixel_shuffle(x, scale))
    except Exception:
        # Mosaic on this jaxlib could not lower the batched transpose; fall back to
        # the 2-D-transpose-only kernel (identical grid / tiling / writeback layout).
        out = jax.block_until_ready(
            unpixel_shuffle(x, scale, use_batched_transpose=False)
        )

    ref = unpixel_shuffle_ref(x, scale)
    assert out.shape == (2, 2 * scale ** 3, 8, 8, 8), out.shape
    assert out.dtype == x.dtype
    assert jnp.allclose(out, ref), "mismatch vs pure-JAX reference"
    print("KERNEL_OK")
</pallas_src>

<mosaic_0001>
module attributes {stable_mosaic.version = 11 : i64} {
  func.func @_unpixel_shuffle_kernel(%arg0: i32, %arg1: i32, %arg2: memref<1x1x2x2x2x8x8x8xf32, #tpu.memory_space<vmem>>, %arg3: memref<1x1x2x8x8x32xf32, #tpu.memory_space<vmem>>) attributes {dimension_semantics = [#tpu.dimension_semantics<parallel>, #tpu.dimension_semantics<parallel>], iteration_bounds = array<i64: 2, 2>, scalar_prefetch = 0 : i64, scratch_operands = 0 : i64, tpu.core_type = #tpu.core_type<tc>, window_params = [{transform_indices = @transform_0, window_bounds = array<i64: 1, 1, 2, 2, 2, 8, 8, 8>}, {transform_indices = @transform_1, window_bounds = array<i64: 1, 1, 2, 8, 8, 32>}]} {
    %c0 = arith.constant 0 : index
    %c0_0 = arith.constant 0 : index
    %c0_1 = arith.constant 0 : index
    %c0_2 = arith.constant 0 : index
    %c0_3 = arith.constant 0 : index
    %c0_4 = arith.constant 0 : index
    %c0_5 = arith.constant 0 : index
    %c0_6 = arith.constant 0 : index
    %0 = vector.load %arg2[%c0, %c0_0, %c0_1, %c0_2, %c0_3, %c0_4, %c0_5, %c0_6] : memref<1x1x2x2x2x8x8x8xf32, #tpu.memory_space<vmem>>, vector<1x1x1x2x1x8x8x8xf32>
    %1 = vector.shape_cast %0 : vector<1x1x1x2x1x8x8x8xf32> to vector<2x8x8x8xf32>
    %2 = tpu.transpose %1, [0, 1, 3, 2] : vector<2x8x8x8xf32> -> vector<2x8x8x8xf32>
    %c0_7 = arith.constant 0 : index
    %c0_8 = arith.constant 0 : index
    %c0_9 = arith.constant 0 : index
    %c0_10 = arith.constant 0 : index
    %c0_11 = arith.constant 0 : index
    %c0_12 = arith.constant 0 : index
    %3 = vector.load %arg3[%c0_7, %c0_8, %c0_9, %c0_10, %c0_11, %c0_12] : memref<1x1x2x8x8x32xf32, #tpu.memory_space<vmem>>, vector<1x1x2x8x8x8xf32>
    %4 = vector.shape_cast %3 : vector<1x1x2x8x8x8xf32> to vector<2x8x8x8xf32>
    %5 = vector.shape_cast %2 : vector<2x8x8x8xf32> to vector<1x1x2x8x8x8xf32>
    tpu.vector_store %arg3[%c0_7, %c0_8, %c0_9, %c0_10, %c0_11, %c0_12], %5 {strides = array<i32>} : memref<1x1x2x8x8x32xf32, #tpu.memory_space<vmem>>, vector<1x1x2x8x8x8xf32>,
    %c0_13 = arith.constant 0 : index
    %c0_14 = arith.constant 0 : index
    %c0_15 = arith.constant 0 : index
    %c0_16 = arith.constant 0 : index
    %c1 = arith.constant 1 : index
    %c0_17 = arith.constant 0 : index
    %c0_18 = arith.constant 0 : index
    %c0_19 = arith.constant 0 : index
    %6 = vector.load %arg2[%c0_13, %c0_14, %c0_15, %c0_16, %c1, %c0_17, %c0_18, %c0_19] : memref<1x1x2x2x2x8x8x8xf32, #tpu.memory_space<vmem>>, vector<1x1x1x2x1x8x8x8xf32>
    %7 = vector.shape_cast %6 : vector<1x1x1x2x1x8x8x8xf32> to vector<2x8x8x8xf32>
    %8 = tpu.transpose %7, [0, 1, 3, 2] : vector<2x8x8x8xf32> -> vector<2x8x8x8xf32>
    %c0_20 = arith.constant 0 : index
    %c0_21 = arith.constant 0 : index
    %c0_22 = arith.constant 0 : index
    %c0_23 = arith.constant 0 : index
    %c0_24 = arith.constant 0 : index
    %c8 = arith.constant 8 : index
    %9 = vector.load %arg3[%c0_20, %c0_21, %c0_22, %c0_23, %c0_24, %c8] : memref<1x1x2x8x8x32xf32, #tpu.memory_space<vmem>>, vector<1x1x2x8x8x8xf32>
    %10 = vector.shape_cast %9 : vector<1x1x2x8x8x8xf32> to vector<2x8x8x8xf32>
    %11 = vector.shape_cast %8 : vector<2x8x8x8xf32> to vector<1x1x2x8x8x8xf32>
    tpu.vector_store %arg3[%c0_20, %c0_21, %c0_22, %c0_23, %c0_24, %c8], %11 {strides = array<i32>} : memref<1x1x2x8x8x32xf32, #tpu.memory_space<vmem>>, vector<1x1x2x8x8x8xf32>,
    %c0_25 = arith.constant 0 : index
    %c0_26 = arith.constant 0 : index
    %c1_27 = arith.constant 1 : index
    %c0_28 = arith.constant 0 : index
    %c0_29 = arith.constant 0 : index
    %c0_30 = arith.constant 0 : index
    %c0_31 = arith.constant 0 : index
    %c0_32 = arith.constant 0 : index
    %12 = vector.load %arg2[%c0_25, %c0_26, %c1_27, %c0_28, %c0_29, %c0_30, %c0_31, %c0_32] : memref<1x1x2x2x2x8x8x8xf32, #tpu.memory_space<vmem>>, vector<1x1x1x2x1x8x8x8xf32>
    %13 = vector.shape_cast %12 : vector<1x1x1x2x1x8x8x8xf32> to vector<2x8x8x8xf32>
    %14 = tpu.transpose %13, [0, 1, 3, 2] : vector<2x8x8x8xf32> -> vector<2x8x8x8xf32>
    %c0_33 = arith.constant 0 : index
    %c0_34 = arith.constant 0 : index
    %c0_35 = arith.constant 0 : index
    %c0_36 = arith.constant 0 : index
    %c0_37 = arith.constant 0 : index
    %c16 = arith.constant 16 : index
    %15 = vector.load %arg3[%c0_33, %c0_34, %c0_35, %c0_36, %c0_37, %c16] : memref<1x1x2x8x8x32xf32, #tpu.memory_space<vmem>>, vector<1x1x2x8x8x8xf32>
    %16 = vector.shape_cast %15 : vector<1x1x2x8x8x8xf32> to vector<2x8x8x8xf32>
    %17 = vector.shape_cast %14 : vector<2x8x8x8xf32> to vector<1x1x2x8x8x8xf32>
    tpu.vector_store %arg3[%c0_33, %c0_34, %c0_35, %c0_36, %c0_37, %c16], %17 {strides = array<i32>} : memref<1x1x2x8x8x32xf32, #tpu.memory_space<vmem>>, vector<1x1x2x8x8x8xf32>,
    %c0_38 = arith.constant 0 : index
    %c0_39 = arith.constant 0 : index
    %c1_40 = arith.constant 1 : index
    %c0_41 = arith.constant 0 : index
    %c1_42 = arith.constant 1 : index
    %c0_43 = arith.constant 0 : index
    %c0_44 = arith.constant 0 : index
    %c0_45 = arith.constant 0 : index
    %18 = vector.load %arg2[%c0_38, %c0_39, %c1_40, %c0_41, %c1_42, %c0_43, %c0_44, %c0_45] : memref<1x1x2x2x2x8x8x8xf32, #tpu.memory_space<vmem>>, vector<1x1x1x2x1x8x8x8xf32>
    %19 = vector.shape_cast %18 : vector<1x1x1x2x1x8x8x8xf32> to vector<2x8x8x8xf32>
    %20 = tpu.transpose %19, [0, 1, 3, 2] : vector<2x8x8x8xf32> -> vector<2x8x8x8xf32>
    %c0_46 = arith.constant 0 : index
    %c0_47 = arith.constant 0 : index
    %c0_48 = arith.constant 0 : index
    %c0_49 = arith.constant 0 : index
    %c0_50 = arith.constant 0 : index
    %c24 = arith.constant 24 : index
    %21 = vector.load %arg3[%c0_46, %c0_47, %c0_48, %c0_49, %c0_50, %c24] : memref<1x1x2x8x8x32xf32, #tpu.memory_space<vmem>>, vector<1x1x2x8x8x8xf32>
    %22 = vector.shape_cast %21 : vector<1x1x2x8x8x8xf32> to vector<2x8x8x8xf32>
    %23 = vector.shape_cast %20 : vector<2x8x8x8xf32> to vector<1x1x2x8x8x8xf32>
    tpu.vector_store %arg3[%c0_46, %c0_47, %c0_48, %c0_49, %c0_50, %c24], %23 {strides = array<i32>} : memref<1x1x2x8x8x32xf32, #tpu.memory_space<vmem>>, vector<1x1x2x8x8x8xf32>,
    return
  }
  func.func @transform_0(%arg0: i32, %arg1: i32) -> (i32, i32, i32, i32, i32, i32, i32, i32) {
    %c0_i32 = arith.constant 0 : i32
    %c0_i32_0 = arith.constant 0 : i32
    %c0_i32_1 = arith.constant 0 : i32
    %c0_i32_2 = arith.constant 0 : i32
    %c0_i32_3 = arith.constant 0 : i32
    %c0_i32_4 = arith.constant 0 : i32
    %c0_i32_5 = arith.constant 0 : i32
    return %arg0, %arg1, %c0_i32, %c0_i32_0, %c0_i32_1, %c0_i32_2, %c0_i32_3, %c0_i32_4 : i32, i32, i32, i32, i32, i32, i32, i32
  }
  func.func @transform_1(%arg0: i32, %arg1: i32) -> (i32, i32, i32, i32, i32, i32) {
    %c0_i32 = arith.constant 0 : i32
    %c0_i32_0 = arith.constant 0 : i32
    %c0_i32_1 = arith.constant 0 : i32
    %c0_i32_2 = arith.constant 0 : i32
    %c0_i32_3 = arith.constant 0 : i32
    return %arg0, %arg1, %c0_i32, %c0_i32_0, %c0_i32_1, %c0_i32_2 : i32, i32, i32, i32, i32, i32
  }
}

module attributes {stable_mosaic.version = 11 : i64} {
  func.func @_unpixel_shuffle_kernel_unrolled(%arg0: i32, %arg1: i32, %arg2: memref<1x1x2x2x2x8x8x8xf32, #tpu.memory_space<vmem>>, %arg3: memref<1x1x2x8x8x32xf32, #tpu.memory_space<vmem>>) attributes {dimension_semantics = [#tpu.dimension_semantics<parallel>, #tpu.dimension_semantics<parallel>], iteration_bounds = array<i64: 2, 2>, scalar_prefetch = 0 : i64, scratch_operands = 0 : i64, tpu.core_type = #tpu.core_type<tc>, window_params = [{transform_indices = @transform_0, window_bounds = array<i64: 1, 1, 2, 2, 2, 8, 8, 8>}, {transform_indices = @transform_1, window_bounds = array<i64: 1, 1, 2, 8, 8, 32>}]} {
    %c0 = arith.constant 0 : index
    %c0_0 = arith.constant 0 : index
    %c0_1 = arith.constant 0 : index
    %c0_2 = arith.constant 0 : index
    %c0_3 = arith.constant 0 : index
    %c0_4 = arith.constant 0 : index
    %c0_5 = arith.constant 0 : index
    %c0_6 = arith.constant 0 : index
    %0 = vector.load %arg2[%c0, %c0_0, %c0_1, %c0_2, %c0_3, %c0_4, %c0_5, %c0_6] : memref<1x1x2x2x2x8x8x8xf32, #tpu.memory_space<vmem>>, vector<1x1x1x1x1x1x8x8xf32>
    %1 = vector.shape_cast %0 : vector<1x1x1x1x1x1x8x8xf32> to vector<8x8xf32>
    %2 = tpu.transpose %1, [1, 0] : vector<8x8xf32> -> vector<8x8xf32>
    %c0_7 = arith.constant 0 : index
    %c0_8 = arith.constant 0 : index
    %c0_9 = arith.constant 0 : index
    %c0_10 = arith.constant 0 : index
    %c0_11 = arith.constant 0 : index
    %c0_12 = arith.constant 0 : index
    %3 = vector.load %arg3[%c0_7, %c0_8, %c0_9, %c0_10, %c0_11, %c0_12] : memref<1x1x2x8x8x32xf32, #tpu.memory_space<vmem>>, vector<1x1x1x1x8x8xf32>
    %4 = vector.shape_cast %3 : vector<1x1x1x1x8x8xf32> to vector<8x8xf32>
    %5 = vector.shape_cast %2 : vector<8x8xf32> to vector<1x1x1x1x8x8xf32>
    tpu.vector_store %arg3[%c0_7, %c0_8, %c0_9, %c0_10, %c0_11, %c0_12], %5 {strides = array<i32>} : memref<1x1x2x8x8x32xf32, #tpu.memory_space<vmem>>, vector<1x1x1x1x8x8xf32>,
    %c0_13 = arith.constant 0 : index
    %c0_14 = arith.constant 0 : index
    %c0_15 = arith.constant 0 : index
    %c0_16 = arith.constant 0 : index
    %c0_17 = arith.constant 0 : index
    %c1 = arith.constant 1 : index
    %c0_18 = arith.constant 0 : index
    %c0_19 = arith.constant 0 : index
    %6 = vector.load %arg2[%c0_13, %c0_14, %c0_15, %c0_16, %c0_17, %c1, %c0_18, %c0_19] : memref<1x1x2x2x2x8x8x8xf32, #tpu.memory_space<vmem>>, vector<1x1x1x1x1x1x8x8xf32>
    %7 = vector.shape_cast %6 : vector<1x1x1x1x1x1x8x8xf32> to vector<8x8xf32>
    %8 = tpu.transpose %7, [1, 0] : vector<8x8xf32> -> vector<8x8xf32>
    %c0_20 = arith.constant 0 : index
    %c0_21 = arith.constant 0 : index
    %c0_22 = arith.constant 0 : index
    %c1_23 = arith.constant 1 : index
    %c0_24 = arith.constant 0 : index
    %c0_25 = arith.constant 0 : index
    %9 = vector.load %arg3[%c0_20, %c0_21, %c0_22, %c1_23, %c0_24, %c0_25] : memref<1x1x2x8x8x32xf32, #tpu.memory_space<vmem>>, vector<1x1x1x1x8x8xf32>
    %10 = vector.shape_cast %9 : vector<1x1x1x1x8x8xf32> to vector<8x8xf32>
    %11 = vector.shape_cast %8 : vector<8x8xf32> to vector<1x1x1x1x8x8xf32>
    tpu.vector_store %arg3[%c0_20, %c0_21, %c0_22, %c1_23, %c0_24, %c0_25], %11 {strides = array<i32>} : memref<1x1x2x8x8x32xf32, #tpu.memory_space<vmem>>, vector<1x1x1x1x8x8xf32>,
    %c0_26 = arith.constant 0 : index
    %c0_27 = arith.constant 0 : index
    %c0_28 = arith.constant 0 : index
    %c0_29 = arith.constant 0 : index
    %c0_30 = arith.constant 0 : index
    %c2 = arith.constant 2 : index
    %c0_31 = arith.constant 0 : index
    %c0_32 = arith.constant 0 : index
    %12 = vector.load %arg2[%c0_26, %c0_27, %c0_28, %c0_29, %c0_30, %c2, %c0_31, %c0_32] : memref<1x1x2x2x2x8x8x8xf32, #tpu.memory_space<vmem>>, vector<1x1x1x1x1x1x8x8xf32>
    %13 = vector.shape_cast %12 : vector<1x1x1x1x1x1x8x8xf32> to vector<8x8xf32>
    %14 = tpu.transpose %13, [1, 0] : vector<8x8xf32> -> vector<8x8xf32>
    %c0_33 = arith.constant 0 : index
    %c0_34 = arith.constant 0 : index
    %c0_35 = arith.constant 0 : index
    %c2_36 = arith.constant 2 : index
    %c0_37 = arith.constant 0 : index
    %c0_38 = arith.constant 0 : index
    %15 = vector.load %arg3[%c0_33, %c0_34, %c0_35, %c2_36, %c0_37, %c0_38] : memref<1x1x2x8x8x32xf32, #tpu.memory_space<vmem>>, vector<1x1x1x1x8x8xf32>
    %16 = vector.shape_cast %15 : vector<1x1x1x1x8x8xf32> to vector<8x8xf32>
    %17 = vector.shape_cast %14 : vector<8x8xf32> to vector<1x1x1x1x8x8xf32>
    tpu.vector_store %arg3[%c0_33, %c0_34, %c0_35, %c2_36, %c0_37, %c0_38], %17 {strides = array<i32>} : memref<1x1x2x8x8x32xf32, #tpu.memory_space<vmem>>, vector<1x1x1x1x8x8xf32>,
    %c0_39 = arith.constant 0 : index
    %c0_40 = arith.constant 0 : index
    %c0_41 = arith.constant 0 : index
    %c0_42 = arith.constant 0 : index
    %c0_43 = arith.constant 0 : index
    %c3 = arith.constant 3 : index
    %c0_44 = arith.constant 0 : index
    %c0_45 = arith.constant 0 : index
    %18 = vector.load %arg2[%c0_39, %c0_40, %c0_41, %c0_42, %c0_43, %c3, %c0_44, %c0_45] : memref<1x1x2x2x2x8x8x8xf32, #tpu.memory_space<vmem>>, vector<1x1x1x1x1x1x8x8xf32>
    %19 = vector.shape_cast %18 : vector<1x1x1x1x1x1x8x8xf32> to vector<8x8xf32>
    %20 = tpu.transpose %19, [1, 0] : vector<8x8xf32> -> vector<8x8xf32>
    %c0_46 = arith.constant 0 : index
    %c0_47 = arith.constant 0 : index
    %c0_48 = arith.constant 0 : index
    %c3_49 = arith.constant 3 : index
    %c0_50 = arith.constant 0 : index
    %c0_51 = arith.constant 0 : index
    %21 = vector.load %arg3[%c0_46, %c0_47, %c0_48, %c3_49, %c0_50, %c0_51] : memref<1x1x2x8x8x32xf32, #tpu.memory_space<vmem>>, vector<1x1x1x1x8x8xf32>
    %22 = vector.shape_cast %21 : vector<1x1x1x1x8x8xf32> to vector<8x8xf32>
    %23 = vector.shape_cast %20 : vector<8x8xf32> to vector<1x1x1x1x8x8xf32>
    tpu.vector_store %arg3[%c0_46, %c0_47, %c0_48, %c3_49, %c0_50, %c0_51], %23 {strides = array<i32>} : memref<1x1x2x8x8x32xf32, #tpu.memory_space<vmem>>, vector<1x1x1x1x8x8xf32>,
    %c0_52 = arith.constant 0 : index
    %c0_53 = arith.constant 0 : index
    %c0_54 = arith.constant 0 : index
    %c0_55 = arith.constant 0 : index
    %c0_56 = arith.constant 0 : index
    %c4 = arith.constant 4 : index
    %c0_57 = arith.constant 0 : index
    %c0_58 = arith.constant 0 : index
    %24 = vector.load %arg2[%c0_52, %c0_53, %c0_54, %c0_55, %c0_56, %c4, %c0_57, %c0_58] : memref<1x1x2x2x2x8x8x8xf32, #tpu.memory_space<vmem>>, vector<1x1x1x1x1x1x8x8xf32>
    %25 = vector.shape_cast %24 : vector<1x1x1x1x1x1x8x8xf32> to vector<8x8xf32>
    %26 = tpu.transpose %25, [1, 0] : vector<8x8xf32> -> vector<8x8xf32>
    %c0_59 = arith.constant 0 : index
    %c0_60 = arith.constant 0 : index
    %c0_61 = arith.constant 0 : index
    %c4_62 = arith.constant 4 : index
    %c0_63 = arith.constant 0 : index
    %c0_64 = arith.constant 0 : index
    %27 = vector.load %arg3[%c0_59, %c0_60, %c0_61, %c4_62, %c0_63, %c0_64] : memref<1x1x2x8x8x32xf32, #tpu.memory_space<vmem>>, vector<1x1x1x1x8x8xf32>
    %28 = vector.shape_cast %27 : vector<1x1x1x1x8x8xf32> to vector<8x8xf32>
    %29 = vector.shape_cast %26 : vector<8x8xf32> to vector<1x1x1x1x8x8xf32>
    tpu.vector_store %arg3[%c0_59, %c0_60, %c0_61, %c4_62, %c0_63, %c0_64], %29 {strides = array<i32>} : memref<1x1x2x8x8x32xf32, #tpu.memory_space<vmem>>, vector<1x1x1x1x8x8xf32>,
    %c0_65 = arith.constant 0 : index
    %c0_66 = arith.constant 0 : index
    %c0_67 = arith.constant 0 : index
    %c0_68 = arith.constant 0 : index
    %c0_69 = arith.constant 0 : index
    %c5 = arith.constant 5 : index
    %c0_70 = arith.constant 0 : index
    %c0_71 = arith.constant 0 : index
    %30 = vector.load %arg2[%c0_65, %c0_66, %c0_67, %c0_68, %c0_69, %c5, %c0_70, %c0_71] : memref<1x1x2x2x2x8x8x8xf32, #tpu.memory_space<vmem>>, vector<1x1x1x1x1x1x8x8xf32>
    %31 = vector.shape_cast %30 : vector<1x1x1x1x1x1x8x8xf32> to vector<8x8xf32>
    %32 = tpu.transpose %31, [1, 0] : vector<8x8xf32> -> vector<8x8xf32>
    %c0_72 = arith.constant 0 : index
    %c0_73 = arith.constant 0 : index
    %c0_74 = arith.constant 0 : index
    %c5_75 = arith.constant 5 : index
    %c0_76 = arith.constant 0 : index
    %c0_77 = arith.constant 0 : index
    %33 = vector.load %arg3[%c0_72, %c0_73, %c0_74, %c5_75, %c0_76, %c0_77] : memref<1x1x2x8x8x32xf32, #tpu.memory_space<vmem>>, vector<1x1x1x1x8x8xf32>
    %34 = vector.shape_cast %33 : vector<1x1x1x1x8x8xf32> to vector<8x8xf32>
    %35 = vector.shape_cast %32 : vector<8x8xf32> to vector<1x1x1x1x8x8xf32>
    tpu.vector_store %arg3[%c0_72, %c0_73, %c0_74, %c5_75, %c0_76, %c0_77], %35 {strides = array<i32>} : memref<1x1x2x8x8x32xf32, #tpu.memory_space<vmem>>, vector<1x1x1x1x8x8xf32>,
    %c0_78 = arith.constant 0 : index
    %c0_79 = arith.constant 0 : index
    %c0_80 = arith.constant 0 : index
    %c0_81 = arith.constant 0 : index
    %c0_82 = arith.constant 0 : index
    %c6 = arith.constant 6 : index
    %c0_83 = arith.constant 0 : index
    %c0_84 = arith.constant 0 : index
    %36 = vector.load %arg2[%c0_78, %c0_79, %c0_80, %c0_81, %c0_82, %c6, %c0_83, %c0_84] : memref<1x1x2x2x2x8x8x8xf32, #tpu.memory_space<vmem>>, vector<1x1x1x1x1x1x8x8xf32>
    %37 = vector.shape_cast %36 : vector<1x1x1x1x1x1x8x8xf32> to vector<8x8xf32>
    %38 = tpu.transpose %37, [1, 0] : vector<8x8xf32> -> vector<8x8xf32>
    %c0_85 = arith.constant 0 : index
    %c0_86 = arith.constant 0 : index
    %c0_87 = arith.constant 0 : index
    %c6_88 = arith.constant 6 : index
    %c0_89 = arith.constant 0 : index
    %c0_90 = arith.constant 0 : index
    %39 = vector.load %arg3[%c0_85, %c0_86, %c0_87, %c6_88, %c0_89, %c0_90] : memref<1x1x2x8x8x32xf32, #tpu.memory_space<vmem>>, vector<1x1x1x1x8x8xf32>
    %40 = vector.shape_cast %39 : vector<1x1x1x1x8x8xf32> to vector<8x8xf32>
    %41 = vector.shape_cast %38 : vector<8x8xf32> to vector<1x1x1x1x8x8xf32>
    tpu.vector_store %arg3[%c0_85, %c0_86, %c0_87, %c6_88, %c0_89, %c0_90], %41 {strides = array<i32>} : memref<1x1x2x8x8x32xf32, #tpu.memory_space<vmem>>, vector<1x1x1x1x8x8xf32>,
    %c0_91 = arith.constant 0 : index
    %c0_92 = arith.constant 0 : index
    %c0_93 = arith.constant 0 : index
    %c0_94 = arith.constant 0 : index
    %c0_95 = arith.constant 0 : index
    %c7 = arith.constant 7 : index
    %c0_96 = arith.constant 0 : index
    %c0_97 = arith.constant 0 : index
    %42 = vector.load %arg2[%c0_91, %c0_92, %c0_93, %c0_94, %c0_95, %c7, %c0_96, %c0_97] : memref<1x1x2x2x2x8x8x8xf32, #tpu.memory_space<vmem>>, vector<1x1x1x1x1x1x8x8xf32>
    %43 = vector.shape_cast %42 : vector<1x1x1x1x1x1x8x8xf32> to vector<8x8xf32>
    %44 = tpu.transpose %43, [1, 0] : vector<8x8xf32> -> vector<8x8xf32>
    %c0_98 = arith.constant 0 : index
    %c0_99 = arith.constant 0 : index
    %c0_100 = arith.constant 0 : index
    %c7_101 = arith.constant 7 : index
    %c0_102 = arith.constant 0 : index
    %c0_103 = arith.constant 0 : index
    %45 = vector.load %arg3[%c0_98, %c0_99, %c0_100, %c7_101, %c0_102, %c0_103] : memref<1x1x2x8x8x32xf32, #tpu.memory_space<vmem>>, vector<1x1x1x1x8x8xf32>
    %46 = vector.shape_cast %45 : vector<1x1x1x1x8x8xf32> to vector<8x8xf32>
    %47 = vector.shape_cast %44 : vector<8x8xf32> to vector<1x1x1x1x8x8xf32>
    tpu.vector_store %arg3[%c0_98, %c0_99, %c0_100, %c7_101, %c0_102, %c0_103], %47 {strides = array<i32>} : memref<1x1x2x8x8x32xf32, #tpu.memory_space<vmem>>, vector<1x1x1x1x8x8xf32>,
    %c0_104 = arith.constant 0 : index
    %c0_105 = arith.constant 0 : index
    %c0_106 = arith.constant 0 : index
    %c1_107 = arith.constant 1 : index
    %c0_108 = arith.constant 0 : index
    %c0_109 = arith.constant 0 : index
    %c0_110 = arith.constant 0 : index
    %c0_111 = arith.constant 0 : index
    %48 = vector.load %arg2[%c0_104, %c0_105, %c0_106, %c1_107, %c0_108, %c0_109, %c0_110, %c0_111] : memref<1x1x2x2x2x8x8x8xf32, #tpu.memory_space<vmem>>, vector<1x1x1x1x1x1x8x8xf32>
    %49 = vector.shape_cast %48 : vector<1x1x1x1x1x1x8x8xf32> to vector<8x8xf32>
    %50 = tpu.transpose %49, [1, 0] : vector<8x8xf32> -> vector<8x8xf32>
    %c0_112 = arith.constant 0 : index
    %c0_113 = arith.constant 0 : index
    %c1_114 = arith.constant 1 : index
    %c0_115 = arith.constant 0 : index
    %c0_116 = arith.constant 0 : index
    %c0_117 = arith.constant 0 : index
    %51 = vector.load %arg3[%c0_112, %c0_113, %c1_114, %c0_115, %c0_116, %c0_117] : memref<1x1x2x8x8x32xf32, #tpu.memory_space<vmem>>, vector<1x1x1x1x8x8xf32>
    %52 = vector.shape_cast %51 : vector<1x1x1x1x8x8xf32> to vector<8x8xf32>
    %53 = vector.shape_cast %50 : vector<8x8xf32> to vector<1x1x1x1x8x8xf32>
    tpu.vector_store %arg3[%c0_112, %c0_113, %c1_114, %c0_115, %c0_116, %c0_117], %53 {strides = array<i32>} : memref<1x1x2x8x8x32xf32, #tpu.memory_space<vmem>>, vector<1x1x1x1x8x8xf32>,
    %c0_118 = arith.constant 0 : index
    %c0_119 = arith.constant 0 : index
    %c0_120 = arith.constant 0 : index
    %c1_121 = arith.constant 1 : index
    %c0_122 = arith.constant 0 : index
    %c1_123 = arith.constant 1 : index
    %c0_124 = arith.constant 0 : index
    %c0_125 = arith.constant 0 : index
    %54 = vector.load %arg2[%c0_118, %c0_119, %c0_120, %c1_121, %c0_122, %c1_123, %c0_124, %c0_125] : memref<1x1x2x2x2x8x8x8xf32, #tpu.memory_space<vmem>>, vector<1x1x1x1x1x1x8x8xf32>
    %55 = vector.shape_cast %54 : vector<1x1x1x1x1x1x8x8xf32> to vector<8x8xf32>
    %56 = tpu.transpose %55, [1, 0] : vector<8x8xf32> -> vector<8x8xf32>
    %c0_126 = arith.constant 0 : index
    %c0_127 = arith.constant 0 : index
    %c1_128 = arith.constant 1 : index
    %c1_129 = arith.constant 1 : index
    %c0_130 = arith.constant 0 : index
    %c0_131 = arith.constant 0 : index
    %57 = vector.load %arg3[%c0_126, %c0_127, %c1_128, %c1_129, %c0_130, %c0_131] : memref<1x1x2x8x8x32xf32, #tpu.memory_space<vmem>>, vector<1x1x1x1x8x8xf32>
    %58 = vector.shape_cast %57 : vector<1x1x1x1x8x8xf32> to vector<8x8xf32>
    %59 = vector.shape_cast %56 : vector<8x8xf32> to vector<1x1x1x1x8x8xf32>
    tpu.vector_store %arg3[%c0_126, %c0_127, %c1_128, %c1_129, %c0_130, %c0_131], %59 {strides = array<i32>} : memref<1x1x2x8x8x32xf32, #tpu.memory_space<vmem>>, vector<1x1x1x1x8x8xf32>,
    %c0_132 = arith.constant 0 : index
    %c0_133 = arith.constant 0 : index
    %c0_134 = arith.constant 0 : index
    %c1_135 = arith.constant 1 : index
    %c0_136 = arith.constant 0 : index
    %c2_137 = arith.constant 2 : index
    %c0_138 = arith.constant 0 : index
    %c0_139 = arith.constant 0 : index
    %60 = vector.load %arg2[%c0_132, %c0_133, %c0_134, %c1_135, %c0_136, %c2_137, %c0_138, %c0_139] : memref<1x1x2x2x2x8x8x8xf32, #tpu.memory_space<vmem>>, vector<1x1x1x1x1x1x8x8xf32>
    %61 = vector.shape_cast %60 : vector<1x1x1x1x1x1x8x8xf32> to vector<8x8xf32>
    %62 = tpu.transpose %61, [1, 0] : vector<8x8xf32> -> vector<8x8xf32>
    %c0_140 = arith.constant 0 : index
    %c0_141 = arith.constant 0 : index
    %c1_142 = arith.constant 1 : index
    %c2_143 = arith.constant 2 : index
    %c0_144 = arith.constant 0 : index
    %c0_145 = arith.constant 0 : index
    %63 = vector.load %arg3[%c0_140, %c0_141, %c1_142, %c2_143, %c0_144, %c0_145] : memref<1x1x2x8x8x32xf32, #tpu.memory_space<vmem>>, vector<1x1x1x1x8x8xf32>
    %64 = vector.shape_cast %63 : vector<1x1x1x1x8x8xf32> to vector<8x8xf32>
    %65 = vector.shape_cast %62 : vector<8x8xf32> to vector<1x1x1x1x8x8xf32>
    tpu.vector_store %arg3[%c0_140, %c0_141, %c1_142, %c2_143, %c0_144, %c0_145], %65 {strides = array<i32>} : memref<1x1x2x8x8x32xf32, #tpu.memory_space<vmem>>, vector<1x1x1x1x8x8xf32>,
    %c0_146 = arith.constant 0 : index
    %c0_147 = arith.constant 0 : index
    %c0_148 = arith.constant 0 : index
    %c1_149 = arith.constant 1 : index
    %c0_150 = arith.constant 0 : index
    %c3_151 = arith.constant 3 : index
    %c0_152 = arith.constant 0 : index
    %c0_153 = arith.constant 0 : index
    %66 = vector.load %arg2[%c0_146, %c0_147, %c0_148, %c1_149, %c0_150, %c3_151, %c0_152, %c0_153] : memref<1x1x2x2x2x8x8x8xf32, #tpu.memory_space<vmem>>, vector<1x1x1x1x1x1x8x8xf32>
    %67 = vector.shape_cast %66 : vector<1x1x1x1x1x1x8x8xf32> to vector<8x8xf32>
    %68 = tpu.transpose %67, [1, 0] : vector<8x8xf32> -> vector<8x8xf32>
    %c0_154 = arith.constant 0 : index
    %c0_155 = arith.constant 0 : index
    %c1_156 = arith.constant 1 : index
    %c3_157 = arith.constant 3 : index
    %c0_158 = arith.constant 0 : index
    %c0_159 = arith.constant 0 : index
    %69 = vector.load %arg3[%c0_154, %c0_155, %c1_156, %c3_157, %c0_158, %c0_159] : memref<1x1x2x8x8x32xf32, #tpu.memory_space<vmem>>, vector<1x1x1x1x8x8xf32>
    %70 = vector.shape_cast %69 : vector<1x1x1x1x8x8xf32> to vector<8x8xf32>
    %71 = vector.shape_cast %68 : vector<8x8xf32> to vector<1x1x1x1x8x8xf32>
    tpu.vector_store %arg3[%c0_154, %c0_155, %c1_156, %c3_157, %c0_158, %c0_159], %71 {strides = array<i32>} : memref<1x1x2x8x8x32xf32, #tpu.memory_space<vmem>>, vector<1x1x1x1x8x8xf32>,
    %c0_160 = arith.constant 0 : index
    %c0_161 = arith.constant 0 : index
    %c0_162 = arith.constant 0 : index
    %c1_163 = arith.constant 1 : index
    %c0_164 = arith.constant 0 : index
    %c4_165 = arith.constant 4 : index
    %c0_166 = arith.constant 0 : index
    %c0_167 = arith.constant 0 : index
    %72 = vector.load %arg2[%c0_160, %c0_161, %c0_162, %c1_163, %c0_164, %c4_165, %c0_166, %c0_167] : memref<1x1x2x2x2x8x8x8xf32, #tpu.memory_space<vmem>>, vector<1x1x1x1x1x1x8x8xf32>
    %73 = vector.shape_cast %72 : vector<1x1x1x1x1x1x8x8xf32> to vector<8x8xf32>
    %74 = tpu.transpose %73, [1, 0] : vector<8x8xf32> -> vector<8x8xf32>
    %c0_168 = arith.constant 0 : index
    %c0_169 = arith.constant 0 : index
    %c1_170 = arith.constant 1 : index
    %c4_171 = arith.constant 4 : index
    %c0_172 = arith.constant 0 : index
    %c0_173 = arith.constant 0 : index
    %75 = vector.load %arg3[%c0_168, %c0_169, %c1_170, %c4_171, %c0_172, %c0_173] : memref<1x1x2x8x8x32xf32, #tpu.memory_space<vmem>>, vector<1x1x1x1x8x8xf32>
    %76 = vector.shape_cast %75 : vector<1x1x1x1x8x8xf32> to vector<8x8xf32>
    %77 = vector.shape_cast %74 : vector<8x8xf32> to vector<1x1x1x1x8x8xf32>
    tpu.vector_store %arg3[%c0_168, %c0_169, %c1_170, %c4_171, %c0_172, %c0_173], %77 {strides = array<i32>} : memref<1x1x2x8x8x32xf32, #tpu.memory_space<vmem>>, vector<1x1x1x1x8x8xf32>,
    %c0_174 = arith.constant 0 : index
    %c0_175 = arith.constant 0 : index
    %c0_176 = arith.constant 0 : index
    %c1_177 = arith.constant 1 : index
    %c0_178 = arith.constant 0 : index
    %c5_179 = arith.constant 5 : index
    %c0_180 = arith.constant 0 : index
    %c0_181 = arith.constant 0 : index
    %78 = vector.load %arg2[%c0_174, %c0_175, %c0_176, %c1_177, %c0_178, %c5_179, %c0_180, %c0_181] : memref<1x1x2x2x2x8x8x8xf32, #tpu.memory_space<vmem>>, vector<1x1x1x1x1x1x8x8xf32>
    %79 = vector.shape_cast %78 : vector<1x1x1x1x1x1x8x8xf32> to vector<8x8xf32>
    %80 = tpu.transpose %79, [1, 0] : vector<8x8xf32> -> vector<8x8xf32>
    %c0_182 = arith.constant 0 : index
    %c0_183 = arith.constant 0 : index
    %c1_184 = arith.constant 1 : index
    %c5_185 = arith.constant 5 : index
    %c0_186 = arith.constant 0 : index
    %c0_187 = arith.constant 0 : index
    %81 = vector.load %arg3[%c0_182, %c0_183, %c1_184, %c5_185, %c0_186, %c0_187] : memref<1x1x2x8x8x32xf32, #tpu.memory_space<vmem>>, vector<1x1x1x1x8x8xf32>
    %82 = vector.shape_cast %81 : vector<1x1x1x1x8x8xf32> to vector<8x8xf32>
    %83 = vector.shape_cast %80 : vector<8x8xf32> to vector<1x1x1x1x8x8xf32>
    tpu.vector_store %arg3[%c0_182, %c0_183, %c1_184, %c5_185, %c0_186, %c0_187], %83 {strides = array<i32>} : memref<1x1x2x8x8x32xf32, #tpu.memory_space<vmem>>, vector<1x1x1x1x8x8xf32>,
    %c0_188 = arith.constant 0 : index
    %c0_189 = arith.constant 0 : index
    %c0_190 = arith.constant 0 : index
    %c1_191 = arith.constant 1 : index
    %c0_192 = arith.constant 0 : index
    %c6_193 = arith.constant 6 : index
    %c0_194 = arith.constant 0 : index
    %c0_195 = arith.constant 0 : index
    %84 = vector.load %arg2[%c0_188, %c0_189, %c0_190, %c1_191, %c0_192, %c6_193, %c0_194, %c0_195] : memref<1x1x2x2x2x8x8x8xf32, #tpu.memory_space<vmem>>, vector<1x1x1x1x1x1x8x8xf32>
    %85 = vector.shape_cast %84 : vector<1x1x1x1x1x1x8x8xf32> to vector<8x8xf32>
    %86 = tpu.transpose %85, [1, 0] : vector<8x8xf32> -> vector<8x8xf32>
    %c0_196 = arith.constant 0 : index
    %c0_197 = arith.constant 0 : index
    %c1_198 = arith.constant 1 : index
    %c6_199 = arith.constant 6 : index
    %c0_200 = arith.constant 0 : index
    %c0_201 = arith.constant 0 : index
    %87 = vector.load %arg3[%c0_196, %c0_197, %c1_198, %c6_199, %c0_200, %c0_201] : memref<1x1x2x8x8x32xf32, #tpu.memory_space<vmem>>, vector<1x1x1x1x8x8xf32>
    %88 = vector.shape_cast %87 : vector<1x1x1x1x8x8xf32> to vector<8x8xf32>
    %89 = vector.shape_cast %86 : vector<8x8xf32> to vector<1x1x1x1x8x8xf32>
    tpu.vector_store %arg3[%c0_196, %c0_197, %c1_198, %c6_199, %c0_200, %c0_201], %89 {strides = array<i32>} : memref<1x1x2x8x8x32xf32, #tpu.memory_space<vmem>>, vector<1x1x1x1x8x8xf32>,
    %c0_202 = arith.constant 0 : index
    %c0_203 = arith.constant 0 : index
    %c0_204 = arith.constant 0 : index
    %c1_205 = arith.constant 1 : index
    %c0_206 = arith.constant 0 : index
    %c7_207 = arith.constant 7 : index
    %c0_208 = arith.constant 0 : index
    %c0_209 = arith.constant 0 : index
    %90 = vector.load %arg2[%c0_202, %c0_203, %c0_204, %c1_205, %c0_206, %c7_207, %c0_208, %c0_209] : memref<1x1x2x2x2x8x8x8xf32, #tpu.memory_space<vmem>>, vector<1x1x1x1x1x1x8x8xf32>
    %91 = vector.shape_cast %90 : vector<1x1x1x1x1x1x8x8xf32> to vector<8x8xf32>
    %92 = tpu.transpose %91, [1, 0] : vector<8x8xf32> -> vector<8x8xf32>
    %c0_210 = arith.constant 0 : index
    %c0_211 = arith.constant 0 : index
    %c1_212 = arith.constant 1 : index
    %c7_213 = arith.constant 7 : index
    %c0_214 = arith.constant 0 : index
    %c0_215 = arith.constant 0 : index
    %93 = vector.load %arg3[%c0_210, %c0_211, %c1_212, %c7_213, %c0_214, %c0_215] : memref<1x1x2x8x8x32xf32, #tpu.memory_space<vmem>>, vector<1x1x1x1x8x8xf32>
    %94 = vector.shape_cast %93 : vector<1x1x1x1x8x8xf32> to vector<8x8xf32>
    %95 = vector.shape_cast %92 : vector<8x8xf32> to vector<1x1x1x1x8x8xf32>
    tpu.vector_store %arg3[%c0_210, %c0_211, %c1_212, %c7_213, %c0_214, %c0_215], %95 {strides = array<i32>} : memref<1x1x2x8x8x32xf32, #tpu.memory_space<vmem>>, vector<1x1x1x1x8x8xf32>,
    %c0_216 = arith.constant 0 : index
    %c0_217 = arith.constant 0 : index
    %c0_218 = arith.constant 0 : index
    %c0_219 = arith.constant 0 : index
    %c1_220 = arith.constant 1 : index
    %c0_221 = arith.constant 0 : index
    %c0_222 = arith.constant 0 : index
    %c0_223 = arith.constant 0 : index
    %96 = vector.load %arg2[%c0_216, %c0_217, %c0_218, %c0_219, %c1_220, %c0_221, %c0_222, %c0_223] : memref<1x1x2x2x2x8x8x8xf32, #tpu.memory_space<vmem>>, vector<1x1x1x1x1x1x8x8xf32>
    %97 = vector.shape_cast %96 : vector<1x1x1x1x1x1x8x8xf32> to vector<8x8xf32>
    %98 = tpu.transpose %97, [1, 0] : vector<8x8xf32> -> vector<8x8xf32>
    %c0_224 = arith.constant 0 : index
    %c0_225 = arith.constant 0 : index
    %c0_226 = arith.constant 0 : index
    %c0_227 = arith.constant 0 : index
    %c0_228 = arith.constant 0 : index
    %c8 = arith.constant 8 : index
    %99 = vector.load %arg3[%c0_224, %c0_225, %c0_226, %c0_227, %c0_228, %c8] : memref<1x1x2x8x8x32xf32, #tpu.memory_space<vmem>>, vector<1x1x1x1x8x8xf32>
    %100 = vector.shape_cast %99 : vector<1x1x1x1x8x8xf32> to vector<8x8xf32>
    %101 = vector.shape_cast %98 : vector<8x8xf32> to vector<1x1x1x1x8x8xf32>
    tpu.vector_store %arg3[%c0_224, %c0_225, %c0_226, %c0_227, %c0_228, %c8], %101 {strides = array<i32>} : memref<1x1x2x8x8x32xf32, #tpu.memory_space<vmem>>, vector<1x1x1x1x8x8xf32>,
    %c0_229 = arith.constant 0 : index
    %c0_230 = arith.constant 0 : index
    %c0_231 = arith.constant 0 : index
    %c0_232 = arith.constant 0 : index
    %c1_233 = arith.constant 1 : index
    %c1_234 = arith.constant 1 : index
    %c0_235 = arith.constant 0 : index
    %c0_236 = arith.constant 0 : index
    %102 = vector.load %arg2[%c0_229, %c0_230, %c0_231, %c0_232, %c1_233, %c1_234, %c0_235, %c0_236] : memref<1x1x2x2x2x8x8x8xf32, #tpu.memory_space<vmem>>, vector<1x1x1x1x1x1x8x8xf32>
    %103 = vector.shape_cast %102 : vector<1x1x1x1x1x1x8x8xf32> to vector<8x8xf32>
    %104 = tpu.transpose %103, [1, 0] : vector<8x8xf32> -> vector<8x8xf32>
    %c0_237 = arith.constant 0 : index
    %c0_238 = arith.constant 0 : index
    %c0_239 = arith.constant 0 : index
    %c1_240 = arith.constant 1 : index
    %c0_241 = arith.constant 0 : index
    %c8_242 = arith.constant 8 : index
    %105 = vector.load %arg3[%c0_237, %c0_238, %c0_239, %c1_240, %c0_241, %c8_242] : memref<1x1x2x8x8x32xf32, #tpu.memory_space<vmem>>, vector<1x1x1x1x8x8xf32>
    %106 = vector.shape_cast %105 : vector<1x1x1x1x8x8xf32> to vector<8x8xf32>
    %107 = vector.shape_cast %104 : vector<8x8xf32> to vector<1x1x1x1x8x8xf32>
    tpu.vector_store %arg3[%c0_237, %c0_238, %c0_239, %c1_240, %c0_241, %c8_242], %107 {strides = array<i32>} : memref<1x1x2x8x8x32xf32, #tpu.memory_space<vmem>>, vector<1x1x1x1x8x8xf32>,
    %c0_243 = arith.constant 0 : index
    %c0_244 = arith.constant 0 : index
    %c0_245 = arith.constant 0 : index
    %c0_246 = arith.constant 0 : index
    %c1_247 = arith.constant 1 : index
    %c2_248 = arith.constant 2 : index
    %c0_249 = arith.constant 0 : index
    %c0_250 = arith.constant 0 : index
    %108 = vector.load %arg2[%c0_243, %c0_244, %c0_245, %c0_246, %c1_247, %c2_248, %c0_249, %c0_250] : memref<1x1x2x2x2x8x8x8xf32, #tpu.memory_space<vmem>>, vector<1x1x1x1x1x1x8x8xf32>
    %109 = vector.shape_cast %108 : vector<1x1x1x1x1x1x8x8xf32> to vector<8x8xf32>
    %110 = tpu.transpose %109, [1, 0] : vector<8x8xf32> -> vector<8x8xf32>
    %c0_251 = arith.constant 0 : index
    %c0_252 = arith.constant 0 : index
    %c0_253 = arith.constant 0 : index
    %c2_254 = arith.constant 2 : index
    %c0_255 = arith.constant 0 : index
    %c8_256 = arith.constant 8 : index
    %111 = vector.load %arg3[%c0_251, %c0_252, %c0_253, %c2_254, %c0_255, %c8_256] : memref<1x1x2x8x8x32xf32, #tpu.memory_space<vmem>>, vector<1x1x1x1x8x8xf32>
    %112 = vector.shape_cast %111 : vector<1x1x1x1x8x8xf32> to vector<8x8xf32>
    %113 = vector.shape_cast %110 : vector<8x8xf32> to vector<1x1x1x1x8x8xf32>
    tpu.vector_store %arg3[%c0_251, %c0_252, %c0_253, %c2_254, %c0_255, %c8_256], %113 {strides = array<i32>} : memref<1x1x2x8x8x32xf32, #tpu.memory_space<vmem>>, vector<1x1x1x1x8x8xf32>,
    %c0_257 = arith.constant 0 : index
    %c0_258 = arith.constant 0 : index
    %c0_259 = arith.constant 0 : index
    %c0_260 = arith.constant 0 : index
    %c1_261 = arith.constant 1 : index
    %c3_262 = arith.constant 3 : index
    %c0_263 = arith.constant 0 : index
    %c0_264 = arith.constant 0 : index
    %114 = vector.load %arg2[%c0_257, %c0_258, %c0_259, %c0_260, %c1_261, %c3_262, %c0_263, %c0_264] : memref<1x1x2x2x2x8x8x8xf32, #tpu.memory_space<vmem>>, vector<1x1x1x1x1x1x8x8xf32>
    %115 = vector.shape_cast %114 : vector<1x1x1x1x1x1x8x8xf32> to vector<8x8xf32>
    %116 = tpu.transpose %115, [1, 0] : vector<8x8xf32> -> vector<8x8xf32>
    %c0_265 = arith.constant 0 : index
    %c0_266 = arith.constant 0 : index
    %c0_267 = arith.constant 0 : index
    %c3_268 = arith.constant 3 : index
    %c0_269 = arith.constant 0 : index
    %c8_270 = arith.constant 8 : index
    %117 = vector.load %arg3[%c0_265, %c0_266, %c0_267, %c3_268, %c0_269, %c8_270] : memref<1x1x2x8x8x32xf32, #tpu.memory_space<vmem>>, vector<1x1x1x1x8x8xf32>
    %118 = vector.shape_cast %117 : vector<1x1x1x1x8x8xf32> to vector<8x8xf32>
    %119 = vector.shape_cast %116 : vector<8x8xf32> to vector<1x1x1x1x8x8xf32>
    tpu.vector_store %arg3[%c0_265, %c0_266, %c0_267, %c3_268, %c0_269, %c8_270], %119 {strides = array<i32>} : memref<1x1x2x8x8x32xf32, #tpu.memory_space<vmem>>, vector<1x1x1x1x8x8xf32>,
    %c0_271 = arith.constant 0 : index
    %c0_272 = arith.constant 0 : index
    %c0_273 = arith.constant 0 : index
    %c0_274 = arith.constant 0 : index
    %c1_275 = arith.constant 1 : index
    %c4_276 = arith.constant 4 : index
    %c0_277 = arith.constant 0 : index
    %c0_278 = arith.constant 0 : index
    %120 = vector.load %arg2[%c0_271, %c0_272, %c0_273, %c0_274, %c1_275, %c4_276, %c0_277, %c0_278] : memref<1x1x2x2x2x8x8x8xf32, #tpu.memory_space<vmem>>, vector<1x1x1x1x1x1x8x8xf32>
    %121 = vector.shape_cast %120 : vector<1x1x1x1x1x1x8x8xf32> to vector<8x8xf32>
    %122 = tpu.transpose %121, [1, 0] : vector<8x8xf32> -> vector<8x8xf32>
    %c0_279 = arith.constant 0 : index
    %c0_280 = arith.constant 0 : index
    %c0_281 = arith.constant 0 : index
    %c4_282 = arith.constant 4 : index
    %c0_283 = arith.constant 0 : index
    %c8_284 = arith.constant 8 : index
    %123 = vector.load %arg3[%c0_279, %c0_280, %c0_281, %c4_282, %c0_283, %c8_284] : memref<1x1x2x8x8x32xf32, #tpu.memory_space<vmem>>, vector<1x1x1x1x8x8xf32>
    %124 = vector.shape_cast %123 : vector<1x1x1x1x8x8xf32> to vector<8x8xf32>
    %125 = vector.shape_cast %122 : vector<8x8xf32> to vector<1x1x1x1x8x8xf32>
    tpu.vector_store %arg3[%c0_279, %c0_280, %c0_281, %c4_282, %c0_283, %c8_284], %125 {strides = array<i32>} : memref<1x1x2x8x8x32xf32, #tpu.memory_space<vmem>>, vector<1x1x1x1x8x8xf32>,
    %c0_285 = arith.constant 0 : index
    %c0_286 = arith.constant 0 : index
    %c0_287 = arith.constant 0 : index
    %c0_288 = arith.constant 0 : index
    %c1_289 = arith.constant 1 : index
    %c5_290 = arith.constant 5 : index
    %c0_291 = arith.constant 0 : index
    %c0_292 = arith.constant 0 : index
    %126 = vector.load %arg2[%c0_285, %c0_286, %c0_287, %c0_288, %c1_289, %c5_290, %c0_291, %c0_292] : memref<1x1x2x2x2x8x8x8xf32, #tpu.memory_space<vmem>>, vector<1x1x1x1x1x1x8x8xf32>
    %127 = vector.shape_cast %126 : vector<1x1x1x1x1x1x8x8xf32> to vector<8x8xf32>
    %128 = tpu.transpose %127, [1, 0] : vector<8x8xf32> -> vector<8x8xf32>
    %c0_293 = arith.constant 0 : index
    %c0_294 = arith.constant 0 : index
    %c0_295 = arith.constant 0 : index
    %c5_296 = arith.constant 5 : index
    %c0_297 = arith.constant 0 : index
    %c8_298 = arith.constant 8 : index
    %129 = vector.load %arg3[%c0_293, %c0_294, %c0_295, %c5_296, %c0_297, %c8_298] : memref<1x1x2x8x8x32xf32, #tpu.memory_space<vmem>>, vector<1x1x1x1x8x8xf32>
    %130 = vector.shape_cast %129 : vector<1x1x1x1x8x8xf32> to vector<8x8xf32>
    %131 = vector.shape_cast %128 : vector<8x8xf32> to vector<1x1x1x1x8x8xf32>
    tpu.vector_store %arg3[%c0_293, %c0_294, %c0_295, %c5_296, %c0_297, %c8_298], %131 {strides = array<i32>} : memref<1x1x2x8x8x32xf32, #tpu.memory_space<vmem>>, vector<1x1x1x1x8x8xf32>,
    %c0_299 = arith.constant 0 : index
    %c0_300 = arith.constant 0 : index
    %c0_301 = arith.constant 0 : index
    %c0_302 = arith.constant 0 : index
    %c1_303 = arith.constant 1 : index
    %c6_304 = arith.constant 6 : index
    %c0_305 = arith.constant 0 : index
    %c0_306 = arith.constant 0 : index
    %132 = vector.load %arg2[%c0_299, %c0_300, %c0_301, %c0_302, %c1_303, %c6_304, %c0_305, %c0_306] : memref<1x1x2x2x2x8x8x8xf32, #tpu.memory_space<vmem>>, vector<1x1x1x1x1x1x8x8xf32>
    %133 = vector.shape_cast %132 : vector<1x1x1x1x1x1x8x8xf32> to vector<8x8xf32>
    %134 = tpu.transpose %133, [1, 0] : vector<8x8xf32> -> vector<8x8xf32>
    %c0_307 = arith.constant 0 : index
    %c0_308 = arith.constant 0 : index
    %c0_309 = arith.constant 0 : index
    %c6_310 = arith.constant 6 : index
    %c0_311 = arith.constant 0 : index
    %c8_312 = arith.constant 8 : index
    %135 = vector.load %arg3[%c0_307, %c0_308, %c0_309, %c6_310, %c0_311, %c8_312] : memref<1x1x2x8x8x32xf32, #tpu.memory_space<vmem>>, vector<1x1x1x1x8x8xf32>
    %136 = vector.shape_cast %135 : vector<1x1x1x1x8x8xf32> to vector<8x8xf32>
    %137 = vector.shape_cast %134 : vector<8x8xf32> to vector<1x1x1x1x8x8xf32>
    tpu.vector_store %arg3[%c0_307, %c0_308, %c0_309, %c6_310, %c0_311, %c8_312], %137 {strides = array<i32>} : memref<1x1x2x8x8x32xf32, #tpu.memory_space<vmem>>, vector<1x1x1x1x8x8xf32>,
    %c0_313 = arith.constant 0 : index
    %c0_314 = arith.constant 0 : index
    %c0_315 = arith.constant 0 : index
    %c0_316 = arith.constant 0 : index
    %c1_317 = arith.constant 1 : index
    %c7_318 = arith.constant 7 : index
    %c0_319 = arith.constant 0 : index
    %c0_320 = arith.constant 0 : index
    %138 = vector.load %arg2[%c0_313, %c0_314, %c0_315, %c0_316, %c1_317, %c7_318, %c0_319, %c0_320] : memref<1x1x2x2x2x8x8x8xf32, #tpu.memory_space<vmem>>, vector<1x1x1x1x1x1x8x8xf32>
    %139 = vector.shape_cast %138 : vector<1x1x1x1x1x1x8x8xf32> to vector<8x8xf32>
    %140 = tpu.transpose %139, [1, 0] : vector<8x8xf32> -> vector<8x8xf32>
    %c0_321 = arith.constant 0 : index
    %c0_322 = arith.constant 0 : index
    %c0_323 = arith.constant 0 : index
    %c7_324 = arith.constant 7 : index
    %c0_325 = arith.constant 0 : index
    %c8_326 = arith.constant 8 : index
    %141 = vector.load %arg3[%c0_321, %c0_322, %c0_323, %c7_324, %c0_325, %c8_326] : memref<1x1x2x8x8x32xf32, #tpu.memory_space<vmem>>, vector<1x1x1x1x8x8xf32>
    %142 = vector.shape_cast %141 : vector<1x1x1x1x8x8xf32> to vector<8x8xf32>
    %143 = vector.shape_cast %140 : vector<8x8xf32> to vector<1x1x1x1x8x8xf32>
    tpu.vector_store %arg3[%c0_321, %c0_322, %c0_323, %c7_324, %c0_325, %c8_326], %143 {strides = array<i32>} : memref<1x1x2x8x8x32xf32, #tpu.memory_space<vmem>>, vector<1x1x1x1x8x8xf32>,
    %c0_327 = arith.constant 0 : index
    %c0_328 = arith.constant 0 : index
    %c0_329 = arith.constant 0 : index
    %c1_330 = arith.constant 1 : index
    %c1_331 = arith.constant 1 : index
    %c0_332 = arith.constant 0 : index
    %c0_333 = arith.constant 0 : index
    %c0_334 = arith.constant 0 : index
    %144 = vector.load %arg2[%c0_327, %c0_328, %c0_329, %c1_330, %c1_331, %c0_332, %c0_333, %c0_334] : memref<1x1x2x2x2x8x8x8xf32, #tpu.memory_space<vmem>>, vector<1x1x1x1x1x1x8x8xf32>
    %145 = vector.shape_cast %144 : vector<1x1x1x1x1x1x8x8xf32> to vector<8x8xf32>
    %146 = tpu.transpose %145, [1, 0] : vector<8x8xf32> -> vector<8x8xf32>
    %c0_335 = arith.constant 0 : index
    %c0_336 = arith.constant 0 : index
    %c1_337 = arith.constant 1 : index
    %c0_338 = arith.constant 0 : index
    %c0_339 = arith.constant 0 : index
    %c8_340 = arith.constant 8 : index
    %147 = vector.load %arg3[%c0_335, %c0_336, %c1_337, %c0_338, %c0_339, %c8_340] : memref<1x1x2x8x8x32xf32, #tpu.memory_space<vmem>>, vector<1x1x1x1x8x8xf32>
    %148 = vector.shape_cast %147 : vector<1x1x1x1x8x8xf32> to vector<8x8xf32>
    %149 = vector.shape_cast %146 : vector<8x8xf32> to vector<1x1x1x1x8x8xf32>
    tpu.vector_store %arg3[%c0_335, %c0_336, %c1_337, %c0_338, %c0_339, %c8_340], %149 {strides = array<i32>} : memref<1x1x2x8x8x32xf32, #tpu.memory_space<vmem>>, vector<1x1x1x1x8x8xf32>,
    %c0_341 = arith.constant 0 : index
    %c0_342 = arith.constant 0 : index
    %c0_343 = arith.constant 0 : index
    %c1_344 = arith.constant 1 : index
    %c1_345 = arith.constant 1 : index
    %c1_346 = arith.constant 1 : index
    %c0_347 = arith.constant 0 : index
    %c0_348 = arith.constant 0 : index
    %150 = vector.load %arg2[%c0_341, %c0_342, %c0_343, %c1_344, %c1_345, %c1_346, %c0_347, %c0_348] : memref<1x1x2x2x2x8x8x8xf32, #tpu.memory_space<vmem>>, vector<1x1x1x1x1x1x8x8xf32>
    %151 = vector.shape_cast %150 : vector<1x1x1x1x1x1x8x8xf32> to vector<8x8xf32>
    %152 = tpu.transpose %151, [1, 0] : vector<8x8xf32> -> vector<8x8xf32>
    %c0_349 = arith.constant 0 : index
    %c0_350 = arith.constant 0 : index
    %c1_351 = arith.constant 1 : index
    %c1_352 = arith.constant 1 : index
    %c0_353 = arith.constant 0 : index
    %c8_354 = arith.constant 8 : index
    %153 = vector.load %arg3[%c0_349, %c0_350, %c1_351, %c1_352, %c0_353, %c8_354] : memref<1x1x2x8x8x32xf32, #tpu.memory_space<vmem>>, vector<1x1x1x1x8x8xf32>
    %154 = vector.shape_cast %153 : vector<1x1x1x1x8x8xf32> to vector<8x8xf32>
    %155 = vector.shape_cast %152 : vector<8x8xf32> to vector<1x1x1x1x8x8xf32>
    tpu.vector_store %arg3[%c0_349, %c0_350, %c1_351, %c1_352, %c0_353, %c8_354], %155 {strides = array<i32>} : memref<1x1x2x8x8x32xf32, #tpu.memory_space<vmem>>, vector<1x1x1x1x8x8xf32>,
    %c0_355 = arith.constant 0 : index
    %c0_356 = arith.constant 0 : index
    %c0_357 = arith.constant 0 : index
    %c1_358 = arith.constant 1 : index
    %c1_359 = arith.constant 1 : index
    %c2_360 = arith.constant 2 : index
    %c0_361 = arith.constant 0 : index
    %c0_362 = arith.constant 0 : index
    %156 = vector.load %arg2[%c0_355, %c0_356, %c0_357, %c1_358, %c1_359, %c2_360, %c0_361, %c0_362] : memref<1x1x2x2x2x8x8x8xf32, #tpu.memory_space<vmem>>, vector<1x1x1x1x1x1x8x8xf32>
    %157 = vector.shape_cast %156 : vector<1x1x1x1x1x1x8x8xf32> to vector<8x8xf32>
    %158 = tpu.transpose %157, [1, 0] : vector<8x8xf32> -> vector<8x8xf32>
    %c0_363 = arith.constant 0 : index
    %c0_364 = arith.constant 0 : index
    %c1_365 = arith.constant 1 : index
    %c2_366 = arith.constant 2 : index
    %c0_367 = arith.constant 0 : index
    %c8_368 = arith.constant 8 : index
    %159 = vector.load %arg3[%c0_363, %c0_364, %c1_365, %c2_366, %c0_367, %c8_368] : memref<1x1x2x8x8x32xf32, #tpu.memory_space<vmem>>, vector<1x1x1x1x8x8xf32>
    %160 = vector.shape_cast %159 : vector<1x1x1x1x8x8xf32> to vector<8x8xf32>
    %161 = vector.shape_cast %158 : vector<8x8xf32> to vector<1x1x1x1x8x8xf32>
    tpu.vector_store %arg3[%c0_363, %c0_364, %c1_365, %c2_366, %c0_367, %c8_368], %161 {strides = array<i32>} : memref<1x1x2x8x8x32xf32, #tpu.memory_space<vmem>>, vector<1x1x1x1x8x8xf32>,
    %c0_369 = arith.constant 0 : index
    %c0_370 = arith.constant 0 : index
    %c0_371 = arith.constant 0 : index
    %c1_372 = arith.constant 1 : index
    %c1_373 = arith.constant 1 : index
    %c3_374 = arith.constant 3 : index
    %c0_375 = arith.constant 0 : index
    %c0_376 = arith.constant 0 : index
    %162 = vector.load %arg2[%c0_369, %c0_370, %c0_371, %c1_372, %c1_373, %c3_374, %c0_375, %c0_376] : memref<1x1x2x2x2x8x8x8xf32, #tpu.memory_space<vmem>>, vector<1x1x1x1x1x1x8x8xf32>
    %163 = vector.shape_cast %162 : vector<1x1x1x1x1x1x8x8xf32> to vector<8x8xf32>
    %164 = tpu.transpose %163, [1, 0] : vector<8x8xf32> -> vector<8x8xf32>
    %c0_377 = arith.constant 0 : index
    %c0_378 = arith.constant 0 : index
    %c1_379 = arith.constant 1 : index
    %c3_380 = arith.constant 3 : index
    %c0_381 = arith.constant 0 : index
    %c8_382 = arith.constant 8 : index
    %165 = vector.load %arg3[%c0_377, %c0_378, %c1_379, %c3_380, %c0_381, %c8_382] : memref<1x1x2x8x8x32xf32, #tpu.memory_space<vmem>>, vector<1x1x1x1x8x8xf32>
    %166 = vector.shape_cast %165 : vector<1x1x1x1x8x8xf32> to vector<8x8xf32>
    %167 = vector.shape_cast %164 : vector<8x8xf32> to vector<1x1x1x1x8x8xf32>
    tpu.vector_store %arg3[%c0_377, %c0_378, %c1_379, %c3_380, %c0_381, %c8_382], %167 {strides = array<i32>} : memref<1x1x2x8x8x32xf32, #tpu.memory_space<vmem>>, vector<1x1x1x1x8x8xf32>,
    %c0_383 = arith.constant 0 : index
    %c0_384 = arith.constant 0 : index
    %c0_385 = arith.constant 0 : index
    %c1_386 = arith.constant 1 : index
    %c1_387 = arith.constant 1 : index
    %c4_388 = arith.constant 4 : index
    %c0_389 = arith.constant 0 : index
    %c0_390 = arith.constant 0 : index
    %168 = vector.load %arg2[%c0_383, %c0_384, %c0_385, %c1_386, %c1_387, %c4_388, %c0_389, %c0_390] : memref<1x1x2x2x2x8x8x8xf32, #tpu.memory_space<vmem>>, vector<1x1x1x1x1x1x8x8xf32>
    %169 = vector.shape_cast %168 : vector<1x1x1x1x1x1x8x8xf32> to vector<8x8xf32>
    %170 = tpu.transpose %169, [1, 0] : vector<8x8xf32> -> vector<8x8xf32>
    %c0_391 = arith.constant 0 : index
    %c0_392 = arith.constant 0 : index
    %c1_393 = arith.constant 1 : index
    %c4_394 = arith.constant 4 : index
    %c0_395 = arith.constant 0 : index
    %c8_396 = arith.constant 8 : index
    %171 = vector.load %arg3[%c0_391, %c0_392, %c1_393, %c4_394, %c0_395, %c8_396] : memref<1x1x2x8x8x32xf32, #tpu.memory_space<vmem>>, vector<1x1x1x1x8x8xf32>
    %172 = vector.shape_cast %171 : vector<1x1x1x1x8x8xf32> to vector<8x8xf32>
    %173 = vector.shape_cast %170 : vector<8x8xf32> to vector<1x1x1x1x8x8xf32>
    tpu.vector_store %arg3[%c0_391, %c0_392, %c1_393, %c4_394, %c0_395, %c8_396], %173 {strides = array<i32>} : memref<1x1x2x8x8x32xf32, #tpu.memory_space<vmem>>, vector<1x1x1x1x8x8xf32>,
    %c0_397 = arith.constant 0 : index
    %c0_398 = arith.constant 0 : index
    %c0_399 = arith.constant 0 : index
    %c1_400 = arith.constant 1 : index
    %c1_401 = arith.constant 1 : index
    %c5_402 = arith.constant 5 : index
    %c0_403 = arith.constant 0 : index
    %c0_404 = arith.constant 0 : index
    %174 = vector.load %arg2[%c0_397, %c0_398, %c0_399, %c1_400, %c1_401, %c5_402, %c0_403, %c0_404] : memref<1x1x2x2x2x8x8x8xf32, #tpu.memory_space<vmem>>, vector<1x1x1x1x1x1x8x8xf32>
    %175 = vector.shape_cast %174 : vector<1x1x1x1x1x1x8x8xf32> to vector<8x8xf32>
    %176 = tpu.transpose %175, [1, 0] : vector<8x8xf32> -> vector<8x8xf32>
    %c0_405 = arith.constant 0 : index
    %c0_406 = arith.constant 0 : index
    %c1_407 = arith.constant 1 : index
    %c5_408 = arith.constant 5 : index
    %c0_409 = arith.constant 0 : index
    %c8_410 = arith.constant 8 : index
    %177 = vector.load %arg3[%c0_405, %c0_406, %c1_407, %c5_408, %c0_409, %c8_410] : memref<1x1x2x8x8x32xf32, #tpu.memory_space<vmem>>, vector<1x1x1x1x8x8xf32>
    %178 = vector.shape_cast %177 : vector<1x1x1x1x8x8xf32> to vector<8x8xf32>
    %179 = vector.shape_cast %176 : vector<8x8xf32> to vector<1x1x1x1x8x8xf32>
    tpu.vector_store %arg3[%c0_405, %c0_406, %c1_407, %c5_408, %c0_409, %c8_410], %179 {strides = array<i32>} : memref<1x1x2x8x8x32xf32, #tpu.memory_space<vmem>>, vector<1x1x1x1x8x8xf32>,
    %c0_411 = arith.constant 0 : index
    %c0_412 = arith.constant 0 : index
    %c0_413 = arith.constant 0 : index
    %c1_414 = arith.constant 1 : index
    %c1_415 = arith.constant 1 : index
    %c6_416 = arith.constant 6 : index
    %c0_417 = arith.constant 0 : index
    %c0_418 = arith.constant 0 : index
    %180 = vector.load %arg2[%c0_411, %c0_412, %c0_413, %c1_414, %c1_415, %c6_416, %c0_417, %c0_418] : memref<1x1x2x2x2x8x8x8xf32, #tpu.memory_space<vmem>>, vector<1x1x1x1x1x1x8x8xf32>
    %181 = vector.shape_cast %180 : vector<1x1x1x1x1x1x8x8xf32> to vector<8x8xf32>
    %182 = tpu.transpose %181, [1, 0] : vector<8x8xf32> -> vector<8x8xf32>
    %c0_419 = arith.constant 0 : index
    %c0_420 = arith.constant 0 : index
    %c1_421 = arith.constant 1 : index
    %c6_422 = arith.constant 6 : index
    %c0_423 = arith.constant 0 : index
    %c8_424 = arith.constant 8 : index
    %183 = vector.load %arg3[%c0_419, %c0_420, %c1_421, %c6_422, %c0_423, %c8_424] : memref<1x1x2x8x8x32xf32, #tpu.memory_space<vmem>>, vector<1x1x1x1x8x8xf32>
    %184 = vector.shape_cast %183 : vector<1x1x1x1x8x8xf32> to vector<8x8xf32>
    %185 = vector.shape_cast %182 : vector<8x8xf32> to vector<1x1x1x1x8x8xf32>
    tpu.vector_store %arg3[%c0_419, %c0_420, %c1_421, %c6_422, %c0_423, %c8_424], %185 {strides = array<i32>} : memref<1x1x2x8x8x32xf32, #tpu.memory_space<vmem>>, vector<1x1x1x1x8x8xf32>,
    %c0_425 = arith.constant 0 : index
    %c0_426 = arith.constant 0 : index
    %c0_427 = arith.constant 0 : index
    %c1_428 = arith.constant 1 : index
    %c1_429 = arith.constant 1 : index
    %c7_430 = arith.constant 7 : index
    %c0_431 = arith.constant 0 : index
    %c0_432 = arith.constant 0 : index
    %186 = vector.load %arg2[%c0_425, %c0_426, %c0_427, %c1_428, %c1_429, %c7_430, %c0_431, %c0_432] : memref<1x1x2x2x2x8x8x8xf32, #tpu.memory_space<vmem>>, vector<1x1x1x1x1x1x8x8xf32>
    %187 = vector.shape_cast %186 : vector<1x1x1x1x1x1x8x8xf32> to vector<8x8xf32>
    %188 = tpu.transpose %187, [1, 0] : vector<8x8xf32> -> vector<8x8xf32>
    %c0_433 = arith.constant 0 : index
    %c0_434 = arith.constant 0 : index
    %c1_435 = arith.constant 1 : index
    %c7_436 = arith.constant 7 : index
    %c0_437 = arith.constant 0 : index
    %c8_438 = arith.constant 8 : index
    %189 = vector.load %arg3[%c0_433, %c0_434, %c1_435, %c7_436, %c0_437, %c8_438] : memref<1x1x2x8x8x32xf32, #tpu.memory_space<vmem>>, vector<1x1x1x1x8x8xf32>
    %190 = vector.shape_cast %189 : vector<1x1x1x1x8x8xf32> to vector<8x8xf32>
    %191 = vector.shape_cast %188 : vector<8x8xf32> to vector<1x1x1x1x8x8xf32>
    tpu.vector_store %arg3[%c0_433, %c0_434, %c1_435, %c7_436, %c0_437, %c8_438], %191 {strides = array<i32>} : memref<1x1x2x8x8x32xf32, #tpu.memory_space<vmem>>, vector<1x1x1x1x8x8xf32>,
    %c0_439 = arith.constant 0 : index
    %c0_440 = arith.constant 0 : index
    %c1_441 = arith.constant 1 : index
    %c0_442 = arith.constant 0 : index
    %c0_443 = arith.constant 0 : index
    %c0_444 = arith.constant 0 : index
    %c0_445 = arith.constant 0 : index
    %c0_446 = arith.constant 0 : index
    %192 = vector.load %arg2[%c0_439, %c0_440, %c1_441, %c0_442, %c0_443, %c0_444, %c0_445, %c0_446] : memref<1x1x2x2x2x8x8x8xf32, #tpu.memory_space<vmem>>, vector<1x1x1x1x1x1x8x8xf32>
    %193 = vector.shape_cast %192 : vector<1x1x1x1x1x1x8x8xf32> to vector<8x8xf32>
    %194 = tpu.transpose %193, [1, 0] : vector<8x8xf32> -> vector<8x8xf32>
    %c0_447 = arith.constant 0 : index
    %c0_448 = arith.constant 0 : index
    %c0_449 = arith.constant 0 : index
    %c0_450 = arith.constant 0 : index
    %c0_451 = arith.constant 0 : index
    %c16 = arith.constant 16 : index
    %195 = vector.load %arg3[%c0_447, %c0_448, %c0_449, %c0_450, %c0_451, %c16] : memref<1x1x2x8x8x32xf32, #tpu.memory_space<vmem>>, vector<1x1x1x1x8x8xf32>
    %196 = vector.shape_cast %195 : vector<1x1x1x1x8x8xf32> to vector<8x8xf32>
    %197 = vector.shape_cast %194 : vector<8x8xf32> to vector<1x1x1x1x8x8xf32>
    tpu.vector_store %arg3[%c0_447, %c0_448, %c0_449, %c0_450, %c0_451, %c16], %197 {strides = array<i32>} : memref<1x1x2x8x8x32xf32, #tpu.memory_space<vmem>>, vector<1x1x1x1x8x8xf32>,
    %c0_452 = arith.constant 0 : index
    %c0_453 = arith.constant 0 : index
    %c1_454 = arith.constant 1 : index
    %c0_455 = arith.constant 0 : index
    %c0_456 = arith.constant 0 : index
    %c1_457 = arith.constant 1 : index
    %c0_458 = arith.constant 0 : index
    %c0_459 = arith.constant 0 : index
    %198 = vector.load %arg2[%c0_452, %c0_453, %c1_454, %c0_455, %c0_456, %c1_457, %c0_458, %c0_459] : memref<1x1x2x2x2x8x8x8xf32, #tpu.memory_space<vmem>>, vector<1x1x1x1x1x1x8x8xf32>
    %199 = vector.shape_cast %198 : vector<1x1x1x1x1x1x8x8xf32> to vector<8x8xf32>
    %200 = tpu.transpose %199, [1, 0] : vector<8x8xf32> -> vector<8x8xf32>
    %c0_460 = arith.constant 0 : index
    %c0_461 = arith.constant 0 : index
    %c0_462 = arith.constant 0 : index
    %c1_463 = arith.constant 1 : index
    %c0_464 = arith.constant 0 : index
    %c16_465 = arith.constant 16 : index
    %201 = vector.load %arg3[%c0_460, %c0_461, %c0_462, %c1_463, %c0_464, %c16_465] : memref<1x1x2x8x8x32xf32, #tpu.memory_space<vmem>>, vector<1x1x1x1x8x8xf32>
    %202 = vector.shape_cast %201 : vector<1x1x1x1x8x8xf32> to vector<8x8xf32>
    %203 = vector.shape_cast %200 : vector<8x8xf32> to vector<1x1x1x1x8x8xf32>
    tpu.vector_store %arg3[%c0_460, %c0_461, %c0_462, %c1_463, %c0_464, %c16_465], %203 {strides = array<i32>} : memref<1x1x2x8x8x32xf32, #tpu.memory_space<vmem>>, vector<1x1x1x1x8x8xf32>,
    %c0_466 = arith.constant 0 : index
    %c0_467 = arith.constant 0 : index
    %c1_468 = arith.constant 1 : index
    %c0_469 = arith.constant 0 : index
    %c0_470 = arith.constant 0 : index
    %c2_471 = arith.constant 2 : index
    %c0_472 = arith.constant 0 : index
    %c0_473 = arith.constant 0 : index
    %204 = vector.load %arg2[%c0_466, %c0_467, %c1_468, %c0_469, %c0_470, %c2_471, %c0_472, %c0_473] : memref<1x1x2x2x2x8x8x8xf32, #tpu.memory_space<vmem>>, vector<1x1x1x1x1x1x8x8xf32>
    %205 = vector.shape_cast %204 : vector<1x1x1x1x1x1x8x8xf32> to vector<8x8xf32>
    %206 = tpu.transpose %205, [1, 0] : vector<8x8xf32> -> vector<8x8xf32>
    %c0_474 = arith.constant 0 : index
    %c0_475 = arith.constant 0 : index
    %c0_476 = arith.constant 0 : index
    %c2_477 = arith.constant 2 : index
    %c0_478 = arith.constant 0 : index
    %c16_479 = arith.constant 16 : index
    %207 = vector.load %arg3[%c0_474, %c0_475, %c0_476, %c2_477, %c0_478, %c16_479] : memref<1x1x2x8x8x32xf32, #tpu.memory_space<vmem>>, vector<1x1x1x1x8x8xf32>
    %208 = vector.shape_cast %207 : vector<1x1x1x1x8x8xf32> to vector<8x8xf32>
    %209 = vector.shape_cast %206 : vector<8x8xf32> to vector<1x1x1x1x8x8xf32>
    tpu.vector_store %arg3[%c0_474, %c0_475, %c0_476, %c2_477, %c0_478, %c16_479], %209 {strides = array<i32>} : memref<1x1x2x8x8x32xf32, #tpu.memory_space<vmem>>, vector<1x1x1x1x8x8xf32>,
    %c0_480 = arith.constant 0 : index
    %c0_481 = arith.constant 0 : index
    %c1_482 = arith.constant 1 : index
    %c0_483 = arith.constant 0 : index
    %c0_484 = arith.constant 0 : index
    %c3_485 = arith.constant 3 : index
    %c0_486 = arith.constant 0 : index
    %c0_487 = arith.constant 0 : index
    %210 = vector.load %arg2[%c0_480, %c0_481, %c1_482, %c0_483, %c0_484, %c3_485, %c0_486, %c0_487] : memref<1x1x2x2x2x8x8x8xf32, #tpu.memory_space<vmem>>, vector<1x1x1x1x1x1x8x8xf32>
    %211 = vector.shape_cast %210 : vector<1x1x1x1x1x1x8x8xf32> to vector<8x8xf32>
    %212 = tpu.transpose %211, [1, 0] : vector<8x8xf32> -> vector<8x8xf32>
    %c0_488 = arith.constant 0 : index
    %c0_489 = arith.constant 0 : index
    %c0_490 = arith.constant 0 : index
    %c3_491 = arith.constant 3 : index
    %c0_492 = arith.constant 0 : index
    %c16_493 = arith.constant 16 : index
    %213 = vector.load %arg3[%c0_488, %c0_489, %c0_490, %c3_491, %c0_492, %c16_493] : memref<1x1x2x8x8x32xf32, #tpu.memory_space<vmem>>, vector<1x1x1x1x8x8xf32>
    %214 = vector.shape_cast %213 : vector<1x1x1x1x8x8xf32> to vector<8x8xf32>
    %215 = vector.shape_cast %212 : vector<8x8xf32> to vector<1x1x1x1x8x8xf32>
    tpu.vector_store %arg3[%c0_488, %c0_489, %c0_490, %c3_491, %c0_492, %c16_493], %215 {strides = array<i32>} : memref<1x1x2x8x8x32xf32, #tpu.memory_space<vmem>>, vector<1x1x1x1x8x8xf32>,
    %c0_494 = arith.constant 0 : index
    %c0_495 = arith.constant 0 : index
    %c1_496 = arith.constant 1 : index
    %c0_497 = arith.constant 0 : index
    %c0_498 = arith.constant 0 : index
    %c4_499 = arith.constant 4 : index
    %c0_500 = arith.constant 0 : index
    %c0_501 = arith.constant 0 : index
    %216 = vector.load %arg2[%c0_494, %c0_495, %c1_496, %c0_497, %c0_498, %c4_499, %c0_500, %c0_501] : memref<1x1x2x2x2x8x8x8xf32, #tpu.memory_space<vmem>>, vector<1x1x1x1x1x1x8x8xf32>
    %217 = vector.shape_cast %216 : vector<1x1x1x1x1x1x8x8xf32> to vector<8x8xf32>
    %218 = tpu.transpose %217, [1, 0] : vector<8x8xf32> -> vector<8x8xf32>
    %c0_502 = arith.constant 0 : index
    %c0_503 = arith.constant 0 : index
    %c0_504 = arith.constant 0 : index
    %c4_505 = arith.constant 4 : index
    %c0_506 = arith.constant 0 : index
    %c16_507 = arith.constant 16 : index
    %219 = vector.load %arg3[%c0_502, %c0_503, %c0_504, %c4_505, %c0_506, %c16_507] : memref<1x1x2x8x8x32xf32, #tpu.memory_space<vmem>>, vector<1x1x1x1x8x8xf32>
    %220 = vector.shape_cast %219 : vector<1x1x1x1x8x8xf32> to vector<8x8xf32>
    %221 = vector.shape_cast %218 : vector<8x8xf32> to vector<1x1x1x1x8x8xf32>
    tpu.vector_store %arg3[%c0_502, %c0_503, %c0_504, %c4_505, %c0_506, %c16_507], %221 {strides = array<i32>} : memref<1x1x2x8x8x32xf32, #tpu.memory_space<vmem>>, vector<1x1x1x1x8x8xf32>,
    %c0_508 = arith.constant 0 : index
    %c0_509 = arith.constant 0 : index
    %c1_510 = arith.constant 1 : index
    %c0_511 = arith.constant 0 : index
    %c0_512 = arith.constant 0 : index
    %c5_513 = arith.constant 5 : index
    %c0_514 = arith.constant 0 : index
    %c0_515 = arith.constant 0 : index
    %222 = vector.load %arg2[%c0_508, %c0_509, %c1_510, %c0_511, %c0_512, %c5_513, %c0_514, %c0_515] : memref<1x1x2x2x2x8x8x8xf32, #tpu.memory_space<vmem>>, vector<1x1x1x1x1x1x8x8xf32>
    %223 = vector.shape_cast %222 : vector<1x1x1x1x1x1x8x8xf32> to vector<8x8xf32>
    %224 = tpu.transpose %223, [1, 0] : vector<8x8xf32> -> vector<8x8xf32>
    %c0_516 = arith.constant 0 : index
    %c0_517 = arith.constant 0 : index
    %c0_518 = arith.constant 0 : index
    %c5_519 = arith.constant 5 : index
    %c0_520 = arith.constant 0 : index
    %c16_521 = arith.constant 16 : index
    %225 = vector.load %arg3[%c0_516, %c0_517, %c0_518, %c5_519, %c0_520, %c16_521] : memref<1x1x2x8x8x32xf32, #tpu.memory_space<vmem>>, vector<1x1x1x1x8x8xf32>
    %226 = vector.shape_cast %225 : vector<1x1x1x1x8x8xf32> to vector<8x8xf32>
    %227 = vector.shape_cast %224 : vector<8x8xf32> to vector<1x1x1x1x8x8xf32>
    tpu.vector_store %arg3[%c0_516, %c0_517, %c0_518, %c5_519, %c0_520, %c16_521], %227 {strides = array<i32>} : memref<1x1x2x8x8x32xf32, #tpu.memory_space<vmem>>, vector<1x1x1x1x8x8xf32>,
    %c0_522 = arith.constant 0 : index
    %c0_523 = arith.constant 0 : index
    %c1_524 = arith.constant 1 : index
    %c0_525 = arith.constant 0 : index
    %c0_526 = arith.constant 0 : index
    %c6_527 = arith.constant 6 : index
    %c0_528 = arith.constant 0 : index
    %c0_529 = arith.constant 0 : index
    %228 = vector.load %arg2[%c0_522, %c0_523, %c1_524, %c0_525, %c0_526, %c6_527, %c0_528, %c0_529] : memref<1x1x2x2x2x8x8x8xf32, #tpu.memory_space<vmem>>, vector<1x1x1x1x1x1x8x8xf32>
    %229 = vector.shape_cast %228 : vector<1x1x1x1x1x1x8x8xf32> to vector<8x8xf32>
    %230 = tpu.transpose %229, [1, 0] : vector<8x8xf32> -> vector<8x8xf32>
    %c0_530 = arith.constant 0 : index
    %c0_531 = arith.constant 0 : index
    %c0_532 = arith.constant 0 : index
    %c6_533 = arith.constant 6 : index
    %c0_534 = arith.constant 0 : index
    %c16_535 = arith.constant 16 : index
    %231 = vector.load %arg3[%c0_530, %c0_531, %c0_532, %c6_533, %c0_534, %c16_535] : memref<1x1x2x8x8x32xf32, #tpu.memory_space<vmem>>, vector<1x1x1x1x8x8xf32>
    %232 = vector.shape_cast %231 : vector<1x1x1x1x8x8xf32> to vector<8x8xf32>
    %233 = vector.shape_cast %230 : vector<8x8xf32> to vector<1x1x1x1x8x8xf32>
    tpu.vector_store %arg3[%c0_530, %c0_531, %c0_532, %c6_533, %c0_534, %c16_535], %233 {strides = array<i32>} : memref<1x1x2x8x8x32xf32, #tpu.memory_space<vmem>>, vector<1x1x1x1x8x8xf32>,
    %c0_536 = arith.constant 0 : index
    %c0_537 = arith.constant 0 : index
    %c1_538 = arith.constant 1 : index
    %c0_539 = arith.constant 0 : index
    %c0_540 = arith.constant 0 : index
    %c7_541 = arith.constant 7 : index
    %c0_542 = arith.constant 0 : index
    %c0_543 = arith.constant 0 : index
    %234 = vector.load %arg2[%c0_536, %c0_537, %c1_538, %c0_539, %c0_540, %c7_541, %c0_542, %c0_543] : memref<1x1x2x2x2x8x8x8xf32, #tpu.memory_space<vmem>>, vector<1x1x1x1x1x1x8x8xf32>
    %235 = vector.shape_cast %234 : vector<1x1x1x1x1x1x8x8xf32> to vector<8x8xf32>
    %236 = tpu.transpose %235, [1, 0] : vector<8x8xf32> -> vector<8x8xf32>
    %c0_544 = arith.constant 0 : index
    %c0_545 = arith.constant 0 : index
    %c0_546 = arith.constant 0 : index
    %c7_547 = arith.constant 7 : index
    %c0_548 = arith.constant 0 : index
    %c16_549 = arith.constant 16 : index
    %237 = vector.load %arg3[%c0_544, %c0_545, %c0_546, %c7_547, %c0_548, %c16_549] : memref<1x1x2x8x8x32xf32, #tpu.memory_space<vmem>>, vector<1x1x1x1x8x8xf32>
    %238 = vector.shape_cast %237 : vector<1x1x1x1x8x8xf32> to vector<8x8xf32>
    %239 = vector.shape_cast %236 : vector<8x8xf32> to vector<1x1x1x1x8x8xf32>
    tpu.vector_store %arg3[%c0_544, %c0_545, %c0_546, %c7_547, %c0_548, %c16_549], %239 {strides = array<i32>} : memref<1x1x2x8x8x32xf32, #tpu.memory_space<vmem>>, vector<1x1x1x1x8x8xf32>,
    %c0_550 = arith.constant 0 : index
    %c0_551 = arith.constant 0 : index
    %c1_552 = arith.constant 1 : index
    %c1_553 = arith.constant 1 : index
    %c0_554 = arith.constant 0 : index
    %c0_555 = arith.constant 0 : index
    %c0_556 = arith.constant 0 : index
    %c0_557 = arith.constant 0 : index
    %240 = vector.load %arg2[%c0_550, %c0_551, %c1_552, %c1_553, %c0_554, %c0_555, %c0_556, %c0_557] : memref<1x1x2x2x2x8x8x8xf32, #tpu.memory_space<vmem>>, vector<1x1x1x1x1x1x8x8xf32>
    %241 = vector.shape_cast %240 : vector<1x1x1x1x1x1x8x8xf32> to vector<8x8xf32>
    %242 = tpu.transpose %241, [1, 0] : vector<8x8xf32> -> vector<8x8xf32>
    %c0_558 = arith.constant 0 : index
    %c0_559 = arith.constant 0 : index
    %c1_560 = arith.constant 1 : index
    %c0_561 = arith.constant 0 : index
    %c0_562 = arith.constant 0 : index
    %c16_563 = arith.constant 16 : index
    %243 = vector.load %arg3[%c0_558, %c0_559, %c1_560, %c0_561, %c0_562, %c16_563] : memref<1x1x2x8x8x32xf32, #tpu.memory_space<vmem>>, vector<1x1x1x1x8x8xf32>
    %244 = vector.shape_cast %243 : vector<1x1x1x1x8x8xf32> to vector<8x8xf32>
    %245 = vector.shape_cast %242 : vector<8x8xf32> to vector<1x1x1x1x8x8xf32>
    tpu.vector_store %arg3[%c0_558, %c0_559, %c1_560, %c0_561, %c0_562, %c16_563], %245 {strides = array<i32>} : memref<1x1x2x8x8x32xf32, #tpu.memory_space<vmem>>, vector<1x1x1x1x8x8xf32>,
    %c0_564 = arith.constant 0 : index
    %c0_565 = arith.constant 0 : index
    %c1_566 = arith.constant 1 : index
    %c1_567 = arith.constant 1 : index
    %c0_568 = arith.constant 0 : index
    %c1_569 = arith.constant 1 : index
    %c0_570 = arith.constant 0 : index
    %c0_571 = arith.constant 0 : index
    %246 = vector.load %arg2[%c0_564, %c0_565, %c1_566, %c1_567, %c0_568, %c1_569, %c0_570, %c0_571] : memref<1x1x2x2x2x8x8x8xf32, #tpu.memory_space<vmem>>, vector<1x1x1x1x1x1x8x8xf32>
    %247 = vector.shape_cast %246 : vector<1x1x1x1x1x1x8x8xf32> to vector<8x8xf32>
    %248 = tpu.transpose %247, [1, 0] : vector<8x8xf32> -> vector<8x8xf32>
    %c0_572 = arith.constant 0 : index
    %c0_573 = arith.constant 0 : index
    %c1_574 = arith.constant 1 : index
    %c1_575 = arith.constant 1 : index
    %c0_576 = arith.constant 0 : index
    %c16_577 = arith.constant 16 : index
    %249 = vector.load %arg3[%c0_572, %c0_573, %c1_574, %c1_575, %c0_576, %c16_577] : memref<1x1x2x8x8x32xf32, #tpu.memory_space<vmem>>, vector<1x1x1x1x8x8xf32>
    %250 = vector.shape_cast %249 : vector<1x1x1x1x8x8xf32> to vector<8x8xf32>
    %251 = vector.shape_cast %248 : vector<8x8xf32> to vector<1x1x1x1x8x8xf32>
    tpu.vector_store %arg3[%c0_572, %c0_573, %c1_574, %c1_575, %c0_576, %c16_577], %251 {strides = array<i32>} : memref<1x1x2x8x8x32xf32, #tpu.memory_space<vmem>>, vector<1x1x1x1x8x8xf32>,
    %c0_578 = arith.constant 0 : index
    %c0_579 = arith.constant 0 : index
    %c1_580 = arith.constant 1 : index
    %c1_581 = arith.constant 1 : index
    %c0_582 = arith.constant 0 : index
    %c2_583 = arith.constant 2 : index
    %c0_584 = arith.constant 0 : index
    %c0_585 = arith.constant 0 : index
    %252 = vector.load %arg2[%c0_578, %c0_579, %c1_580, %c1_581, %c0_582, %c2_583, %c0_584, %c0_585] : memref<1x1x2x2x2x8x8x8xf32, #tpu.memory_space<vmem>>, vector<1x1x1x1x1x1x8x8xf32>
    %253 = vector.shape_cast %252 : vector<1x1x1x1x1x1x8x8xf32> to vector<8x8xf32>
    %254 = tpu.transpose %253, [1, 0] : vector<8x8xf32> -> vector<8x8xf32>
    %c0_586 = arith.constant 0 : index
    %c0_587 = arith.constant 0 : index
    %c1_588 = arith.constant 1 : index
    %c2_589 = arith.constant 2 : index
    %c0_590 = arith.constant 0 : index
    %c16_591 = arith.constant 16 : index
    %255 = vector.load %arg3[%c0_586, %c0_587, %c1_588, %c2_589, %c0_590, %c16_591] : memref<1x1x2x8x8x32xf32, #tpu.memory_space<vmem>>, vector<1x1x1x1x8x8xf32>
    %256 = vector.shape_cast %255 : vector<1x1x1x1x8x8xf32> to vector<8x8xf32>
    %257 = vector.shape_cast %254 : vector<8x8xf32> to vector<1x1x1x1x8x8xf32>
    tpu.vector_store %arg3[%c0_586, %c0_587, %c1_588, %c2_589, %c0_590, %c16_591], %257 {strides = array<i32>} : memref<1x1x2x8x8x32xf32, #tpu.memory_space<vmem>>, vector<1x1x1x1x8x8xf32>,
    %c0_592 = arith.constant 0 : index
    %c0_593 = arith.constant 0 : index
    %c1_594 = arith.constant 1 : index
    %c1_595 = arith.constant 1 : index
    %c0_596 = arith.constant 0 : index
    %c3_597 = arith.constant 3 : index
    %c0_598 = arith.constant 0 : index
    %c0_599 = arith.constant 0 : index
    %258 = vector.load %arg2[%c0_592, %c0_593, %c1_594, %c1_595, %c0_596, %c3_597, %c0_598, %c0_599] : memref<1x1x2x2x2x8x8x8xf32, #tpu.memory_space<vmem>>, vector<1x1x1x1x1x1x8x8xf32>
    %259 = vector.shape_cast %258 : vector<1x1x1x1x1x1x8x8xf32> to vector<8x8xf32>
    %260 = tpu.transpose %259, [1, 0] : vector<8x8xf32> -> vector<8x8xf32>
    %c0_600 = arith.constant 0 : index
    %c0_601 = arith.constant 0 : index
    %c1_602 = arith.constant 1 : index
    %c3_603 = arith.constant 3 : index
    %c0_604 = arith.constant 0 : index
    %c16_605 = arith.constant 16 : index
    %261 = vector.load %arg3[%c0_600, %c0_601, %c1_602, %c3_603, %c0_604, %c16_605] : memref<1x1x2x8x8x32xf32, #tpu.memory_space<vmem>>, vector<1x1x1x1x8x8xf32>
    %262 = vector.shape_cast %261 : vector<1x1x1x1x8x8xf32> to vector<8x8xf32>
    %263 = vector.shape_cast %260 : vector<8x8xf32> to vector<1x1x1x1x8x8xf32>
    tpu.vector_store %arg3[%c0_600, %c0_601, %c1_602, %c3_603, %c0_604, %c16_605], %263 {strides = array<i32>} : memref<1x1x2x8x8x32xf32, #tpu.memory_space<vmem>>, vector<1x1x1x1x8x8xf32>,
    %c0_606 = arith.constant 0 : index
    %c0_607 = arith.constant 0 : index
    %c1_608 = arith.constant 1 : index
    %c1_609 = arith.constant 1 : index
    %c0_610 = arith.constant 0 : index
    %c4_611 = arith.constant 4 : index
    %c0_612 = arith.constant 0 : index
    %c0_613 = arith.constant 0 : index
    %264 = vector.load %arg2[%c0_606, %c0_607, %c1_608, %c1_609, %c0_610, %c4_611, %c0_612, %c0_613] : memref<1x1x2x2x2x8x8x8xf32, #tpu.memory_space<vmem>>, vector<1x1x1x1x1x1x8x8xf32>
    %265 = vector.shape_cast %264 : vector<1x1x1x1x1x1x8x8xf32> to vector<8x8xf32>
    %266 = tpu.transpose %265, [1, 0] : vector<8x8xf32> -> vector<8x8xf32>
    %c0_614 = arith.constant 0 : index
    %c0_615 = arith.constant 0 : index
    %c1_616 = arith.constant 1 : index
    %c4_617 = arith.constant 4 : index
    %c0_618 = arith.constant 0 : index
    %c16_619 = arith.constant 16 : index
    %267 = vector.load %arg3[%c0_614, %c0_615, %c1_616, %c4_617, %c0_618, %c16_619] : memref<1x1x2x8x8x32xf32, #tpu.memory_space<vmem>>, vector<1x1x1x1x8x8xf32>
    %268 = vector.shape_cast %267 : vector<1x1x1x1x8x8xf32> to vector<8x8xf32>
    %269 = vector.shape_cast %266 : vector<8x8xf32> to vector<1x1x1x1x8x8xf32>
    tpu.vector_store %arg3[%c0_614, %c0_615, %c1_616, %c4_617, %c0_618, %c16_619], %269 {strides = array<i32>} : memref<1x1x2x8x8x32xf32, #tpu.memory_space<vmem>>, vector<1x1x1x1x8x8xf32>,
    %c0_620 = arith.constant 0 : index
    %c0_621 = arith.constant 0 : index
    %c1_622 = arith.constant 1 : index
    %c1_623 = arith.constant 1 : index
    %c0_624 = arith.constant 0 : index
    %c5_625 = arith.constant 5 : index
    %c0_626 = arith.constant 0 : index
    %c0_627 = arith.constant 0 : index
    %270 = vector.load %arg2[%c0_620, %c0_621, %c1_622, %c1_623, %c0_624, %c5_625, %c0_626, %c0_627] : memref<1x1x2x2x2x8x8x8xf32, #tpu.memory_space<vmem>>, vector<1x1x1x1x1x1x8x8xf32>
    %271 = vector.shape_cast %270 : vector<1x1x1x1x1x1x8x8xf32> to vector<8x8xf32>
    %272 = tpu.transpose %271, [1, 0] : vector<8x8xf32> -> vector<8x8xf32>
    %c0_628 = arith.constant 0 : index
    %c0_629 = arith.constant 0 : index
    %c1_630 = arith.constant 1 : index
    %c5_631 = arith.constant 5 : index
    %c0_632 = arith.constant 0 : index
    %c16_633 = arith.constant 16 : index
    %273 = vector.load %arg3[%c0_628, %c0_629, %c1_630, %c5_631, %c0_632, %c16_633] : memref<1x1x2x8x8x32xf32, #tpu.memory_space<vmem>>, vector<1x1x1x1x8x8xf32>
    %274 = vector.shape_cast %273 : vector<1x1x1x1x8x8xf32> to vector<8x8xf32>
    %275 = vector.shape_cast %272 : vector<8x8xf32> to vector<1x1x1x1x8x8xf32>
    tpu.vector_store %arg3[%c0_628, %c0_629, %c1_630, %c5_631, %c0_632, %c16_633], %275 {strides = array<i32>} : memref<1x1x2x8x8x32xf32, #tpu.memory_space<vmem>>, vector<1x1x1x1x8x8xf32>,
    %c0_634 = arith.constant 0 : index
    %c0_635 = arith.constant 0 : index
    %c1_636 = arith.constant 1 : index
    %c1_637 = arith.constant 1 : index
    %c0_638 = arith.constant 0 : index
    %c6_639 = arith.constant 6 : index
    %c0_640 = arith.constant 0 : index
    %c0_641 = arith.constant 0 : index
    %276 = vector.load %arg2[%c0_634, %c0_635, %c1_636, %c1_637, %c0_638, %c6_639, %c0_640, %c0_641] : memref<1x1x2x2x2x8x8x8xf32, #tpu.memory_space<vmem>>, vector<1x1x1x1x1x1x8x8xf32>
    %277 = vector.shape_cast %276 : vector<1x1x1x1x1x1x8x8xf32> to vector<8x8xf32>
    %278 = tpu.transpose %277, [1, 0] : vector<8x8xf32> -> vector<8x8xf32>
    %c0_642 = arith.constant 0 : index
    %c0_643 = arith.constant 0 : index
    %c1_644 = arith.constant 1 : index
    %c6_645 = arith.constant 6 : index
    %c0_646 = arith.constant 0 : index
    %c16_647 = arith.constant 16 : index
    %279 = vector.load %arg3[%c0_642, %c0_643, %c1_644, %c6_645, %c0_646, %c16_647] : memref<1x1x2x8x8x32xf32, #tpu.memory_space<vmem>>, vector<1x1x1x1x8x8xf32>
    %280 = vector.shape_cast %279 : vector<1x1x1x1x8x8xf32> to vector<8x8xf32>
    %281 = vector.shape_cast %278 : vector<8x8xf32> to vector<1x1x1x1x8x8xf32>
    tpu.vector_store %arg3[%c0_642, %c0_643, %c1_644, %c6_645, %c0_646, %c16_647], %281 {strides = array<i32>} : memref<1x1x2x8x8x32xf32, #tpu.memory_space<vmem>>, vector<1x1x1x1x8x8xf32>,
    %c0_648 = arith.constant 0 : index
    %c0_649 = arith.constant 0 : index
    %c1_650 = arith.constant 1 : index
    %c1_651 = arith.constant 1 : index
    %c0_652 = arith.constant 0 : index
    %c7_653 = arith.constant 7 : index
    %c0_654 = arith.constant 0 : index
    %c0_655 = arith.constant 0 : index
    %282 = vector.load %arg2[%c0_648, %c0_649, %c1_650, %c1_651, %c0_652, %c7_653, %c0_654, %c0_655] : memref<1x1x2x2x2x8x8x8xf32, #tpu.memory_space<vmem>>, vector<1x1x1x1x1x1x8x8xf32>
    %283 = vector.shape_cast %282 : vector<1x1x1x1x1x1x8x8xf32> to vector<8x8xf32>
    %284 = tpu.transpose %283, [1, 0] : vector<8x8xf32> -> vector<8x8xf32>
    %c0_656 = arith.constant 0 : index
    %c0_657 = arith.constant 0 : index
    %c1_658 = arith.constant 1 : index
    %c7_659 = arith.constant 7 : index
    %c0_660 = arith.constant 0 : index
    %c16_661 = arith.constant 16 : index
    %285 = vector.load %arg3[%c0_656, %c0_657, %c1_658, %c7_659, %c0_660, %c16_661] : memref<1x1x2x8x8x32xf32, #tpu.memory_space<vmem>>, vector<1x1x1x1x8x8xf32>
    %286 = vector.shape_cast %285 : vector<1x1x1x1x8x8xf32> to vector<8x8xf32>
    %287 = vector.shape_cast %284 : vector<8x8xf32> to vector<1x1x1x1x8x8xf32>
    tpu.vector_store %arg3[%c0_656, %c0_657, %c1_658, %c7_659, %c0_660, %c16_661], %287 {strides = array<i32>} : memref<1x1x2x8x8x32xf32, #tpu.memory_space<vmem>>, vector<1x1x1x1x8x8xf32>,
    %c0_662 = arith.constant 0 : index
    %c0_663 = arith.constant 0 : index
    %c1_664 = arith.constant 1 : index
    %c0_665 = arith.constant 0 : index
    %c1_666 = arith.constant 1 : index
    %c0_667 = arith.constant 0 : index
    %c0_668 = arith.constant 0 : index
    %c0_669 = arith.constant 0 : index
    %288 = vector.load %arg2[%c0_662, %c0_663, %c1_664, %c0_665, %c1_666, %c0_667, %c0_668, %c0_669] : memref<1x1x2x2x2x8x8x8xf32, #tpu.memory_space<vmem>>, vector<1x1x1x1x1x1x8x8xf32>
    %289 = vector.shape_cast %288 : vector<1x1x1x1x1x1x8x8xf32> to vector<8x8xf32>
    %290 = tpu.transpose %289, [1, 0] : vector<8x8xf32> -> vector<8x8xf32>
    %c0_670 = arith.constant 0 : index
    %c0_671 = arith.constant 0 : index
    %c0_672 = arith.constant 0 : index
    %c0_673 = arith.constant 0 : index
    %c0_674 = arith.constant 0 : index
    %c24 = arith.constant 24 : index
    %291 = vector.load %arg3[%c0_670, %c0_671, %c0_672, %c0_673, %c0_674, %c24] : memref<1x1x2x8x8x32xf32, #tpu.memory_space<vmem>>, vector<1x1x1x1x8x8xf32>
    %292 = vector.shape_cast %291 : vector<1x1x1x1x8x8xf32> to vector<8x8xf32>
    %293 = vector.shape_cast %290 : vector<8x8xf32> to vector<1x1x1x1x8x8xf32>
    tpu.vector_store %arg3[%c0_670, %c0_671, %c0_672, %c0_673, %c0_674, %c24], %293 {strides = array<i32>} : memref<1x1x2x8x8x32xf32, #tpu.memory_space<vmem>>, vector<1x1x1x1x8x8xf32>,
    %c0_675 = arith.constant 0 : index
    %c0_676 = arith.constant 0 : index
    %c1_677 = arith.constant 1 : index
    %c0_678 = arith.constant 0 : index
    %c1_679 = arith.constant 1 : index
    %c1_680 = arith.constant 1 : index
    %c0_681 = arith.constant 0 : index
    %c0_682 = arith.constant 0 : index
    %294 = vector.load %arg2[%c0_675, %c0_676, %c1_677, %c0_678, %c1_679, %c1_680, %c0_681, %c0_682] : memref<1x1x2x2x2x8x8x8xf32, #tpu.memory_space<vmem>>, vector<1x1x1x1x1x1x8x8xf32>
    %295 = vector.shape_cast %294 : vector<1x1x1x1x1x1x8x8xf32> to vector<8x8xf32>
    %296 = tpu.transpose %295, [1, 0] : vector<8x8xf32> -> vector<8x8xf32>
    %c0_683 = arith.constant 0 : index
    %c0_684 = arith.constant 0 : index
    %c0_685 = arith.constant 0 : index
    %c1_686 = arith.constant 1 : index
    %c0_687 = arith.constant 0 : index
    %c24_688 = arith.constant 24 : index
    %297 = vector.load %arg3[%c0_683, %c0_684, %c0_685, %c1_686, %c0_687, %c24_688] : memref<1x1x2x8x8x32xf32, #tpu.memory_space<vmem>>, vector<1x1x1x1x8x8xf32>
    %298 = vector.shape_cast %297 : vector<1x1x1x1x8x8xf32> to vector<8x8xf32>
    %299 = vector.shape_cast %296 : vector<8x8xf32> to vector<1x1x1x1x8x8xf32>
    tpu.vector_store %arg3[%c0_683, %c0_684, %c0_685, %c1_686, %c0_687, %c24_688], %299 {strides = array<i32>} : memref<1x1x2x8x8x32xf32, #tpu.memory_space<vmem>>, vector<1x1x1x1x8x8xf32>,
    %c0_689 = arith.constant 0 : index
    %c0_690 = arith.constant 0 : index
    %c1_691 = arith.constant 1 : index
    %c0_692 = arith.constant 0 : index
    %c1_693 = arith.constant 1 : index
    %c2_694 = arith.constant 2 : index
    %c0_695 = arith.constant 0 : index
    %c0_696 = arith.constant 0 : index
    %300 = vector.load %arg2[%c0_689, %c0_690, %c1_691, %c0_692, %c1_693, %c2_694, %c0_695, %c0_696] : memref<1x1x2x2x2x8x8x8xf32, #tpu.memory_space<vmem>>, vector<1x1x1x1x1x1x8x8xf32>
    %301 = vector.shape_cast %300 : vector<1x1x1x1x1x1x8x8xf32> to vector<8x8xf32>
    %302 = tpu.transpose %301, [1, 0] : vector<8x8xf32> -> vector<8x8xf32>
    %c0_697 = arith.constant 0 : index
    %c0_698 = arith.constant 0 : index
    %c0_699 = arith.constant 0 : index
    %c2_700 = arith.constant 2 : index
    %c0_701 = arith.constant 0 : index
    %c24_702 = arith.constant 24 : index
    %303 = vector.load %arg3[%c0_697, %c0_698, %c0_699, %c2_700, %c0_701, %c24_702] : memref<1x1x2x8x8x32xf32, #tpu.memory_space<vmem>>, vector<1x1x1x1x8x8xf32>
    %304 = vector.shape_cast %303 : vector<1x1x1x1x8x8xf32> to vector<8x8xf32>
    %305 = vector.shape_cast %302 : vector<8x8xf32> to vector<1x1x1x1x8x8xf32>
    tpu.vector_store %arg3[%c0_697, %c0_698, %c0_699, %c2_700, %c0_701, %c24_702], %305 {strides = array<i32>} : memref<1x1x2x8x8x32xf32, #tpu.memory_space<vmem>>, vector<1x1x1x1x8x8xf32>,
    %c0_703 = arith.constant 0 : index
    %c0_704 = arith.constant 0 : index
    %c1_705 = arith.constant 1 : index
    %c0_706 = arith.constant 0 : index
    %c1_707 = arith.constant 1 : index
    %c3_708 = arith.constant 3 : index
    %c0_709 = arith.constant 0 : index
    %c0_710 = arith.constant 0 : index
    %306 = vector.load %arg2[%c0_703, %c0_704, %c1_705, %c0_706, %c1_707, %c3_708, %c0_709, %c0_710] : memref<1x1x2x2x2x8x8x8xf32, #tpu.memory_space<vmem>>, vector<1x1x1x1x1x1x8x8xf32>
    %307 = vector.shape_cast %306 : vector<1x1x1x1x1x1x8x8xf32> to vector<8x8xf32>
    %308 = tpu.transpose %307, [1, 0] : vector<8x8xf32> -> vector<8x8xf32>
    %c0_711 = arith.constant 0 : index
    %c0_712 = arith.constant 0 : index
    %c0_713 = arith.constant 0 : index
    %c3_714 = arith.constant 3 : index
    %c0_715 = arith.constant 0 : index
    %c24_716 = arith.constant 24 : index
    %309 = vector.load %arg3[%c0_711, %c0_712, %c0_713, %c3_714, %c0_715, %c24_716] : memref<1x1x2x8x8x32xf32, #tpu.memory_space<vmem>>, vector<1x1x1x1x8x8xf32>
    %310 = vector.shape_cast %309 : vector<1x1x1x1x8x8xf32> to vector<8x8xf32>
    %311 = vector.shape_cast %308 : vector<8x8xf32> to vector<1x1x1x1x8x8xf32>
    tpu.vector_store %arg3[%c0_711, %c0_712, %c0_713, %c3_714, %c0_715, %c24_716], %311 {strides = array<i32>} : memref<1x1x2x8x8x32xf32, #tpu.memory_space<vmem>>, vector<1x1x1x1x8x8xf32>,
    %c0_717 = arith.constant 0 : index
    %c0_718 = arith.constant 0 : index
    %c1_719 = arith.constant 1 : index
    %c0_720 = arith.constant 0 : index
    %c1_721 = arith.constant 1 : index
    %c4_722 = arith.constant 4 : index
    %c0_723 = arith.constant 0 : index
    %c0_724 = arith.constant 0 : index
    %312 = vector.load %arg2[%c0_717, %c0_718, %c1_719, %c0_720, %c1_721, %c4_722, %c0_723, %c0_724] : memref<1x1x2x2x2x8x8x8xf32, #tpu.memory_space<vmem>>, vector<1x1x1x1x1x1x8x8xf32>
    %313 = vector.shape_cast %312 : vector<1x1x1x1x1x1x8x8xf32> to vector<8x8xf32>
    %314 = tpu.transpose %313, [1, 0] : vector<8x8xf32> -> vector<8x8xf32>
    %c0_725 = arith.constant 0 : index
    %c0_726 = arith.constant 0 : index
    %c0_727 = arith.constant 0 : index
    %c4_728 = arith.constant 4 : index
    %c0_729 = arith.constant 0 : index
    %c24_730 = arith.constant 24 : index
    %315 = vector.load %arg3[%c0_725, %c0_726, %c0_727, %c4_728, %c0_729, %c24_730] : memref<1x1x2x8x8x32xf32, #tpu.memory_space<vmem>>, vector<1x1x1x1x8x8xf32>
    %316 = vector.shape_cast %315 : vector<1x1x1x1x8x8xf32> to vector<8x8xf32>
    %317 = vector.shape_cast %314 : vector<8x8xf32> to vector<1x1x1x1x8x8xf32>
    tpu.vector_store %arg3[%c0_725, %c0_726, %c0_727, %c4_728, %c0_729, %c24_730], %317 {strides = array<i32>} : memref<1x1x2x8x8x32xf32, #tpu.memory_space<vmem>>, vector<1x1x1x1x8x8xf32>,
    %c0_731 = arith.constant 0 : index
    %c0_732 = arith.constant 0 : index
    %c1_733 = arith.constant 1 : index
    %c0_734 = arith.constant 0 : index
    %c1_735 = arith.constant 1 : index
    %c5_736 = arith.constant 5 : index
    %c0_737 = arith.constant 0 : index
    %c0_738 = arith.constant 0 : index
    %318 = vector.load %arg2[%c0_731, %c0_732, %c1_733, %c0_734, %c1_735, %c5_736, %c0_737, %c0_738] : memref<1x1x2x2x2x8x8x8xf32, #tpu.memory_space<vmem>>, vector<1x1x1x1x1x1x8x8xf32>
    %319 = vector.shape_cast %318 : vector<1x1x1x1x1x1x8x8xf32> to vector<8x8xf32>
    %320 = tpu.transpose %319, [1, 0] : vector<8x8xf32> -> vector<8x8xf32>
    %c0_739 = arith.constant 0 : index
    %c0_740 = arith.constant 0 : index
    %c0_741 = arith.constant 0 : index
    %c5_742 = arith.constant 5 : index
    %c0_743 = arith.constant 0 : index
    %c24_744 = arith.constant 24 : index
    %321 = vector.load %arg3[%c0_739, %c0_740, %c0_741, %c5_742, %c0_743, %c24_744] : memref<1x1x2x8x8x32xf32, #tpu.memory_space<vmem>>, vector<1x1x1x1x8x8xf32>
    %322 = vector.shape_cast %321 : vector<1x1x1x1x8x8xf32> to vector<8x8xf32>
    %323 = vector.shape_cast %320 : vector<8x8xf32> to vector<1x1x1x1x8x8xf32>
    tpu.vector_store %arg3[%c0_739, %c0_740, %c0_741, %c5_742, %c0_743, %c24_744], %323 {strides = array<i32>} : memref<1x1x2x8x8x32xf32, #tpu.memory_space<vmem>>, vector<1x1x1x1x8x8xf32>,
    %c0_745 = arith.constant 0 : index
    %c0_746 = arith.constant 0 : index
    %c1_747 = arith.constant 1 : index
    %c0_748 = arith.constant 0 : index
    %c1_749 = arith.constant 1 : index
    %c6_750 = arith.constant 6 : index
    %c0_751 = arith.constant 0 : index
    %c0_752 = arith.constant 0 : index
    %324 = vector.load %arg2[%c0_745, %c0_746, %c1_747, %c0_748, %c1_749, %c6_750, %c0_751, %c0_752] : memref<1x1x2x2x2x8x8x8xf32, #tpu.memory_space<vmem>>, vector<1x1x1x1x1x1x8x8xf32>
    %325 = vector.shape_cast %324 : vector<1x1x1x1x1x1x8x8xf32> to vector<8x8xf32>
    %326 = tpu.transpose %325, [1, 0] : vector<8x8xf32> -> vector<8x8xf32>
    %c0_753 = arith.constant 0 : index
    %c0_754 = arith.constant 0 : index
    %c0_755 = arith.constant 0 : index
    %c6_756 = arith.constant 6 : index
    %c0_757 = arith.constant 0 : index
    %c24_758 = arith.constant 24 : index
    %327 = vector.load %arg3[%c0_753, %c0_754, %c0_755, %c6_756, %c0_757, %c24_758] : memref<1x1x2x8x8x32xf32, #tpu.memory_space<vmem>>, vector<1x1x1x1x8x8xf32>
    %328 = vector.shape_cast %327 : vector<1x1x1x1x8x8xf32> to vector<8x8xf32>
    %329 = vector.shape_cast %326 : vector<8x8xf32> to vector<1x1x1x1x8x8xf32>
    tpu.vector_store %arg3[%c0_753, %c0_754, %c0_755, %c6_756, %c0_757, %c24_758], %329 {strides = array<i32>} : memref<1x1x2x8x8x32xf32, #tpu.memory_space<vmem>>, vector<1x1x1x1x8x8xf32>,
    %c0_759 = arith.constant 0 : index
    %c0_760 = arith.constant 0 : index
    %c1_761 = arith.constant 1 : index
    %c0_762 = arith.constant 0 : index
    %c1_763 = arith.constant 1 : index
    %c7_764 = arith.constant 7 : index
    %c0_765 = arith.constant 0 : index
    %c0_766 = arith.constant 0 : index
    %330 = vector.load %arg2[%c0_759, %c0_760, %c1_761, %c0_762, %c1_763, %c7_764, %c0_765, %c0_766] : memref<1x1x2x2x2x8x8x8xf32, #tpu.memory_space<vmem>>, vector<1x1x1x1x1x1x8x8xf32>
    %331 = vector.shape_cast %330 : vector<1x1x1x1x1x1x8x8xf32> to vector<8x8xf32>
    %332 = tpu.transpose %331, [1, 0] : vector<8x8xf32> -> vector<8x8xf32>
    %c0_767 = arith.constant 0 : index
    %c0_768 = arith.constant 0 : index
    %c0_769 = arith.constant 0 : index
    %c7_770 = arith.constant 7 : index
    %c0_771 = arith.constant 0 : index
    %c24_772 = arith.constant 24 : index
    %333 = vector.load %arg3[%c0_767, %c0_768, %c0_769, %c7_770, %c0_771, %c24_772] : memref<1x1x2x8x8x32xf32, #tpu.memory_space<vmem>>, vector<1x1x1x1x8x8xf32>
    %334 = vector.shape_cast %333 : vector<1x1x1x1x8x8xf32> to vector<8x8xf32>
    %335 = vector.shape_cast %332 : vector<8x8xf32> to vector<1x1x1x1x8x8xf32>
    tpu.vector_store %arg3[%c0_767, %c0_768, %c0_769, %c7_770, %c0_771, %c24_772], %335 {strides = array<i32>} : memref<1x1x2x8x8x32xf32, #tpu.memory_space<vmem>>, vector<1x1x1x1x8x8xf32>,
    %c0_773 = arith.constant 0 : index
    %c0_774 = arith.constant 0 : index
    %c1_775 = arith.constant 1 : index
    %c1_776 = arith.constant 1 : index
    %c1_777 = arith.constant 1 : index
    %c0_778 = arith.constant 0 : index
    %c0_779 = arith.constant 0 : index
    %c0_780 = arith.constant 0 : index
    %336 = vector.load %arg2[%c0_773, %c0_774, %c1_775, %c1_776, %c1_777, %c0_778, %c0_779, %c0_780] : memref<1x1x2x2x2x8x8x8xf32, #tpu.memory_space<vmem>>, vector<1x1x1x1x1x1x8x8xf32>
    %337 = vector.shape_cast %336 : vector<1x1x1x1x1x1x8x8xf32> to vector<8x8xf32>
    %338 = tpu.transpose %337, [1, 0] : vector<8x8xf32> -> vector<8x8xf32>
    %c0_781 = arith.constant 0 : index
    %c0_782 = arith.constant 0 : index
    %c1_783 = arith.constant 1 : index
    %c0_784 = arith.constant 0 : index
    %c0_785 = arith.constant 0 : index
    %c24_786 = arith.constant 24 : index
    %339 = vector.load %arg3[%c0_781, %c0_782, %c1_783, %c0_784, %c0_785, %c24_786] : memref<1x1x2x8x8x32xf32, #tpu.memory_space<vmem>>, vector<1x1x1x1x8x8xf32>
    %340 = vector.shape_cast %339 : vector<1x1x1x1x8x8xf32> to vector<8x8xf32>
    %341 = vector.shape_cast %338 : vector<8x8xf32> to vector<1x1x1x1x8x8xf32>
    tpu.vector_store %arg3[%c0_781, %c0_782, %c1_783, %c0_784, %c0_785, %c24_786], %341 {strides = array<i32>} : memref<1x1x2x8x8x32xf32, #tpu.memory_space<vmem>>, vector<1x1x1x1x8x8xf32>,
    %c0_787 = arith.constant 0 : index
    %c0_788 = arith.constant 0 : index
    %c1_789 = arith.constant 1 : index
    %c1_790 = arith.constant 1 : index
    %c1_791 = arith.constant 1 : index
    %c1_792 = arith.constant 1 : index
    %c0_793 = arith.constant 0 : index
    %c0_794 = arith.constant 0 : index
    %342 = vector.load %arg2[%c0_787, %c0_788, %c1_789, %c1_790, %c1_791, %c1_792, %c0_793, %c0_794] : memref<1x1x2x2x2x8x8x8xf32, #tpu.memory_space<vmem>>, vector<1x1x1x1x1x1x8x8xf32>
    %343 = vector.shape_cast %342 : vector<1x1x1x1x1x1x8x8xf32> to vector<8x8xf32>
    %344 = tpu.transpose %343, [1, 0] : vector<8x8xf32> -> vector<8x8xf32>
    %c0_795 = arith.constant 0 : index
    %c0_796 = arith.constant 0 : index
    %c1_797 = arith.constant 1 : index
    %c1_798 = arith.constant 1 : index
    %c0_799 = arith.constant 0 : index
    %c24_800 = arith.constant 24 : index
    %345 = vector.load %arg3[%c0_795, %c0_796, %c1_797, %c1_798, %c0_799, %c24_800] : memref<1x1x2x8x8x32xf32, #tpu.memory_space<vmem>>, vector<1x1x1x1x8x8xf32>
    %346 = vector.shape_cast %345 : vector<1x1x1x1x8x8xf32> to vector<8x8xf32>
    %347 = vector.shape_cast %344 : vector<8x8xf32> to vector<1x1x1x1x8x8xf32>
    tpu.vector_store %arg3[%c0_795, %c0_796, %c1_797, %c1_798, %c0_799, %c24_800], %347 {strides = array<i32>} : memref<1x1x2x8x8x32xf32, #tpu.memory_space<vmem>>, vector<1x1x1x1x8x8xf32>,
    %c0_801 = arith.constant 0 : index
    %c0_802 = arith.constant 0 : index
    %c1_803 = arith.constant 1 : index
    %c1_804 = arith.constant 1 : index
    %c1_805 = arith.constant 1 : index
    %c2_806 = arith.constant 2 : index
    %c0_807 = arith.constant 0 : index
    %c0_808 = arith.constant 0 : index
    %348 = vector.load %arg2[%c0_801, %c0_802, %c1_803, %c1_804, %c1_805, %c2_806, %c0_807, %c0_808] : memref<1x1x2x2x2x8x8x8xf32, #tpu.memory_space<vmem>>, vector<1x1x1x1x1x1x8x8xf32>
    %349 = vector.shape_cast %348 : vector<1x1x1x1x1x1x8x8xf32> to vector<8x8xf32>
    %350 = tpu.transpose %349, [1, 0] : vector<8x8xf32> -> vector<8x8xf32>
    %c0_809 = arith.constant 0 : index
    %c0_810 = arith.constant 0 : index
    %c1_811 = arith.constant 1 : index
    %c2_812 = arith.constant 2 : index
    %c0_813 = arith.constant 0 : index
    %c24_814 = arith.constant 24 : index
    %351 = vector.load %arg3[%c0_809, %c0_810, %c1_811, %c2_812, %c0_813, %c24_814] : memref<1x1x2x8x8x32xf32, #tpu.memory_space<vmem>>, vector<1x1x1x1x8x8xf32>
    %352 = vector.shape_cast %351 : vector<1x1x1x1x8x8xf32> to vector<8x8xf32>
    %353 = vector.shape_cast %350 : vector<8x8xf32> to vector<1x1x1x1x8x8xf32>
    tpu.vector_store %arg3[%c0_809, %c0_810, %c1_811, %c2_812, %c0_813, %c24_814], %353 {strides = array<i32>} : memref<1x1x2x8x8x32xf32, #tpu.memory_space<vmem>>, vector<1x1x1x1x8x8xf32>,
    %c0_815 = arith.constant 0 : index
    %c0_816 = arith.constant 0 : index
    %c1_817 = arith.constant 1 : index
    %c1_818 = arith.constant 1 : index
    %c1_819 = arith.constant 1 : index
    %c3_820 = arith.constant 3 : index
    %c0_821 = arith.constant 0 : index
    %c0_822 = arith.constant 0 : index
    %354 = vector.load %arg2[%c0_815, %c0_816, %c1_817, %c1_818, %c1_819, %c3_820, %c0_821, %c0_822] : memref<1x1x2x2x2x8x8x8xf32, #tpu.memory_space<vmem>>, vector<1x1x1x1x1x1x8x8xf32>
    %355 = vector.shape_cast %354 : vector<1x1x1x1x1x1x8x8xf32> to vector<8x8xf32>
    %356 = tpu.transpose %355, [1, 0] : vector<8x8xf32> -> vector<8x8xf32>
    %c0_823 = arith.constant 0 : index
    %c0_824 = arith.constant 0 : index
    %c1_825 = arith.constant 1 : index
    %c3_826 = arith.constant 3 : index
    %c0_827 = arith.constant 0 : index
    %c24_828 = arith.constant 24 : index
    %357 = vector.load %arg3[%c0_823, %c0_824, %c1_825, %c3_826, %c0_827, %c24_828] : memref<1x1x2x8x8x32xf32, #tpu.memory_space<vmem>>, vector<1x1x1x1x8x8xf32>
    %358 = vector.shape_cast %357 : vector<1x1x1x1x8x8xf32> to vector<8x8xf32>
    %359 = vector.shape_cast %356 : vector<8x8xf32> to vector<1x1x1x1x8x8xf32>
    tpu.vector_store %arg3[%c0_823, %c0_824, %c1_825, %c3_826, %c0_827, %c24_828], %359 {strides = array<i32>} : memref<1x1x2x8x8x32xf32, #tpu.memory_space<vmem>>, vector<1x1x1x1x8x8xf32>,
    %c0_829 = arith.constant 0 : index
    %c0_830 = arith.constant 0 : index
    %c1_831 = arith.constant 1 : index
    %c1_832 = arith.constant 1 : index
    %c1_833 = arith.constant 1 : index
    %c4_834 = arith.constant 4 : index
    %c0_835 = arith.constant 0 : index
    %c0_836 = arith.constant 0 : index
    %360 = vector.load %arg2[%c0_829, %c0_830, %c1_831, %c1_832, %c1_833, %c4_834, %c0_835, %c0_836] : memref<1x1x2x2x2x8x8x8xf32, #tpu.memory_space<vmem>>, vector<1x1x1x1x1x1x8x8xf32>
    %361 = vector.shape_cast %360 : vector<1x1x1x1x1x1x8x8xf32> to vector<8x8xf32>
    %362 = tpu.transpose %361, [1, 0] : vector<8x8xf32> -> vector<8x8xf32>
    %c0_837 = arith.constant 0 : index
    %c0_838 = arith.constant 0 : index
    %c1_839 = arith.constant 1 : index
    %c4_840 = arith.constant 4 : index
    %c0_841 = arith.constant 0 : index
    %c24_842 = arith.constant 24 : index
    %363 = vector.load %arg3[%c0_837, %c0_838, %c1_839, %c4_840, %c0_841, %c24_842] : memref<1x1x2x8x8x32xf32, #tpu.memory_space<vmem>>, vector<1x1x1x1x8x8xf32>
    %364 = vector.shape_cast %363 : vector<1x1x1x1x8x8xf32> to vector<8x8xf32>
    %365 = vector.shape_cast %362 : vector<8x8xf32> to vector<1x1x1x1x8x8xf32>
    tpu.vector_store %arg3[%c0_837, %c0_838, %c1_839, %c4_840, %c0_841, %c24_842], %365 {strides = array<i32>} : memref<1x1x2x8x8x32xf32, #tpu.memory_space<vmem>>, vector<1x1x1x1x8x8xf32>,
    %c0_843 = arith.constant 0 : index
    %c0_844 = arith.constant 0 : index
    %c1_845 = arith.constant 1 : index
    %c1_846 = arith.constant 1 : index
    %c1_847 = arith.constant 1 : index
    %c5_848 = arith.constant 5 : index
    %c0_849 = arith.constant 0 : index
    %c0_850 = arith.constant 0 : index
    %366 = vector.load %arg2[%c0_843, %c0_844, %c1_845, %c1_846, %c1_847, %c5_848, %c0_849, %c0_850] : memref<1x1x2x2x2x8x8x8xf32, #tpu.memory_space<vmem>>, vector<1x1x1x1x1x1x8x8xf32>
    %367 = vector.shape_cast %366 : vector<1x1x1x1x1x1x8x8xf32> to vector<8x8xf32>
    %368 = tpu.transpose %367, [1, 0] : vector<8x8xf32> -> vector<8x8xf32>
    %c0_851 = arith.constant 0 : index
    %c0_852 = arith.constant 0 : index
    %c1_853 = arith.constant 1 : index
    %c5_854 = arith.constant 5 : index
    %c0_855 = arith.constant 0 : index
    %c24_856 = arith.constant 24 : index
    %369 = vector.load %arg3[%c0_851, %c0_852, %c1_853, %c5_854, %c0_855, %c24_856] : memref<1x1x2x8x8x32xf32, #tpu.memory_space<vmem>>, vector<1x1x1x1x8x8xf32>
    %370 = vector.shape_cast %369 : vector<1x1x1x1x8x8xf32> to vector<8x8xf32>
    %371 = vector.shape_cast %368 : vector<8x8xf32> to vector<1x1x1x1x8x8xf32>
    tpu.vector_store %arg3[%c0_851, %c0_852, %c1_853, %c5_854, %c0_855, %c24_856], %371 {strides = array<i32>} : memref<1x1x2x8x8x32xf32, #tpu.memory_space<vmem>>, vector<1x1x1x1x8x8xf32>,
    %c0_857 = arith.constant 0 : index
    %c0_858 = arith.constant 0 : index
    %c1_859 = arith.constant 1 : index
    %c1_860 = arith.constant 1 : index
    %c1_861 = arith.constant 1 : index
    %c6_862 = arith.constant 6 : index
    %c0_863 = arith.constant 0 : index
    %c0_864 = arith.constant 0 : index
    %372 = vector.load %arg2[%c0_857, %c0_858, %c1_859, %c1_860, %c1_861, %c6_862, %c0_863, %c0_864] : memref<1x1x2x2x2x8x8x8xf32, #tpu.memory_space<vmem>>, vector<1x1x1x1x1x1x8x8xf32>
    %373 = vector.shape_cast %372 : vector<1x1x1x1x1x1x8x8xf32> to vector<8x8xf32>
    %374 = tpu.transpose %373, [1, 0] : vector<8x8xf32> -> vector<8x8xf32>
    %c0_865 = arith.constant 0 : index
    %c0_866 = arith.constant 0 : index
    %c1_867 = arith.constant 1 : index
    %c6_868 = arith.constant 6 : index
    %c0_869 = arith.constant 0 : index
    %c24_870 = arith.constant 24 : index
    %375 = vector.load %arg3[%c0_865, %c0_866, %c1_867, %c6_868, %c0_869, %c24_870] : memref<1x1x2x8x8x32xf32, #tpu.memory_space<vmem>>, vector<1x1x1x1x8x8xf32>
    %376 = vector.shape_cast %375 : vector<1x1x1x1x8x8xf32> to vector<8x8xf32>
    %377 = vector.shape_cast %374 : vector<8x8xf32> to vector<1x1x1x1x8x8xf32>
    tpu.vector_store %arg3[%c0_865, %c0_866, %c1_867, %c6_868, %c0_869, %c24_870], %377 {strides = array<i32>} : memref<1x1x2x8x8x32xf32, #tpu.memory_space<vmem>>, vector<1x1x1x1x8x8xf32>,
    %c0_871 = arith.constant 0 : index
    %c0_872 = arith.constant 0 : index
    %c1_873 = arith.constant 1 : index
    %c1_874 = arith.constant 1 : index
    %c1_875 = arith.constant 1 : index
    %c7_876 = arith.constant 7 : index
    %c0_877 = arith.constant 0 : index
    %c0_878 = arith.constant 0 : index
    %378 = vector.load %arg2[%c0_871, %c0_872, %c1_873, %c1_874, %c1_875, %c7_876, %c0_877, %c0_878] : memref<1x1x2x2x2x8x8x8xf32, #tpu.memory_space<vmem>>, vector<1x1x1x1x1x1x8x8xf32>
    %379 = vector.shape_cast %378 : vector<1x1x1x1x1x1x8x8xf32> to vector<8x8xf32>
    %380 = tpu.transpose %379, [1, 0] : vector<8x8xf32> -> vector<8x8xf32>
    %c0_879 = arith.constant 0 : index
    %c0_880 = arith.constant 0 : index
    %c1_881 = arith.constant 1 : index
    %c7_882 = arith.constant 7 : index
    %c0_883 = arith.constant 0 : index
    %c24_884 = arith.constant 24 : index
    %381 = vector.load %arg3[%c0_879, %c0_880, %c1_881, %c7_882, %c0_883, %c24_884] : memref<1x1x2x8x8x32xf32, #tpu.memory_space<vmem>>, vector<1x1x1x1x8x8xf32>
    %382 = vector.shape_cast %381 : vector<1x1x1x1x8x8xf32> to vector<8x8xf32>
    %383 = vector.shape_cast %380 : vector<8x8xf32> to vector<1x1x1x1x8x8xf32>
    tpu.vector_store %arg3[%c0_879, %c0_880, %c1_881, %c7_882, %c0_883, %c24_884], %383 {strides = array<i32>} : memref<1x1x2x8x8x32xf32, #tpu.memory_space<vmem>>, vector<1x1x1x1x8x8xf32>,
    return
  }
  func.func @transform_0(%arg0: i32, %arg1: i32) -> (i32, i32, i32, i32, i32, i32, i32, i32) {
    %c0_i32 = arith.constant 0 : i32
    %c0_i32_0 = arith.constant 0 : i32
    %c0_i32_1 = arith.constant 0 : i32
    %c0_i32_2 = arith.constant 0 : i32
    %c0_i32_3 = arith.constant 0 : i32
    %c0_i32_4 = arith.constant 0 : i32
    %c0_i32_5 = arith.constant 0 : i32
    return %arg0, %arg1, %c0_i32, %c0_i32_0, %c0_i32_1, %c0_i32_2, %c0_i32_3, %c0_i32_4 : i32, i32, i32, i32, i32, i32, i32, i32
  }
  func.func @transform_1(%arg0: i32, %arg1: i32) -> (i32, i32, i32, i32, i32, i32) {
    %c0_i32 = arith.constant 0 : i32
    %c0_i32_0 = arith.constant 0 : i32
    %c0_i32_1 = arith.constant 0 : i32
    %c0_i32_2 = arith.constant 0 : i32
    %c0_i32_3 = arith.constant 0 : i32
    return %arg0, %arg1, %c0_i32, %c0_i32_0, %c0_i32_1, %c0_i32_2 : i32, i32, i32, i32, i32, i32
  }
}

</mosaic_0001>

<bundles_post_ra>
// kernel: tpu_custom_call.1
= control target key start
LH: loop header
LB: loop body
LE: loop exit
PB: predicated region body
PF: predicated region fallthrough
CT: control target
= control target key end

     0   :  { %6 = vsyncpa [#allocation3], 0  ;;  %s3358_s0 = inlined_call_operand.hbm [shape: f32[2,2,2,2,2,8,8,8], index: 0, kind: input, shape index: {}]   ;;  %s3359_s1 = inlined_call_operand.hbm [shape: f32[2,2,2,8,8,32], index: 1, kind: output, shape index: {}]  }
   0x1   :  { %8 = vsyncpa [#allocation3 + $0x1], 0 }
   0x2   :  { %9 = vsyncpa [#allocation4], 0 }
   0x3   :  { %11 = vsyncpa [#allocation4 + $0x1], 0  ;;  %s2932_s6 = smov 0   ;;  %s2934_s7 = smov 0  }
   0x4   :  { %s2936_s8 = smov 0   ;;  %s2938_s9 = smov 0  }
   0x5   :  { %s2940_s10 = smov 0   ;;  %s2942_s11 = smov 0  }
   0x6   :  { %s2944_s12 = smov 0   ;;  %s2946_s13 = smov 0  }
   0x7 LB: > { %s2634_s14 = sadd.s32 4294967295, %s2912_s13   ;;  %s2635_s15 = sadd.s32 4294967294, %s2912_s13   ;;  %s2912_s13 = sphi %s2946_s13, %s17_s13   ;;  %s2908_s12 = sphi %s2944_s12, %s3374_s12   ;;  %s2904_s11 = sphi %s2942_s11, %s3373_s11   ;;  %s2900_s10 = sphi %s2940_s10, %s3372_s10   ;;  %s2896_s9 = sphi %s2938_s9, %s3371_s9   ;;  %s2892_s8 = sphi %s2936_s8, %s3370_s8   ;;  %s2888_s7 = sphi %s2934_s7, %s3369_s7   ;;  %s2884_s6 = sphi %s2932_s6, %s3368_s6  }
   0x8   : > { %s26_s16 = sadd.s32 1, %s2904_s11  ;;  %s29_s17 = sadd.s32 1, %s2908_s12 }
   0x9   : > { %p27_p0 = scmp.ge.s32.totalorder %s26_s16, 2  ;;  %s38_s18 = sadd.s32 1, %s2892_s8 }
   0xa   : > { %p45_p1 = scmp.ne.s32.totalorder %s2892_s8, %s2888_s7  ;;  %p46_p2 = scmp.eq.s32.totalorder %s2912_s13, 0 }
   0xb   : > { %s3376_s16 = smov (%p27_p0, %s26_s16), 0  ;;  %s3378_s17 = smov (!%p27_p0, %s29_s17), %s2908_s12 }
   0xc   : > { %s34_s19 = ssub.s32 %s2904_s11, %s3376_s16  ;;  %p2985_p3 = por %p46_p2, %p45_p1 }
   0xd   : > { %p31_p4 = scmp.ge.s32.totalorder %s3378_s17, 2  ;;  %p51_p5 = scmp.ne.s32.totalorder %s2888_s7, %s2884_s6 }
   0xe   : > { %p52_p6 = scmp.eq.s32.totalorder %s2634_s14, 0  ;;  %p77_p7 = scmp.eq.s32.totalorder %s2634_s14, 3 }
   0xf   : > { %s3380_s17 = smov (%p31_p4, %s3378_s17), 0  ;;  %p83_p10 = scmp.eq.s32.totalorder %s2635_s15, 3 }
  0x10   : > { %p2993_p8 = por %p52_p6, %p51_p5  ;;  %p2997_p9 = por %p77_p7, %p45_p1 }
  0x11   : > { %s33_s23 = ssub.s32 %s2908_s12, %s3380_s17  ;;  %p3003_p12 = por %p83_p10, %p51_p5 }
  0x12   : > { %s3363_s22 = scalar_select %p2997_p9, 1, 0 }
  0x13   : > { %s35_s24 = sor.u32 %s34_s19, %s33_s23  ;;  %p2711_p13 = scmp.lt.s32.totalorder %s2912_s13, 4 }
  0x14   : > { %p36_p11 = scmp.eq.s32.totalorder %s35_s24, 0  ;;  %s103_s26 = sand.u32 1, %s2892_s8  }
  0x15   : > { %s3364_s25 = scalar_select %p3003_p12, 1, 0 }
  0x16   : > { %s3010_s27 = scalar_select %p36_p11, %s2892_s8, %s38_s18  }
  0x17   : > { %s2638_s28 = sshll.u32 %s103_s26, 9  ;;  %s2639_s29 = sshll.u32 %s2904_s11, 6 }
  0x18   : > { %s2640_s30 = sshll.u32 %s2908_s12, 7  ;;  %s107_s2 = scalar_lea.vmem [#allocation2], %s2638_s28 }
  0x19   : > { %s116_s3 = sshll.u32 %s107_s2, 4  ;;  %s113_s4 = sadd.s32 %s2640_s30, %s2639_s29  ;;  %s3014_s3 = int_to_ptr.vmem [resolvable:$true] %s116_s3 }
  0x1a   : > { %s2641_s5 = sshll.u32 %s113_s4, 7  ;;  %p3018_p0 = pnand %p2711_p13, %p2985_p3 }
  0x1b   : > { %s3025_s18 = scalar_lea.hbm %s3358_s0, %s2641_s5  ;;  %s3027_s23 = scalar_lea.sflag [#allocation3], %s103_s26 }
  0x1c   : > { %s2784_s24 = scalar_lea.hbm %s3025_s18, 8192  ;;  %p2786_p2 = pneg %p3018_p0 }
  0x1d   : > { %p2785_p1 = scmp.ne.s32.totalorder %s3025_s18, %s2784_s24  ;;  %s2789_s29 = scalar_lea.hbm %s3358_s0, 32768 }
  0x1e   : > { %p2790_p5 = scmp.lt.u32.totalorder %s3025_s18, %s3358_s0  ;;  %p2791_p6 = scmp.lt.u32.totalorder %s2789_s29, %s2784_s24 }
  0x1f   : > { %p2787_p3 = pnand %p2786_p2, %p2785_p1  ;;  %p2793_p10 = scmp.lt.u32.totalorder %s2784_s24, %s3025_s18 }
  0x20   : > { %p2792_p7 = por %p2791_p6, %p2790_p5 }
  0x21   : > { %p2788_p4 = pneg %p2787_p3 }
  0x22   : > { %p2794_p11 = por %p2793_p10, %p2792_p7 }
  0x24   : > { %p2795_p13 = pnand %p2794_p11, %p2788_p4 }
  0x26   : > { %2798 = shalt.err (!%p2795_p13)
}
  0x27   : > { %s2799_s26 = scalar_lea.vmem %s3014_s3, 8192  ;;  %s2914_s4 = smov [#allocation2]  }
  0x28   : > { %p2800_p1 = scmp.ne.s32.totalorder %s3014_s3, %s2799_s26  ;;  %s2804_s5 = sshll.u32 %s2914_s4, 4  ;;  %s2805_s5 = int_to_ptr.vmem [resolvable:$false] %s2804_s5 }
  0x29   : > { %s2806_s15 = scalar_lea.vmem %s2805_s5, 16384  ;;  %p2807_p9 = scmp.lt.s32.totalorder %s3014_s3, %s2805_s5 }
  0x2a   : > { %p2802_p3 = pnand %p2800_p1, %p2786_p2  ;;  %p2808_p5 = scmp.lt.s32.totalorder %s2806_s15, %s2799_s26 }
  0x2c   : > { %p2803_p12 = pneg %p2802_p3  ;;  %p2809_p6 = por %p2808_p5, %p2807_p9 }
  0x2e   : > { %p2810_p7 = pnand %p2809_p6, %p2803_p12 }
  0x30   : > { %2813 = shalt.err (!%p2810_p7)
}
  0x31   : > { %s2915_s19 = smov 128   ;;  %s2916_s24 = smov 8  }
  0x32   : > { %2706 = dma.hbm_to_vmem [thread:$0]  (!%p3018_p0), %s3025_s18, 8192, %s3014_s3, %s3027_s23, %s2915_s19, %s2915_s19, %s2916_s24  }
  0x33   : > { %p2642_p2 = scmp.ge.s32.totalorder %s2912_s13, 1  ;;  %p124_p4 = scmp.lt.s32.totalorder %s2912_s13, 5 }
  0x35   : > { %p125_p10 = pnand %p2642_p2, %p124_p4 }
  0x36   : > { %s3058_s20 = sand.u32 (!%p125_p10), 1, %s2888_s7  }
  0x37   : > { %128 = sbr.rel (%p125_p10) target bundleno = 459 (0x1cb), region = 24  ;;  %s2643_s28 = sshll.u32 (!%p125_p10), %s3058_s20, 9 }
  0x38   : > { %s131_s29 = scalar_lea.sflag (!%p125_p10), [#allocation3], %s3058_s20  ;;  %s3062_s30 = scalar_lea.vmem (!%p125_p10), [#allocation2], %s2643_s28 }
  0x3e   : > { %2875 = dma.done.wait (%p2993_p8), %s131_s29, 8192  }
  0x3f   : > { %2877 = vsyncadd (%p2993_p8), %s131_s29, 4294959104  ;;  %v155_v0 = vld [vmem:[%s3062_s30 + $0x10] sm:$0xff]  ;;  %v153_v1 = vld [vmem:[%s3062_s30] sm:$0xff]  ;;  %s2644_s21 = sshll.u32 %s3058_s20, 7  ;;  %vm681_vm0 = vcmask 64512   ;;  %s2917_s14 = smov 8  }
  0x40   : > { %233 = vxpose.xlu1.b32.start.end [1/1] (short) (narrow) %v155_v0, 8  ;;  %169 = vxpose.xlu0.b32.start.end [1/1] (short) (narrow) %v153_v1, 8  ;;  %v156_v2 = vld [vmem:[%s3062_s30 + $0x18] sm:$0xff]  ;;  %v154_v3 = vld [vmem:[%s3062_s30 + $0x8] sm:$0xff]  ;;  %v157_v5 = vld [vmem:[%s3062_s30 + $0x20] sm:$0xff]  ;;  %s3132_s3 = scalar_lea.vmem [#allocation5], %s2644_s21 }
  0x41   : > { %v158_v4 = vld [vmem:[%s3062_s30 + $0x28] sm:$0xff]  ;;  %v160_v6 = vld [vmem:[%s3062_s30 + $0x38] sm:$0xff]  ;;  %v159_v7 = vld [vmem:[%s3062_s30 + $0x30] sm:$0xff]  ;;  %s2918_s18 = smov 16   ;;  %s2919_s23 = smov 24   ;;  %vm1291_vm1 = vcmask 130112  }
  0x42   : > { %v162_v8 = vld [vmem:[%s3062_s30 + $0x88] sm:$0xff]  ;;  %v161_v9 = vld [vmem:[%s3062_s30 + $0x80] sm:$0xff]  ;;  %v164_v10 = vld [vmem:[%s3062_s30 + $0x98] sm:$0xff]  ;;  %vm1901_vm2 = vcmask 195712   ;;  %vm2511_vm3 = vcmask 261312   ;;  %s2694_s2 = sshll.u32 %s2896_s9, 4 }
  0x43   : > { %v163_v11 = vld [vmem:[%s3062_s30 + $0x90] sm:$0xff]  ;;  %v166_v12 = vld [vmem:[%s3062_s30 + $0xa8] sm:$0xff]  ;;  %v165_v13 = vld [vmem:[%s3062_s30 + $0xa0] sm:$0xff]  ;;  %s2695_s26 = sshll.u32 %s2900_s10, 5  ;;  %s2544_s15 = sshll.u32 %s3132_s3, 4  ;;  %s3301_s15 = int_to_ptr.vmem [resolvable:$true] %s2544_s15 }
  0x44   : > { %265 = vxpose.xlu1.b32.start.end [1/1] (short) (narrow) %v156_v2, 8  ;;  %201 = vxpose.xlu0.b32.start.end [1/1] (short) (narrow) %v154_v3, 8  ;;  %v168_v14 = vld [vmem:[%s3062_s30 + $0xb8] sm:$0xff]  ;;  %v167_v15 = vld [vmem:[%s3062_s30 + $0xb0] sm:$0xff]  ;;  %v2646_v16 = vld [vmem:[%s3062_s30 + $0x48] sm:$0xff]  ;;  %s2541_s4 = sadd.s32 %s2695_s26, %s2694_s2  ;;  %s2529_s9 = scalar_lea.sflag [#allocation4], %s3058_s20 }
  0x45   : > { %v2645_v17 = vld [vmem:[%s3062_s30 + $0x40] sm:$0xff]  ;;  %v2647_v18 = vld [vmem:[%s3062_s30 + $0x50] sm:$0xff]  ;;  %v2648_v19 = vld [vmem:[%s3062_s30 + $0x58] sm:$0xff]  ;;  %s2696_s5 = sshll.u32 %s2541_s4, 7  ;;  %s2814_s10 = scalar_lea.vmem %s3301_s15, 2048 }
  0x46   : > { %v2649_v20 = vld [vmem:[%s3062_s30 + $0x60] sm:$0xff]  ;;  %v2650_v21 = vld [vmem:[%s3062_s30 + $0x68] sm:$0xff]  ;;  %v2651_v22 = vld [vmem:[%s3062_s30 + $0x70] sm:$0xff]  ;;  %s3299_s28 = scalar_lea.hbm %s3359_s1, %s2696_s5  ;;  %p2815_p8 = scmp.ne.s32.totalorder %s3301_s15, %s2814_s10 }
  0x47   : > { %v2652_v23 = vld [vmem:[%s3062_s30 + $0x78] sm:$0xff]  ;;  %v2653_v24 = vld [vmem:[%s3062_s30 + $0xc0] sm:$0xff]  ;;  %v2654_v25 = vld [vmem:[%s3062_s30 + $0xc8] sm:$0xff]  ;;  %p3366_p9 = scmp.ne.s32.totalorder %s3363_s22, 0  ;;  %s2920_s29 = smov [#allocation5]  }
  0x48   : > { %329 = vxpose.xlu1.b32.start.end [1/1] (short) (narrow) %v158_v4, 8  ;;  %297 = vxpose.xlu0.b32.start.end [1/1] (short) (narrow) %v157_v5, 8  ;;  %v2655_v26 = vld [vmem:[%s3062_s30 + $0xd0] sm:$0xff]  ;;  %v2656_v27 = vld [vmem:[%s3062_s30 + $0xd8] sm:$0xff]  ;;  %v2657_v28 = vld [vmem:[%s3062_s30 + $0xe0] sm:$0xff] }
  0x49   : > { %v2658_v29 = vld [vmem:[%s3062_s30 + $0xe8] sm:$0xff]  ;;  %v2659_v30 = vld [vmem:[%s3062_s30 + $0xf0] sm:$0xff]  ;;  %v2660_v31 = vld [vmem:[%s3062_s30 + $0xf8] sm:$0xff]  ;;  %p2816_p12 = pnand %p2815_p8, %p3366_p9 }
  0x4a   : > { %v2662_v32 = vld [vmem:[%s3062_s30 + $0x108] sm:$0xff]  ;;  %v2661_v33 = vld [vmem:[%s3062_s30 + $0x100] sm:$0xff]  ;;  %v2663_v34 = vld [vmem:[%s3062_s30 + $0x110] sm:$0xff] }
  0x4b   : > { %v2666_v35 = vld [vmem:[%s3062_s30 + $0x128] sm:$0xff]  ;;  %v2664_v36 = vld [vmem:[%s3062_s30 + $0x118] sm:$0xff]  ;;  %v2665_v38 = vld [vmem:[%s3062_s30 + $0x120] sm:$0xff]  ;;  %p2817_p0 = pneg %p2816_p12 }
  0x4c   : > { %393 = vxpose.xlu1.b32.start.end [1/1] (short) (narrow) %v160_v6, 8  ;;  %361 = vxpose.xlu0.b32.start.end [1/1] (short) (narrow) %v159_v7, 8  ;;  %v2668_v37 = vld [vmem:[%s3062_s30 + $0x138] sm:$0xff]  ;;  %v2670_v39 = vld [vmem:[%s3062_s30 + $0x188] sm:$0xff]  ;;  %v2667_v40 = vld [vmem:[%s3062_s30 + $0x130] sm:$0xff] }
  0x4d   : > { %v2672_v41 = vld [vmem:[%s3062_s30 + $0x198] sm:$0xff]  ;;  %v2669_v42 = vld [vmem:[%s3062_s30 + $0x180] sm:$0xff]  ;;  %v2674_v43 = vld [vmem:[%s3062_s30 + $0x1a8] sm:$0xff] }
  0x4e   : > { %v2671_v44 = vld [vmem:[%s3062_s30 + $0x190] sm:$0xff]  ;;  %v2676_v45 = vld [vmem:[%s3062_s30 + $0x1b8] sm:$0xff]  ;;  %v2673_v46 = vld [vmem:[%s3062_s30 + $0x1a0] sm:$0xff] }
  0x4f   : > { %v2677_v47 = vld [vmem:[%s3062_s30 + $0x140] sm:$0xff]  ;;  %v2675_v48 = vld [vmem:[%s3062_s30 + $0x1b0] sm:$0xff]  ;;  %v2682_v49 = vld [vmem:[%s3062_s30 + $0x168] sm:$0xff] }
  0x50   : > { %457 = vxpose.xlu1.b32.start.end [1/1] (short) (narrow) %v162_v8, 8  ;;  %425 = vxpose.xlu0.b32.start.end [1/1] (short) (narrow) %v161_v9, 8  ;;  %v2678_v50 = vld [vmem:[%s3062_s30 + $0x148] sm:$0xff]  ;;  %v2684_v51 = vld [vmem:[%s3062_s30 + $0x178] sm:$0xff]  ;;  %v2679_v52 = vld [vmem:[%s3062_s30 + $0x150] sm:$0xff] }
  0x51   : > { %v2686_v53 = vld [vmem:[%s3062_s30 + $0x1c8] sm:$0xff]  ;;  %v2680_v54 = vld [vmem:[%s3062_s30 + $0x158] sm:$0xff]  ;;  %v2681_v56 = vld [vmem:[%s3062_s30 + $0x160] sm:$0xff] }
  0x52   : > { %v2688_v55 = vld [vmem:[%s3062_s30 + $0x1d8] sm:$0xff]  ;;  %v2690_v57 = vld [vmem:[%s3062_s30 + $0x1e8] sm:$0xff]  ;;  %v2683_v58 = vld [vmem:[%s3062_s30 + $0x170] sm:$0xff] }
  0x53   : > { %v2692_v59 = vld [vmem:[%s3062_s30 + $0x1f8] sm:$0xff]  ;;  %v2685_v60 = vld [vmem:[%s3062_s30 + $0x1c0] sm:$0xff]  ;;  %v2687_v61 = vld [vmem:[%s3062_s30 + $0x1d0] sm:$0xff] }
  0x54   : > { %521 = vxpose.xlu1.b32.start.end [1/1] (short) (narrow) %v164_v10, 8  ;;  %489 = vxpose.xlu0.b32.start.end [1/1] (short) (narrow) %v163_v11, 8  ;;  %v2689_v62 = vld [vmem:[%s3062_s30 + $0x1e0] sm:$0xff]  ;;  %v2691_v1 = vld [vmem:[%s3062_s30 + $0x1f0] sm:$0xff]  ;;  %s2818_s30 = sshll.u32 %s2920_s29, 4  ;;  %s2819_s30 = int_to_ptr.vmem [resolvable:$false] %s2818_s30 }
  0x55   : > { %s2820_s21 = scalar_lea.vmem %s2819_s30, 4096  ;;  %p2821_p11 = scmp.lt.s32.totalorder %s3301_s15, %s2819_s30 }
  0x56   : > { %p2822_p13 = scmp.lt.s32.totalorder %s2820_s21, %s2814_s10 }
  0x58   : > { %585 = vxpose.xlu1.b32.start.end [1/1] (short) (narrow) %v166_v12, 8  ;;  %553 = vxpose.xlu0.b32.start.end [1/1] (short) (narrow) %v165_v13, 8  ;;  %p2823_p1 = por %p2822_p13, %p2821_p11 }
  0x5a   : > { %p2824_p3 = pnand %p2823_p1, %p2817_p0 }
  0x5c   : > { %649 = vxpose.xlu1.b32.start.end [1/1] (short) (narrow) %v168_v14, 8  ;;  %617 = vxpose.xlu0.b32.start.end [1/1] (short) (narrow) %v167_v15, 8 }
  0x60   : > { %747 = vxpose.xlu1.b32.start.end [1/1] (short) (narrow) %v2646_v16, 8  ;;  %715 = vxpose.xlu0.b32.start.end [1/1] (short) (narrow) %v2645_v17, 8 }
  0x64   : > { %779 = vxpose.xlu0.b32.start.end [1/1] (short) (narrow) %v2647_v18, 8  ;;  %811 = vxpose.xlu1.b32.start.end [1/1] (short) (narrow) %v2648_v19, 8 }
  0x68   : > { %843 = vxpose.xlu0.b32.start.end [1/1] (short) (narrow) %v2649_v20, 8  ;;  %875 = vxpose.xlu1.b32.start.end [1/1] (short) (narrow) %v2650_v21, 8 }
  0x6c   : > { %907 = vxpose.xlu0.b32.start.end [1/1] (short) (narrow) %v2651_v22, 8  ;;  %939 = vxpose.xlu1.b32.start.end [1/1] (short) (narrow) %v2652_v23, 8 }
  0x70   : > { %971 = vxpose.xlu0.b32.start.end [1/1] (short) (narrow) %v2653_v24, 8  ;;  %1003 = vxpose.xlu1.b32.start.end [1/1] (short) (narrow) %v2654_v25, 8 }
  0x74   : > { %1035 = vxpose.xlu0.b32.start.end [1/1] (short) (narrow) %v2655_v26, 8  ;;  %1067 = vxpose.xlu1.b32.start.end [1/1] (short) (narrow) %v2656_v27, 8 }
  0x78   : > { %1099 = vxpose.xlu0.b32.start.end [1/1] (short) (narrow) %v2657_v28, 8  ;;  %1131 = vxpose.xlu1.b32.start.end [1/1] (short) (narrow) %v2658_v29, 8 }
  0x7c   : > { %1163 = vxpose.xlu0.b32.start.end [1/1] (short) (narrow) %v2659_v30, 8  ;;  %1195 = vxpose.xlu1.b32.start.end [1/1] (short) (narrow) %v2660_v31, 8 }
  0x80   : > { %1357 = vxpose.xlu0.b32.start.end [1/1] (short) (narrow) %v2662_v32, 8  ;;  %1325 = vxpose.xlu1.b32.start.end [1/1] (short) (narrow) %v2661_v33, 8 }
  0x84   : > { %1389 = vxpose.xlu0.b32.start.end [1/1] (short) (narrow) %v2663_v34, 8  ;;  %1485 = vxpose.xlu1.b32.start.end [1/1] (short) (narrow) %v2666_v35, 8 }
  0x88   : > { %1421 = vxpose.xlu0.b32.start.end [1/1] (short) (narrow) %v2664_v36, 8  ;;  %1549 = vxpose.xlu1.b32.start.end [1/1] (short) (narrow) %v2668_v37, 8 }
  0x8c   : > { %1453 = vxpose.xlu0.b32.start.end [1/1] (short) (narrow) %v2665_v38, 8  ;;  %1613 = vxpose.xlu1.b32.start.end [1/1] (short) (narrow) %v2670_v39, 8 }
  0x90   : > { %1517 = vxpose.xlu0.b32.start.end [1/1] (short) (narrow) %v2667_v40, 8  ;;  %1677 = vxpose.xlu1.b32.start.end [1/1] (short) (narrow) %v2672_v41, 8 }
  0x94   : > { %1581 = vxpose.xlu0.b32.start.end [1/1] (short) (narrow) %v2669_v42, 8  ;;  %1741 = vxpose.xlu1.b32.start.end [1/1] (short) (narrow) %v2674_v43, 8 }
  0x98   : > { %1645 = vxpose.xlu0.b32.start.end [1/1] (short) (narrow) %v2671_v44, 8  ;;  %1805 = vxpose.xlu1.b32.start.end [1/1] (short) (narrow) %v2676_v45, 8 }
  0x9c   : > { %1709 = vxpose.xlu0.b32.start.end [1/1] (short) (narrow) %v2673_v46, 8  ;;  %1935 = vxpose.xlu1.b32.start.end [1/1] (short) (narrow) %v2677_v47, 8 }
  0xa0   : > { %1773 = vxpose.xlu0.b32.start.end [1/1] (short) (narrow) %v2675_v48, 8  ;;  %2095 = vxpose.xlu1.b32.start.end [1/1] (short) (narrow) %v2682_v49, 8 }
  0xa4   : > { %1967 = vxpose.xlu0.b32.start.end [1/1] (short) (narrow) %v2678_v50, 8  ;;  %2159 = vxpose.xlu1.b32.start.end [1/1] (short) (narrow) %v2684_v51, 8 }
  0xa8   : > { %1999 = vxpose.xlu0.b32.start.end [1/1] (short) (narrow) %v2679_v52, 8  ;;  %2223 = vxpose.xlu1.b32.start.end [1/1] (short) (narrow) %v2686_v53, 8 }
  0xac   : > { %2031 = vxpose.xlu0.b32.start.end [1/1] (short) (narrow) %v2680_v54, 8  ;;  %2287 = vxpose.xlu1.b32.start.end [1/1] (short) (narrow) %v2688_v55, 8 }
  0xb0   : > { %2063 = vxpose.xlu0.b32.start.end [1/1] (short) (narrow) %v2681_v56, 8  ;;  %2351 = vxpose.xlu1.b32.start.end [1/1] (short) (narrow) %v2690_v57, 8 }
  0xb4   : > { %2127 = vxpose.xlu0.b32.start.end [1/1] (short) (narrow) %v2683_v58, 8  ;;  %2415 = vxpose.xlu1.b32.start.end [1/1] (short) (narrow) %v2692_v59, 8 }
  0xb8   : > { %2191 = vxpose.xlu0.b32.start.end [1/1] (short) (narrow) %v2685_v60, 8 }
  0xbc   : > { %2255 = vxpose.xlu0.b32.start.end [1/1] (short) (narrow) %v2687_v61, 8 }
  0xc0   : > { %v249_v63 = vpop.trf.xlu1  ;;  %2319 = vxpose.xlu0.b32.start.end [1/1] (short) (narrow) %v2689_v62, 8  ;;  %v185_v0 = vpop.trf.xlu0 }
  0xc1   : > { %684 = vst.msk [vmem:[%s3132_s3 + $0x10] sm:$0xff] %vm681_vm0, %v249_v63  ;;  %682 = vst.msk [vmem:[%s3132_s3] sm:$0xff] %vm681_vm0, %v185_v0 }
  0xc4   : > { %v281_v2 = vpop.trf.xlu1  ;;  %2383 = vxpose.xlu0.b32.start.end [1/1] (short) (narrow) %v2691_v1, 8  ;;  %v217_v3 = vpop.trf.xlu0 }
  0xc5   : > { %685 = vst.msk [vmem:[%s3132_s3 + $0x18] sm:$0xff] %vm681_vm0, %v281_v2  ;;  %683 = vst.msk [vmem:[%s3132_s3 + $0x8] sm:$0xff] %vm681_vm0, %v217_v3 }
  0xc8   : > { %v345_v4 = vpop.trf.xlu1  ;;  %v313_v5 = vpop.trf.xlu0 }
  0xc9   : > { %687 = vst.msk [vmem:[%s3132_s3 + $0x28] sm:$0xff] %vm681_vm0, %v345_v4  ;;  %686 = vst.msk [vmem:[%s3132_s3 + $0x20] sm:$0xff] %vm681_vm0, %v313_v5 }
  0xcc   : > { %v409_v6 = vpop.trf.xlu1  ;;  %v377_v7 = vpop.trf.xlu0 }
  0xcd   : > { %689 = vst.msk [vmem:[%s3132_s3 + $0x38] sm:$0xff] %vm681_vm0, %v409_v6  ;;  %688 = vst.msk [vmem:[%s3132_s3 + $0x30] sm:$0xff] %vm681_vm0, %v377_v7 }
  0xd0   : > { %v473_v8 = vpop.trf.xlu1  ;;  %v441_v9 = vpop.trf.xlu0 }
  0xd1   : > { %691 = vst.msk [vmem:[%s3132_s3 + $0x48] sm:$0xff] %vm681_vm0, %v473_v8  ;;  %690 = vst.msk [vmem:[%s3132_s3 + $0x40] sm:$0xff] %vm681_vm0, %v441_v9 }
  0xd4   : > { %v537_v10 = vpop.trf.xlu1  ;;  %v505_v11 = vpop.trf.xlu0 }
  0xd5   : > { %693 = vst.msk [vmem:[%s3132_s3 + $0x58] sm:$0xff] %vm681_vm0, %v537_v10  ;;  %692 = vst.msk [vmem:[%s3132_s3 + $0x50] sm:$0xff] %vm681_vm0, %v505_v11 }
  0xd8   : > { %v601_v12 = vpop.trf.xlu1  ;;  %v569_v13 = vpop.trf.xlu0 }
  0xd9   : > { %695 = vst.msk [vmem:[%s3132_s3 + $0x68] sm:$0xff] %vm681_vm0, %v601_v12  ;;  %694 = vst.msk [vmem:[%s3132_s3 + $0x60] sm:$0xff] %vm681_vm0, %v569_v13 }
  0xdc   : > { %v665_v14 = vpop.trf.xlu1  ;;  %v633_v15 = vpop.trf.xlu0 }
  0xdd   : > { %697 = vst.msk [vmem:[%s3132_s3 + $0x78] sm:$0xff] %vm681_vm0, %v665_v14  ;;  %696 = vst.msk [vmem:[%s3132_s3 + $0x70] sm:$0xff] %vm681_vm0, %v633_v15 }
  0xe0   : > { %v763_v16 = vpop.trf.xlu1  ;;  %v731_v17 = vpop.trf.xlu0 }
  0xe1   : > { %1245 = vrot.lane.b32.xlu1 %v763_v16, %s2917_s14 }
  0xe4   : > { %v795_v18 = vpop.trf.xlu0  ;;  %v827_v19 = vpop.trf.xlu1 }
  0xe5   : > { %1247 = vrot.lane.b32.xlu1 %v795_v18, %s2917_s14 }
  0xe8   : > { %v859_v20 = vpop.trf.xlu0  ;;  %v891_v21 = vpop.trf.xlu1 }
  0xe9   : > { %1249 = vrot.lane.b32.xlu1 %v827_v19, %s2917_s14 }
  0xec   : > { %v923_v22 = vpop.trf.xlu0  ;;  %v955_v23 = vpop.trf.xlu1 }
  0xed   : > { %1243 = vrot.lane.b32.xlu0 %v731_v17, %s2917_s14  ;;  %1251 = vrot.lane.b32.xlu1 %v859_v20, %s2917_s14 }
  0xf0   : > { %v987_v24 = vpop.trf.xlu0  ;;  %v1019_v25 = vpop.trf.xlu1 }
  0xf1   : > { %1255 = vrot.lane.b32.xlu1 %v923_v22, %s2917_s14  ;;  %1253 = vrot.lane.b32.xlu0 %v891_v21, %s2917_s14 }
  0xf4   : > { %v1051_v26 = vpop.trf.xlu0  ;;  %v1083_v27 = vpop.trf.xlu1 }
  0xf5   : > { %1259 = vrot.lane.b32.xlu1 %v987_v24, %s2917_s14  ;;  %1257 = vrot.lane.b32.xlu0 %v955_v23, %s2917_s14 }
  0xf8   : > { %v1115_v28 = vpop.trf.xlu0  ;;  %v1147_v29 = vpop.trf.xlu1 }
  0xf9   : > { %1263 = vrot.lane.b32.xlu1 %v1051_v26, %s2917_s14  ;;  %1261 = vrot.lane.b32.xlu0 %v1019_v25, %s2917_s14 }
  0xfc   : > { %v1179_v30 = vpop.trf.xlu0  ;;  %v1211_v31 = vpop.trf.xlu1 }
  0xfd   : > { %1267 = vrot.lane.b32.xlu1 %v1115_v28, %s2917_s14  ;;  %1265 = vrot.lane.b32.xlu0 %v1083_v27, %s2917_s14 }
 0x100   : > { %v1373_v32 = vpop.trf.xlu0  ;;  %v1341_v33 = vpop.trf.xlu1 }
 0x101   : > { %1271 = vrot.lane.b32.xlu1 %v1179_v30, %s2917_s14  ;;  %1269 = vrot.lane.b32.xlu0 %v1147_v29, %s2917_s14 }
 0x104   : > { %v1405_v34 = vpop.trf.xlu0  ;;  %v1501_v35 = vpop.trf.xlu1 }
 0x105   : > { %1855 = vrot.lane.b32.xlu1 %v1373_v32, %s2918_s18  ;;  %1273 = vrot.lane.b32.xlu0 %v1211_v31, %s2917_s14 }
 0x108   : > { %v1437_v36 = vpop.trf.xlu0  ;;  %v1565_v37 = vpop.trf.xlu1 }
 0x109   : > { %1857 = vrot.lane.b32.xlu1 %v1405_v34, %s2918_s18  ;;  %1853 = vrot.lane.b32.xlu0 %v1341_v33, %s2918_s18 }
 0x10c   : > { %v1469_v38 = vpop.trf.xlu0  ;;  %v1629_v39 = vpop.trf.xlu1 }
 0x10d   : > { %1859 = vrot.lane.b32.xlu1 %v1437_v36, %s2918_s18  ;;  %1863 = vrot.lane.b32.xlu0 %v1501_v35, %s2918_s18 }
 0x110   : > { %v1533_v40 = vpop.trf.xlu0  ;;  %v1693_v41 = vpop.trf.xlu1 }
 0x111   : > { %1861 = vrot.lane.b32.xlu1 %v1469_v38, %s2918_s18  ;;  %1867 = vrot.lane.b32.xlu0 %v1565_v37, %s2918_s18 }
 0x114   : > { %v1597_v42 = vpop.trf.xlu0  ;;  %v1757_v43 = vpop.trf.xlu1 }
 0x115   : > { %1865 = vrot.lane.b32.xlu1 %v1533_v40, %s2918_s18  ;;  %1871 = vrot.lane.b32.xlu0 %v1629_v39, %s2918_s18 }
 0x118   : > { %v1661_v44 = vpop.trf.xlu0  ;;  %v1821_v45 = vpop.trf.xlu1 }
 0x119   : > { %1869 = vrot.lane.b32.xlu1 %v1597_v42, %s2918_s18  ;;  %1875 = vrot.lane.b32.xlu0 %v1693_v41, %s2918_s18 }
 0x11c   : > { %v1725_v46 = vpop.trf.xlu0  ;;  %v1951_v47 = vpop.trf.xlu1 }
 0x11d   : > { %1873 = vrot.lane.b32.xlu1 %v1661_v44, %s2918_s18  ;;  %1879 = vrot.lane.b32.xlu0 %v1757_v43, %s2918_s18 }
 0x120   : > { %v1789_v48 = vpop.trf.xlu0  ;;  %v2111_v49 = vpop.trf.xlu1 }
 0x121   : > { %1877 = vrot.lane.b32.xlu1 %v1725_v46, %s2918_s18  ;;  %1883 = vrot.lane.b32.xlu0 %v1821_v45, %s2918_s18 }
 0x124   : > { %v1983_v50 = vpop.trf.xlu0  ;;  %v2175_v51 = vpop.trf.xlu1 }
 0x125   : > { %1881 = vrot.lane.b32.xlu1 %v1789_v48, %s2918_s18  ;;  %2463 = vrot.lane.b32.xlu0 %v1951_v47, %s2919_s23 }
 0x128   : > { %v2015_v52 = vpop.trf.xlu0  ;;  %v2239_v53 = vpop.trf.xlu1 }
 0x129   : > { %2465 = vrot.lane.b32.xlu1 %v1983_v50, %s2919_s23  ;;  %2473 = vrot.lane.b32.xlu0 %v2111_v49, %s2919_s23 }
 0x12c   : > { %v2047_v54 = vpop.trf.xlu0  ;;  %v2303_v55 = vpop.trf.xlu1 }
 0x12d   : > { %2467 = vrot.lane.b32.xlu1 %v2015_v52, %s2919_s23  ;;  %2477 = vrot.lane.b32.xlu0 %v2175_v51, %s2919_s23 }
 0x130   : > { %v2079_v56 = vpop.trf.xlu0  ;;  %v2367_v58 = vpop.trf.xlu1 }
 0x131   : > { %2469 = vrot.lane.b32.xlu1 %v2047_v54, %s2919_s23  ;;  %2481 = vrot.lane.b32.xlu0 %v2239_v53, %s2919_s23 }
 0x134   : > { %v2143_v57 = vpop.trf.xlu0  ;;  %v2431_v60 = vpop.trf.xlu1 }
 0x135   : > { %2471 = vrot.lane.b32.xlu1 %v2079_v56, %s2919_s23  ;;  %2485 = vrot.lane.b32.xlu0 %v2303_v55, %s2919_s23 }
 0x138   : > { %v2207_v59 = vpop.trf.xlu0 }
 0x139   : > { %2475 = vrot.lane.b32.xlu1 %v2143_v57, %s2919_s23  ;;  %2489 = vrot.lane.b32.xlu0 %v2367_v58, %s2919_s23 }
 0x13c   : > { %v2271_v61 = vpop.trf.xlu0 }
 0x13d   : > { %2479 = vrot.lane.b32.xlu1 %v2207_v59, %s2919_s23  ;;  %2493 = vrot.lane.b32.xlu0 %v2431_v60, %s2919_s23 }
 0x140   : > { %v2335_v62 = vpop.trf.xlu0 }
 0x141   : > { %2483 = vrot.lane.b32.xlu1 %v2271_v61, %s2919_s23 }
 0x144   : > { %v2399_v63 = vpop.trf.xlu0 }
 0x145   : > { %2487 = vrot.lane.b32.xlu1 %v2335_v62, %s2919_s23 }
 0x149   : > { %2491 = vrot.lane.b32.xlu1 %v2399_v63, %s2919_s23 }
 0x153   : > { %v1246_v0 = vpop.permute.xlu1 %1245 }
 0x154   : > { %1293 = vst.msk [vmem:[%s3132_s3 + $0x8] sm:$0xff] %vm1291_vm1, %v1246_v0 }
 0x157   : > { %v1248_v1 = vpop.permute.xlu1 %1247 }
 0x158   : > { %1294 = vst.msk [vmem:[%s3132_s3 + $0x10] sm:$0xff] %vm1291_vm1, %v1248_v1 }
 0x15b   : > { %v1250_v2 = vpop.permute.xlu1 %1249 }
 0x15c   : > { %1295 = vst.msk [vmem:[%s3132_s3 + $0x18] sm:$0xff] %vm1291_vm1, %v1250_v2 }
 0x15f   : > { %v1252_v3 = vpop.permute.xlu1 %1251  ;;  %v1244_v4 = vpop.permute.xlu0 %1243 }
 0x160   : > { %1296 = vst.msk [vmem:[%s3132_s3 + $0x20] sm:$0xff] %vm1291_vm1, %v1252_v3  ;;  %1292 = vst.msk [vmem:[%s3132_s3] sm:$0xff] %vm1291_vm1, %v1244_v4 }
 0x163   : > { %v1256_v5 = vpop.permute.xlu1 %1255  ;;  %v1254_v6 = vpop.permute.xlu0 %1253 }
 0x164   : > { %1298 = vst.msk [vmem:[%s3132_s3 + $0x30] sm:$0xff] %vm1291_vm1, %v1256_v5  ;;  %1297 = vst.msk [vmem:[%s3132_s3 + $0x28] sm:$0xff] %vm1291_vm1, %v1254_v6 }
 0x167   : > { %v1260_v7 = vpop.permute.xlu1 %1259  ;;  %v1258_v8 = vpop.permute.xlu0 %1257 }
 0x168   : > { %1300 = vst.msk [vmem:[%s3132_s3 + $0x40] sm:$0xff] %vm1291_vm1, %v1260_v7  ;;  %1299 = vst.msk [vmem:[%s3132_s3 + $0x38] sm:$0xff] %vm1291_vm1, %v1258_v8 }
 0x16b   : > { %v1264_v9 = vpop.permute.xlu1 %1263  ;;  %v1262_v10 = vpop.permute.xlu0 %1261 }
 0x16c   : > { %1302 = vst.msk [vmem:[%s3132_s3 + $0x50] sm:$0xff] %vm1291_vm1, %v1264_v9  ;;  %1301 = vst.msk [vmem:[%s3132_s3 + $0x48] sm:$0xff] %vm1291_vm1, %v1262_v10 }
 0x16f   : > { %v1268_v11 = vpop.permute.xlu1 %1267  ;;  %v1266_v12 = vpop.permute.xlu0 %1265 }
 0x170   : > { %1304 = vst.msk [vmem:[%s3132_s3 + $0x60] sm:$0xff] %vm1291_vm1, %v1268_v11  ;;  %1303 = vst.msk [vmem:[%s3132_s3 + $0x58] sm:$0xff] %vm1291_vm1, %v1266_v12 }
 0x173   : > { %v1272_v13 = vpop.permute.xlu1 %1271  ;;  %v1270_v14 = vpop.permute.xlu0 %1269 }
 0x174   : > { %1306 = vst.msk [vmem:[%s3132_s3 + $0x70] sm:$0xff] %vm1291_vm1, %v1272_v13  ;;  %1305 = vst.msk [vmem:[%s3132_s3 + $0x68] sm:$0xff] %vm1291_vm1, %v1270_v14 }
 0x177   : > { %v1856_v15 = vpop.permute.xlu1 %1855  ;;  %v1274_v16 = vpop.permute.xlu0 %1273 }
 0x178   : > { %1903 = vst.msk [vmem:[%s3132_s3 + $0x8] sm:$0xff] %vm1901_vm2, %v1856_v15 }
 0x179   : > { %1307 = vst.msk [vmem:[%s3132_s3 + $0x78] sm:$0xff] %vm1291_vm1, %v1274_v16 }
 0x17b   : > { %v1858_v17 = vpop.permute.xlu1 %1857  ;;  %v1854_v18 = vpop.permute.xlu0 %1853 }
 0x17c   : > { %1904 = vst.msk [vmem:[%s3132_s3 + $0x10] sm:$0xff] %vm1901_vm2, %v1858_v17  ;;  %1902 = vst.msk [vmem:[%s3132_s3] sm:$0xff] %vm1901_vm2, %v1854_v18 }
 0x17f   : > { %v1860_v19 = vpop.permute.xlu1 %1859  ;;  %v1864_v20 = vpop.permute.xlu0 %1863 }
 0x180   : > { %1905 = vst.msk [vmem:[%s3132_s3 + $0x18] sm:$0xff] %vm1901_vm2, %v1860_v19  ;;  %1907 = vst.msk [vmem:[%s3132_s3 + $0x28] sm:$0xff] %vm1901_vm2, %v1864_v20 }
 0x183   : > { %v1862_v21 = vpop.permute.xlu1 %1861  ;;  %v1868_v22 = vpop.permute.xlu0 %1867 }
 0x184   : > { %1906 = vst.msk [vmem:[%s3132_s3 + $0x20] sm:$0xff] %vm1901_vm2, %v1862_v21  ;;  %1909 = vst.msk [vmem:[%s3132_s3 + $0x38] sm:$0xff] %vm1901_vm2, %v1868_v22 }
 0x187   : > { %v1866_v23 = vpop.permute.xlu1 %1865  ;;  %v1872_v24 = vpop.permute.xlu0 %1871 }
 0x188   : > { %1908 = vst.msk [vmem:[%s3132_s3 + $0x30] sm:$0xff] %vm1901_vm2, %v1866_v23  ;;  %1911 = vst.msk [vmem:[%s3132_s3 + $0x48] sm:$0xff] %vm1901_vm2, %v1872_v24 }
 0x18b   : > { %v1870_v25 = vpop.permute.xlu1 %1869  ;;  %v1876_v26 = vpop.permute.xlu0 %1875 }
 0x18c   : > { %1910 = vst.msk [vmem:[%s3132_s3 + $0x40] sm:$0xff] %vm1901_vm2, %v1870_v25  ;;  %1913 = vst.msk [vmem:[%s3132_s3 + $0x58] sm:$0xff] %vm1901_vm2, %v1876_v26 }
 0x18f   : > { %v1874_v27 = vpop.permute.xlu1 %1873  ;;  %v1880_v28 = vpop.permute.xlu0 %1879 }
 0x190   : > { %1912 = vst.msk [vmem:[%s3132_s3 + $0x50] sm:$0xff] %vm1901_vm2, %v1874_v27  ;;  %1915 = vst.msk [vmem:[%s3132_s3 + $0x68] sm:$0xff] %vm1901_vm2, %v1880_v28 }
 0x193   : > { %v1878_v29 = vpop.permute.xlu1 %1877  ;;  %v1884_v30 = vpop.permute.xlu0 %1883 }
 0x194   : > { %1914 = vst.msk [vmem:[%s3132_s3 + $0x60] sm:$0xff] %vm1901_vm2, %v1878_v29  ;;  %1917 = vst.msk [vmem:[%s3132_s3 + $0x78] sm:$0xff] %vm1901_vm2, %v1884_v30 }
 0x197   : > { %v1882_v31 = vpop.permute.xlu1 %1881  ;;  %v2464_v32 = vpop.permute.xlu0 %2463 }
 0x198   : > { %1916 = vst.msk [vmem:[%s3132_s3 + $0x70] sm:$0xff] %vm1901_vm2, %v1882_v31 }
 0x199   : > { %2512 = vst.msk [vmem:[%s3132_s3] sm:$0xff] %vm2511_vm3, %v2464_v32 }
 0x19b   : > { %v2466_v33 = vpop.permute.xlu1 %2465  ;;  %v2474_v34 = vpop.permute.xlu0 %2473 }
 0x19c   : > { %2513 = vst.msk [vmem:[%s3132_s3 + $0x8] sm:$0xff] %vm2511_vm3, %v2466_v33  ;;  %2517 = vst.msk [vmem:[%s3132_s3 + $0x28] sm:$0xff] %vm2511_vm3, %v2474_v34 }
 0x19f   : > { %v2468_v35 = vpop.permute.xlu1 %2467  ;;  %v2478_v36 = vpop.permute.xlu0 %2477 }
 0x1a0   : > { %2514 = vst.msk [vmem:[%s3132_s3 + $0x10] sm:$0xff] %vm2511_vm3, %v2468_v35  ;;  %2519 = vst.msk [vmem:[%s3132_s3 + $0x38] sm:$0xff] %vm2511_vm3, %v2478_v36 }
 0x1a3   : > { %v2470_v37 = vpop.permute.xlu1 %2469  ;;  %v2482_v38 = vpop.permute.xlu0 %2481 }
 0x1a4   : > { %2515 = vst.msk [vmem:[%s3132_s3 + $0x18] sm:$0xff] %vm2511_vm3, %v2470_v37  ;;  %2521 = vst.msk [vmem:[%s3132_s3 + $0x48] sm:$0xff] %vm2511_vm3, %v2482_v38 }
 0x1a7   : > { %v2472_v39 = vpop.permute.xlu1 %2471  ;;  %v2486_v40 = vpop.permute.xlu0 %2485 }
 0x1a8   : > { %2516 = vst.msk [vmem:[%s3132_s3 + $0x20] sm:$0xff] %vm2511_vm3, %v2472_v39  ;;  %2523 = vst.msk [vmem:[%s3132_s3 + $0x58] sm:$0xff] %vm2511_vm3, %v2486_v40 }
 0x1ab   : > { %v2476_v41 = vpop.permute.xlu1 %2475  ;;  %v2490_v42 = vpop.permute.xlu0 %2489 }
 0x1ac   : > { %2518 = vst.msk [vmem:[%s3132_s3 + $0x30] sm:$0xff] %vm2511_vm3, %v2476_v41  ;;  %2525 = vst.msk [vmem:[%s3132_s3 + $0x68] sm:$0xff] %vm2511_vm3, %v2490_v42 }
 0x1af   : > { %v2480_v43 = vpop.permute.xlu1 %2479  ;;  %v2494_v44 = vpop.permute.xlu0 %2493 }
 0x1b0   : > { %2520 = vst.msk [vmem:[%s3132_s3 + $0x40] sm:$0xff] %vm2511_vm3, %v2480_v43  ;;  %2527 = vst.msk [vmem:[%s3132_s3 + $0x78] sm:$0xff] %vm2511_vm3, %v2494_v44 }
 0x1b3   : > { %v2484_v45 = vpop.permute.xlu1 %2483 }
 0x1b4   : > { %2522 = vst.msk [vmem:[%s3132_s3 + $0x50] sm:$0xff] %vm2511_vm3, %v2484_v45 }
 0x1b7   : > { %v2488_v46 = vpop.permute.xlu1 %2487 }
 0x1b8   : > { %2524 = vst.msk [vmem:[%s3132_s3 + $0x60] sm:$0xff] %vm2511_vm3, %v2488_v46 }
 0x1bb   : > { %v2492_v47 = vpop.permute.xlu1 %2491 }
 0x1bc   : > { %2526 = vst.msk [vmem:[%s3132_s3 + $0x70] sm:$0xff] %vm2511_vm3, %v2492_v47 }
 0x1bd   : > { %2827 = shalt.err (!%p2824_p3)
}
 0x1be   : > { %s2828_s3 = scalar_lea.hbm %s3299_s28, 2048  ;;  %s2832_s2 = scalar_lea.hbm %s3359_s1, 8192 }
 0x1bf   : > { %p2829_p5 = scmp.ne.s32.totalorder %s3299_s28, %s2828_s3  ;;  %p2833_p2 = scmp.lt.u32.totalorder %s3299_s28, %s3359_s1 }
 0x1c0   : > { %p2834_p4 = scmp.lt.u32.totalorder %s2832_s2, %s2828_s3  ;;  %p2836_p8 = scmp.lt.u32.totalorder %s2828_s3, %s3299_s28 }
 0x1c1   : > { %p2830_p6 = pnand %p2829_p5, %p3366_p9 }
 0x1c2   : > { %p2835_p10 = por %p2834_p4, %p2833_p2 }
 0x1c3   : > { %p2831_p7 = pneg %p2830_p6 }
 0x1c4   : > { %p2837_p12 = por %p2836_p8, %p2835_p10 }
 0x1c6   : > { %p2838_p0 = pnand %p2837_p12, %p2831_p7 }
 0x1c8   : > { %2841 = shalt.err (!%p2838_p0)
}
 0x1c9   : > { %s2921_s5 = smov 128  }
 0x1ca   : > { %2701 = dma.vmem_to_hbm [thread:$0]  (%p3366_p9), %s3301_s15, 2048, %s3299_s28, %s2529_s9, %s2921_s5, %s2921_s5, %s2917_s14  }
 0x1cb PF: > { %p2712_p11 = scmp.ge.s32.totalorder %s2912_s13, 2  ;;  %s2559_s19 = sand.u32 1, %s2884_s6  }
 0x1cc   : > { %p3367_p13 = scmp.ne.s32.totalorder %s3364_s25, 0  ;;  %s2560_s24 = scalar_lea.sflag [#allocation4], %s2559_s19 }
 0x1ce   : > { %p2708_p1 = pnand %p2712_p11, %p3367_p13 }
 0x1d0   : > { %2879 = dma.done.wait (!%p2708_p1), %s2560_s24, 2048  }
 0x1d1   : > { %2881 = vsyncadd (!%p2708_p1), %s2560_s24, 4294965248  ;;  %s17_s13 = sadd.s32 1, %s2912_s13   ;;  %s3368_s6 = smov %s2888_s7 }
 0x1d2   : > { %p14_p3 = scmp.ge.s32.totalorder %s17_s13, 6   ;;  %s3369_s7 = smov %s2892_s8 }
 0x1d3   : > { %s3370_s8 = smov %s3010_s27  ;;  %s3371_s9 = smov %s2904_s11 }
 0x1d4   : > { %s3372_s10 = smov %s2908_s12  ;;  %s3373_s11 = smov %s3376_s16 }
 0x1d5   : > { %s3374_s12 = smov %s3380_s17  ;;  %16 = sbr.rel (!%p14_p3) target bundleno = 7 (0x7), region = 72 }
 0x1dc   :  { %2565 = vsyncpa [#allocation3], 1 }
 0x1dd   :  { %2567 = vsyncpa [#allocation3 + $0x1], 1 }
 0x1de   :  { %2568 = vsyncpa [#allocation4], 1 }
 0x1df   :  { %2570 = vsyncpa [#allocation4 + $0x1], 1 }

// kernel: tpu_custom_call.1
= control target key start
LH: loop header
LB: loop body
LE: loop exit
PB: predicated region body
PF: predicated region fallthrough
CT: control target
= control target key end

     0   :  { %6 = vsyncpa [#allocation3], 0  ;;  %s3524_s0 = inlined_call_operand.hbm [shape: f32[2,2,2,2,2,8,8,8], index: 0, kind: input, shape index: {}]   ;;  %s3525_s1 = inlined_call_operand.hbm [shape: f32[2,2,2,8,8,32], index: 1, kind: output, shape index: {}]  }
   0x1   :  { %8 = vsyncpa [#allocation3 + $0x1], 0 }
   0x2   :  { %9 = vsyncpa [#allocation4], 0 }
   0x3   :  { %11 = vsyncpa [#allocation4 + $0x1], 0  ;;  %s3082_s6 = smov 0   ;;  %s3084_s7 = smov 0  }
   0x4   :  { %s3086_s8 = smov 0   ;;  %s3088_s9 = smov 0  }
   0x5   :  { %s3090_s10 = smov 0   ;;  %s3092_s11 = smov 0  }
   0x6   :  { %s3094_s12 = smov 0   ;;  %s3096_s13 = smov 0  }
   0x7 LB: > { %s2709_s14 = sadd.s32 4294967295, %s3062_s13   ;;  %s2710_s15 = sadd.s32 4294967294, %s3062_s13   ;;  %s3062_s13 = sphi %s3096_s13, %s17_s13   ;;  %s3058_s12 = sphi %s3094_s12, %s3540_s12   ;;  %s3054_s11 = sphi %s3092_s11, %s3539_s11   ;;  %s3050_s10 = sphi %s3090_s10, %s3538_s10   ;;  %s3046_s9 = sphi %s3088_s9, %s3537_s9   ;;  %s3042_s8 = sphi %s3086_s8, %s3536_s8   ;;  %s3038_s7 = sphi %s3084_s7, %s3535_s7   ;;  %s3034_s6 = sphi %s3082_s6, %s3534_s6  }
   0x8   : > { %s26_s16 = sadd.s32 1, %s3054_s11  ;;  %s29_s17 = sadd.s32 1, %s3058_s12 }
   0x9   : > { %p27_p0 = scmp.ge.s32.totalorder %s26_s16, 2  ;;  %s38_s18 = sadd.s32 1, %s3042_s8 }
   0xa   : > { %p45_p1 = scmp.ne.s32.totalorder %s3042_s8, %s3038_s7  ;;  %p46_p2 = scmp.eq.s32.totalorder %s3062_s13, 0 }
   0xb   : > { %s3542_s16 = smov (%p27_p0, %s26_s16), 0  ;;  %s3544_s17 = smov (!%p27_p0, %s29_s17), %s3058_s12 }
   0xc   : > { %s34_s19 = ssub.s32 %s3054_s11, %s3542_s16  ;;  %p3135_p3 = por %p46_p2, %p45_p1 }
   0xd   : > { %p31_p4 = scmp.ge.s32.totalorder %s3544_s17, 2  ;;  %p51_p5 = scmp.ne.s32.totalorder %s3038_s7, %s3034_s6 }
   0xe   : > { %p52_p6 = scmp.eq.s32.totalorder %s2709_s14, 0  ;;  %p77_p7 = scmp.eq.s32.totalorder %s2709_s14, 3 }
   0xf   : > { %s3546_s17 = smov (%p31_p4, %s3544_s17), 0  ;;  %p83_p10 = scmp.eq.s32.totalorder %s2710_s15, 3 }
  0x10   : > { %p3143_p8 = por %p52_p6, %p51_p5  ;;  %p3147_p9 = por %p77_p7, %p45_p1 }
  0x11   : > { %s33_s23 = ssub.s32 %s3058_s12, %s3546_s17  ;;  %p3153_p12 = por %p83_p10, %p51_p5 }
  0x12   : > { %s3529_s22 = scalar_select %p3147_p9, 1, 0 }
  0x13   : > { %s35_s24 = sor.u32 %s34_s19, %s33_s23  ;;  %p2861_p13 = scmp.lt.s32.totalorder %s3062_s13, 4 }
  0x14   : > { %p36_p11 = scmp.eq.s32.totalorder %s35_s24, 0  ;;  %s103_s26 = sand.u32 1, %s3042_s8  }
  0x15   : > { %s3530_s25 = scalar_select %p3153_p12, 1, 0 }
  0x16   : > { %s3160_s27 = scalar_select %p36_p11, %s3042_s8, %s38_s18  }
  0x17   : > { %s2713_s28 = sshll.u32 %s103_s26, 9  ;;  %s2714_s29 = sshll.u32 %s3054_s11, 6 }
  0x18   : > { %s2715_s30 = sshll.u32 %s3058_s12, 7  ;;  %s107_s2 = scalar_lea.vmem [#allocation2], %s2713_s28 }
  0x19   : > { %s116_s3 = sshll.u32 %s107_s2, 4  ;;  %s113_s4 = sadd.s32 %s2715_s30, %s2714_s29  ;;  %s3164_s3 = int_to_ptr.vmem [resolvable:$true] %s116_s3 }
  0x1a   : > { %s2716_s5 = sshll.u32 %s113_s4, 7  ;;  %p3168_p0 = pnand %p2861_p13, %p3135_p3 }
  0x1b   : > { %s3175_s18 = scalar_lea.hbm %s3524_s0, %s2716_s5  ;;  %s3177_s23 = scalar_lea.sflag [#allocation3], %s103_s26 }
  0x1c   : > { %s2934_s24 = scalar_lea.hbm %s3175_s18, 8192  ;;  %p2936_p2 = pneg %p3168_p0 }
  0x1d   : > { %p2935_p1 = scmp.ne.s32.totalorder %s3175_s18, %s2934_s24  ;;  %s2939_s29 = scalar_lea.hbm %s3524_s0, 32768 }
  0x1e   : > { %p2940_p5 = scmp.lt.u32.totalorder %s3175_s18, %s3524_s0  ;;  %p2941_p6 = scmp.lt.u32.totalorder %s2939_s29, %s2934_s24 }
  0x1f   : > { %p2937_p3 = pnand %p2936_p2, %p2935_p1  ;;  %p2943_p10 = scmp.lt.u32.totalorder %s2934_s24, %s3175_s18 }
  0x20   : > { %p2942_p7 = por %p2941_p6, %p2940_p5 }
  0x21   : > { %p2938_p4 = pneg %p2937_p3 }
  0x22   : > { %p2944_p11 = por %p2943_p10, %p2942_p7 }
  0x24   : > { %p2945_p13 = pnand %p2944_p11, %p2938_p4 }
  0x26   : > { %2948 = shalt.err (!%p2945_p13)
}
  0x27   : > { %s2949_s26 = scalar_lea.vmem %s3164_s3, 8192  ;;  %s3064_s4 = smov [#allocation2]  }
  0x28   : > { %p2950_p1 = scmp.ne.s32.totalorder %s3164_s3, %s2949_s26  ;;  %s2954_s5 = sshll.u32 %s3064_s4, 4  ;;  %s2955_s5 = int_to_ptr.vmem [resolvable:$false] %s2954_s5 }
  0x29   : > { %s2956_s15 = scalar_lea.vmem %s2955_s5, 16384  ;;  %p2957_p9 = scmp.lt.s32.totalorder %s3164_s3, %s2955_s5 }
  0x2a   : > { %p2952_p3 = pnand %p2950_p1, %p2936_p2  ;;  %p2958_p5 = scmp.lt.s32.totalorder %s2956_s15, %s2949_s26 }
  0x2c   : > { %p2953_p12 = pneg %p2952_p3  ;;  %p2959_p6 = por %p2958_p5, %p2957_p9 }
  0x2e   : > { %p2960_p7 = pnand %p2959_p6, %p2953_p12 }
  0x30   : > { %2963 = shalt.err (!%p2960_p7)
}
  0x31   : > { %s3065_s19 = smov 128   ;;  %s3066_s24 = smov 8  }
  0x32   : > { %2856 = dma.hbm_to_vmem [thread:$0]  (!%p3168_p0), %s3175_s18, 8192, %s3164_s3, %s3177_s23, %s3065_s19, %s3065_s19, %s3066_s24  }
  0x33   : > { %p2717_p2 = scmp.ge.s32.totalorder %s3062_s13, 1  ;;  %p124_p4 = scmp.lt.s32.totalorder %s3062_s13, 5 }
  0x35   : > { %p125_p10 = pnand %p2717_p2, %p124_p4 }
  0x36   : > { %s3208_s20 = sand.u32 (!%p125_p10), 1, %s3038_s7  }
  0x37   : > { %128 = sbr.rel (%p125_p10) target bundleno = 527 (0x20f), region = 24  ;;  %s2718_s28 = sshll.u32 (!%p125_p10), %s3208_s20, 9 }
  0x38   : > { %s131_s29 = scalar_lea.sflag (!%p125_p10), [#allocation3], %s3208_s20  ;;  %s3212_s30 = scalar_lea.vmem (!%p125_p10), [#allocation2], %s2718_s28 }
  0x3e   : > { %3025 = dma.done.wait (%p3143_p8), %s131_s29, 8192  }
  0x3f   : > { %3027 = vsyncadd (%p3143_p8), %s131_s29, 4294959104  ;;  %v153_v0 = vld [vmem:[%s3212_s30] sm:$0xff]  ;;  %v2720_v1 = vld [vmem:[%s3212_s30 + $0x8] sm:$0xff]  ;;  %s2719_s21 = sshll.u32 %s3208_s20, 7  ;;  %vm186_vm0 = vcmask 64512   ;;  %s3067_s14 = smov 8  }
  0x40   : > { %154 = vxpose.xlu0.b32.start.end [1/1] (short) (narrow) %v153_v0, 8  ;;  %v2726_v2 = vld [vmem:[%s3212_s30 + $0x20] sm:$0xff]  ;;  %v2722_v3 = vld [vmem:[%s3212_s30 + $0x10] sm:$0xff]  ;;  %v2724_v4 = vld [vmem:[%s3212_s30 + $0x18] sm:$0xff]  ;;  %s3264_s3 = scalar_lea.vmem [#allocation5], %s2719_s21  ;;  %s3068_s18 = smov 16  }
  0x41   : > { %226 = vxpose.xlu1.b32.start.end [1/1] (short) (narrow) %v2722_v3, 8  ;;  %v2730_v5 = vld [vmem:[%s3212_s30 + $0x30] sm:$0xff]  ;;  %v2728_v6 = vld [vmem:[%s3212_s30 + $0x28] sm:$0xff]  ;;  %v2734_v7 = vld [vmem:[%s3212_s30 + $0x80] sm:$0xff]  ;;  %vm766_vm1 = vcmask 130112   ;;  %s3069_s23 = smov 24  }
  0x42   : > { %v2732_v8 = vld [vmem:[%s3212_s30 + $0x38] sm:$0xff]  ;;  %v2738_v9 = vld [vmem:[%s3212_s30 + $0x90] sm:$0xff]  ;;  %v2736_v10 = vld [vmem:[%s3212_s30 + $0x88] sm:$0xff]  ;;  %vm1391_vm2 = vcmask 195712   ;;  %vm2016_vm3 = vcmask 261312   ;;  %s2844_s2 = sshll.u32 %s3046_s9, 4 }
  0x43   : > { %v2742_v11 = vld [vmem:[%s3212_s30 + $0xa0] sm:$0xff]  ;;  %v2740_v12 = vld [vmem:[%s3212_s30 + $0x98] sm:$0xff]  ;;  %v2746_v13 = vld [vmem:[%s3212_s30 + $0xb0] sm:$0xff]  ;;  %s2845_s26 = sshll.u32 %s3050_s10, 5  ;;  %s2619_s15 = sshll.u32 %s3264_s3, 4  ;;  %s3467_s15 = int_to_ptr.vmem [resolvable:$true] %s2619_s15 }
  0x44   : > { %190 = vxpose.xlu0.b32.start.end [1/1] (short) (narrow) %v2720_v1, 8  ;;  %v2744_v14 = vld [vmem:[%s3212_s30 + $0xa8] sm:$0xff]  ;;  %v2750_v15 = vld [vmem:[%s3212_s30 + $0x40] sm:$0xff]  ;;  %v2748_v16 = vld [vmem:[%s3212_s30 + $0xb8] sm:$0xff]  ;;  %s2616_s4 = sadd.s32 %s2845_s26, %s2844_s2  ;;  %s2604_s9 = scalar_lea.sflag [#allocation4], %s3208_s20 }
  0x45   : > { %262 = vxpose.xlu1.b32.start.end [1/1] (short) (narrow) %v2724_v4, 8  ;;  %v2751_v17 = vld [vmem:[%s3212_s30 + $0x48] sm:$0xff]  ;;  %v2753_v18 = vld [vmem:[%s3212_s30 + $0x50] sm:$0xff]  ;;  %v2755_v19 = vld [vmem:[%s3212_s30 + $0x58] sm:$0xff]  ;;  %s2846_s5 = sshll.u32 %s2616_s4, 7  ;;  %s2964_s10 = scalar_lea.vmem %s3467_s15, 2048 }
  0x46   : > { %v2759_v20 = vld [vmem:[%s3212_s30 + $0x68] sm:$0xff]  ;;  %v2757_v21 = vld [vmem:[%s3212_s30 + $0x60] sm:$0xff]  ;;  %v2761_v23 = vld [vmem:[%s3212_s30 + $0x70] sm:$0xff]  ;;  %s3465_s28 = scalar_lea.hbm %s3525_s1, %s2846_s5  ;;  %p2965_p8 = scmp.ne.s32.totalorder %s3467_s15, %s2964_s10 }
  0x47   : > { %v2765_v22 = vld [vmem:[%s3212_s30 + $0xc0] sm:$0xff]  ;;  %v2839_v24 = vld [vmem:[%s3212_s30 + $0x1f0] sm:$0xff]  ;;  %v2763_v25 = vld [vmem:[%s3212_s30 + $0x78] sm:$0xff]  ;;  %p3532_p9 = scmp.ne.s32.totalorder %s3529_s22, 0  ;;  %s3070_s29 = smov [#allocation5]  }
  0x48   : > { %298 = vxpose.xlu0.b32.start.end [1/1] (short) (narrow) %v2726_v2, 8  ;;  %v2767_v26 = vld [vmem:[%s3212_s30 + $0xc8] sm:$0xff]  ;;  %v2769_v27 = vld [vmem:[%s3212_s30 + $0xd0] sm:$0xff]  ;;  %v2771_v28 = vld [vmem:[%s3212_s30 + $0xd8] sm:$0xff] }
  0x49   : > { %334 = vxpose.xlu1.b32.start.end [1/1] (short) (narrow) %v2728_v6, 8  ;;  %v2773_v29 = vld [vmem:[%s3212_s30 + $0xe0] sm:$0xff]  ;;  %v2775_v30 = vld [vmem:[%s3212_s30 + $0xe8] sm:$0xff]  ;;  %v2777_v31 = vld [vmem:[%s3212_s30 + $0xf0] sm:$0xff]  ;;  %p2966_p12 = pnand %p2965_p8, %p3532_p9 }
  0x4a   : > { %v2779_v32 = vld [vmem:[%s3212_s30 + $0xf8] sm:$0xff]  ;;  %v2781_v33 = vld [vmem:[%s3212_s30 + $0x100] sm:$0xff]  ;;  %v2782_v34 = vld [vmem:[%s3212_s30 + $0x108] sm:$0xff] }
  0x4b   : > { %v2784_v35 = vld [vmem:[%s3212_s30 + $0x110] sm:$0xff]  ;;  %v2786_v36 = vld [vmem:[%s3212_s30 + $0x118] sm:$0xff]  ;;  %v2788_v37 = vld [vmem:[%s3212_s30 + $0x120] sm:$0xff]  ;;  %p2967_p0 = pneg %p2966_p12 }
  0x4c   : > { %370 = vxpose.xlu0.b32.start.end [1/1] (short) (narrow) %v2730_v5, 8  ;;  %v2790_v38 = vld [vmem:[%s3212_s30 + $0x128] sm:$0xff]  ;;  %v2792_v39 = vld [vmem:[%s3212_s30 + $0x130] sm:$0xff]  ;;  %v2794_v40 = vld [vmem:[%s3212_s30 + $0x138] sm:$0xff] }
  0x4d   : > { %406 = vxpose.xlu1.b32.start.end [1/1] (short) (narrow) %v2732_v8, 8  ;;  %v2796_v41 = vld [vmem:[%s3212_s30 + $0x180] sm:$0xff]  ;;  %v2798_v42 = vld [vmem:[%s3212_s30 + $0x188] sm:$0xff]  ;;  %v2800_v43 = vld [vmem:[%s3212_s30 + $0x190] sm:$0xff] }
  0x4e   : > { %v2802_v44 = vld [vmem:[%s3212_s30 + $0x198] sm:$0xff]  ;;  %v2804_v46 = vld [vmem:[%s3212_s30 + $0x1a0] sm:$0xff]  ;;  %v2806_v48 = vld [vmem:[%s3212_s30 + $0x1a8] sm:$0xff] }
  0x4f   : > { %v2808_v51 = vld [vmem:[%s3212_s30 + $0x1b0] sm:$0xff]  ;;  %v2810_v54 = vld [vmem:[%s3212_s30 + $0x1b8] sm:$0xff]  ;;  %v2812_v57 = vld [vmem:[%s3212_s30 + $0x140] sm:$0xff] }
  0x50   : > { %442 = vxpose.xlu0.b32.start.end [1/1] (short) (narrow) %v2734_v7, 8  ;;  %v2813_v60 = vld [vmem:[%s3212_s30 + $0x148] sm:$0xff]  ;;  %v2815_v63 = vld [vmem:[%s3212_s30 + $0x150] sm:$0xff]  ;;  %v2817_v2 = vld [vmem:[%s3212_s30 + $0x158] sm:$0xff] }
  0x51   : > { %478 = vxpose.xlu1.b32.start.end [1/1] (short) (narrow) %v2736_v10, 8  ;;  %v2819_v5 = vld [vmem:[%s3212_s30 + $0x160] sm:$0xff]  ;;  %v2821_v8 = vld [vmem:[%s3212_s30 + $0x168] sm:$0xff]  ;;  %v2823_v10 = vld [vmem:[%s3212_s30 + $0x170] sm:$0xff] }
  0x54   : > { %514 = vxpose.xlu0.b32.start.end [1/1] (short) (narrow) %v2738_v9, 8 }
  0x55   : > { %550 = vxpose.xlu1.b32.start.end [1/1] (short) (narrow) %v2740_v12, 8  ;;  %v2825_v12 = vld [vmem:[%s3212_s30 + $0x178] sm:$0xff] }
  0x58   : > { %586 = vxpose.xlu0.b32.start.end [1/1] (short) (narrow) %v2742_v11, 8 }
  0x59   : > { %622 = vxpose.xlu1.b32.start.end [1/1] (short) (narrow) %v2744_v14, 8  ;;  %v2827_v14 = vld [vmem:[%s3212_s30 + $0x1c0] sm:$0xff] }
  0x5c   : > { %658 = vxpose.xlu0.b32.start.end [1/1] (short) (narrow) %v2746_v13, 8 }
  0x5d   : > { %694 = vxpose.xlu1.b32.start.end [1/1] (short) (narrow) %v2748_v16, 8  ;;  %v2829_v16 = vld [vmem:[%s3212_s30 + $0x1c8] sm:$0xff] }
  0x60   : > { %730 = vxpose.xlu0.b32.start.end [1/1] (short) (narrow) %v2750_v15, 8 }
  0x61   : > { %809 = vxpose.xlu1.b32.start.end [1/1] (short) (narrow) %v2753_v18, 8  ;;  %v2831_v18 = vld [vmem:[%s3212_s30 + $0x1d0] sm:$0xff] }
  0x64   : > { %770 = vxpose.xlu0.b32.start.end [1/1] (short) (narrow) %v2751_v17, 8 }
  0x65   : > { %926 = vxpose.xlu1.b32.start.end [1/1] (short) (narrow) %v2759_v20, 8  ;;  %v2833_v20 = vld [vmem:[%s3212_s30 + $0x1d8] sm:$0xff] }
  0x68   : > { %848 = vxpose.xlu0.b32.start.end [1/1] (short) (narrow) %v2755_v19, 8 }
  0x69   : > { %1043 = vxpose.xlu1.b32.start.end [1/1] (short) (narrow) %v2765_v22, 8  ;;  %v2835_v22 = vld [vmem:[%s3212_s30 + $0x1e0] sm:$0xff] }
  0x6c   : > { %887 = vxpose.xlu0.b32.start.end [1/1] (short) (narrow) %v2757_v21, 8 }
  0x6d   : > { %2527 = vxpose.xlu1.b32.start.end [1/1] (short) (narrow) %v2839_v24, 8  ;;  %v2837_v24 = vld [vmem:[%s3212_s30 + $0x1e8] sm:$0xff] }
  0x70   : > { %965 = vxpose.xlu0.b32.start.end [1/1] (short) (narrow) %v2761_v23, 8 }
  0x74   : > { %1004 = vxpose.xlu0.b32.start.end [1/1] (short) (narrow) %v2763_v25, 8 }
  0x78   : > { %1082 = vxpose.xlu0.b32.start.end [1/1] (short) (narrow) %v2767_v26, 8  ;;  %v2841_v26 = vld [vmem:[%s3212_s30 + $0x1f8] sm:$0xff]  ;;  %s2968_s30 = sshll.u32 %s3070_s29, 4  ;;  %s2969_s30 = int_to_ptr.vmem [resolvable:$false] %s2968_s30 }
  0x79   : > { %s2970_s21 = scalar_lea.vmem %s2969_s30, 4096  ;;  %p2971_p11 = scmp.lt.s32.totalorder %s3467_s15, %s2969_s30 }
  0x7a   : > { %p2972_p13 = scmp.lt.s32.totalorder %s2970_s21, %s2964_s10 }
  0x7c   : > { %1121 = vxpose.xlu0.b32.start.end [1/1] (short) (narrow) %v2769_v27, 8  ;;  %p2973_p1 = por %p2972_p13, %p2971_p11 }
  0x7e   : > { %p2974_p3 = pnand %p2973_p1, %p2967_p0 }
  0x80   : > { %1160 = vxpose.xlu0.b32.start.end [1/1] (short) (narrow) %v2771_v28, 8 }
  0x84   : > { %1199 = vxpose.xlu0.b32.start.end [1/1] (short) (narrow) %v2773_v29, 8 }
  0x88   : > { %1238 = vxpose.xlu0.b32.start.end [1/1] (short) (narrow) %v2775_v30, 8 }
  0x8c   : > { %1277 = vxpose.xlu0.b32.start.end [1/1] (short) (narrow) %v2777_v31, 8 }
  0x90   : > { %1316 = vxpose.xlu0.b32.start.end [1/1] (short) (narrow) %v2779_v32, 8 }
  0x94   : > { %1355 = vxpose.xlu0.b32.start.end [1/1] (short) (narrow) %v2781_v33, 8 }
  0x98   : > { %1395 = vxpose.xlu0.b32.start.end [1/1] (short) (narrow) %v2782_v34, 8 }
  0x9c   : > { %1434 = vxpose.xlu0.b32.start.end [1/1] (short) (narrow) %v2784_v35, 8 }
  0xa0   : > { %1473 = vxpose.xlu0.b32.start.end [1/1] (short) (narrow) %v2786_v36, 8 }
  0xa4   : > { %1512 = vxpose.xlu0.b32.start.end [1/1] (short) (narrow) %v2788_v37, 8 }
  0xa8   : > { %1551 = vxpose.xlu0.b32.start.end [1/1] (short) (narrow) %v2790_v38, 8 }
  0xac   : > { %1590 = vxpose.xlu0.b32.start.end [1/1] (short) (narrow) %v2792_v39, 8 }
  0xb0   : > { %1629 = vxpose.xlu0.b32.start.end [1/1] (short) (narrow) %v2794_v40, 8 }
  0xb4   : > { %1668 = vxpose.xlu0.b32.start.end [1/1] (short) (narrow) %v2796_v41, 8 }
  0xb8   : > { %1707 = vxpose.xlu0.b32.start.end [1/1] (short) (narrow) %v2798_v42, 8 }
  0xbc   : > { %1746 = vxpose.xlu0.b32.start.end [1/1] (short) (narrow) %v2800_v43, 8 }
  0xc0   : > { %1785 = vxpose.xlu0.b32.start.end [1/1] (short) (narrow) %v2802_v44, 8  ;;  %v170_v45 = vpop.trf.xlu0 }
  0xc1   : > { %187 = vst.msk [vmem:[%s3264_s3] sm:$0xff] %vm186_vm0, %v170_v45  ;;  %v242_v49 = vpop.trf.xlu1 }
  0xc2   : > { %2723 = vst.msk [vmem:[%s3264_s3 + $0x10] sm:$0xff] %vm186_vm0, %v242_v49 }
  0xc4   : > { %1824 = vxpose.xlu0.b32.start.end [1/1] (short) (narrow) %v2804_v46, 8  ;;  %v206_v47 = vpop.trf.xlu0 }
  0xc5   : > { %2721 = vst.msk [vmem:[%s3264_s3 + $0x8] sm:$0xff] %vm186_vm0, %v206_v47  ;;  %v278_v52 = vpop.trf.xlu1 }
  0xc6   : > { %2725 = vst.msk [vmem:[%s3264_s3 + $0x18] sm:$0xff] %vm186_vm0, %v278_v52 }
  0xc8   : > { %1863 = vxpose.xlu0.b32.start.end [1/1] (short) (narrow) %v2806_v48, 8  ;;  %v314_v50 = vpop.trf.xlu0 }
  0xc9   : > { %2727 = vst.msk [vmem:[%s3264_s3 + $0x20] sm:$0xff] %vm186_vm0, %v314_v50  ;;  %v350_v55 = vpop.trf.xlu1 }
  0xca   : > { %2729 = vst.msk [vmem:[%s3264_s3 + $0x28] sm:$0xff] %vm186_vm0, %v350_v55 }
  0xcc   : > { %1902 = vxpose.xlu0.b32.start.end [1/1] (short) (narrow) %v2808_v51, 8  ;;  %v386_v53 = vpop.trf.xlu0 }
  0xcd   : > { %2731 = vst.msk [vmem:[%s3264_s3 + $0x30] sm:$0xff] %vm186_vm0, %v386_v53  ;;  %v422_v58 = vpop.trf.xlu1 }
  0xce   : > { %2733 = vst.msk [vmem:[%s3264_s3 + $0x38] sm:$0xff] %vm186_vm0, %v422_v58 }
  0xd0   : > { %1941 = vxpose.xlu0.b32.start.end [1/1] (short) (narrow) %v2810_v54, 8  ;;  %v458_v56 = vpop.trf.xlu0 }
  0xd1   : > { %2735 = vst.msk [vmem:[%s3264_s3 + $0x40] sm:$0xff] %vm186_vm0, %v458_v56  ;;  %v494_v61 = vpop.trf.xlu1 }
  0xd2   : > { %2737 = vst.msk [vmem:[%s3264_s3 + $0x48] sm:$0xff] %vm186_vm0, %v494_v61 }
  0xd4   : > { %1980 = vxpose.xlu0.b32.start.end [1/1] (short) (narrow) %v2812_v57, 8  ;;  %v530_v59 = vpop.trf.xlu0 }
  0xd5   : > { %2739 = vst.msk [vmem:[%s3264_s3 + $0x50] sm:$0xff] %vm186_vm0, %v530_v59  ;;  %v566_v0 = vpop.trf.xlu1 }
  0xd6   : > { %2741 = vst.msk [vmem:[%s3264_s3 + $0x58] sm:$0xff] %vm186_vm0, %v566_v0 }
  0xd8   : > { %2020 = vxpose.xlu0.b32.start.end [1/1] (short) (narrow) %v2813_v60, 8  ;;  %v602_v62 = vpop.trf.xlu0 }
  0xd9   : > { %2743 = vst.msk [vmem:[%s3264_s3 + $0x60] sm:$0xff] %vm186_vm0, %v602_v62  ;;  %v638_v3 = vpop.trf.xlu1 }
  0xda   : > { %2745 = vst.msk [vmem:[%s3264_s3 + $0x68] sm:$0xff] %vm186_vm0, %v638_v3 }
  0xdc   : > { %2059 = vxpose.xlu0.b32.start.end [1/1] (short) (narrow) %v2815_v63, 8  ;;  %v674_v1 = vpop.trf.xlu0 }
  0xdd   : > { %2747 = vst.msk [vmem:[%s3264_s3 + $0x70] sm:$0xff] %vm186_vm0, %v674_v1  ;;  %v710_v6 = vpop.trf.xlu1 }
  0xde   : > { %2749 = vst.msk [vmem:[%s3264_s3 + $0x78] sm:$0xff] %vm186_vm0, %v710_v6 }
  0xe0   : > { %2098 = vxpose.xlu0.b32.start.end [1/1] (short) (narrow) %v2817_v2, 8  ;;  %v746_v4 = vpop.trf.xlu0 }
  0xe1   : > { %763 = vrot.lane.b32.xlu1 %v746_v4, %s3067_s14  ;;  %v825_v38 = vpop.trf.xlu1 }
  0xe4   : > { %2137 = vxpose.xlu0.b32.start.end [1/1] (short) (narrow) %v2819_v5, 8  ;;  %v786_v7 = vpop.trf.xlu0 }
  0xe5   : > { %v942_v41 = vpop.trf.xlu1 }
  0xe8   : > { %2176 = vxpose.xlu0.b32.start.end [1/1] (short) (narrow) %v2821_v8, 8  ;;  %v864_v9 = vpop.trf.xlu0 }
  0xe9   : > { %881 = vrot.lane.b32.xlu1 %v864_v9, %s3067_s14  ;;  %v1059_v44 = vpop.trf.xlu1 }
  0xec   : > { %2215 = vxpose.xlu0.b32.start.end [1/1] (short) (narrow) %v2823_v10, 8  ;;  %v903_v11 = vpop.trf.xlu0 }
  0xed   : > { %v2543_v47 = vpop.trf.xlu1 }
  0xf0   : > { %2254 = vxpose.xlu0.b32.start.end [1/1] (short) (narrow) %v2825_v12, 8  ;;  %v981_v13 = vpop.trf.xlu0 }
  0xf1   : > { %998 = vrot.lane.b32.xlu1 %v981_v13, %s3067_s14 }
  0xf4   : > { %2293 = vxpose.xlu0.b32.start.end [1/1] (short) (narrow) %v2827_v14, 8  ;;  %v1020_v15 = vpop.trf.xlu0 }
  0xf8   : > { %2332 = vxpose.xlu0.b32.start.end [1/1] (short) (narrow) %v2829_v16, 8  ;;  %v1098_v17 = vpop.trf.xlu0 }
  0xf9   : > { %1115 = vrot.lane.b32.xlu1 %v1098_v17, %s3067_s14 }
  0xfc   : > { %2371 = vxpose.xlu0.b32.start.end [1/1] (short) (narrow) %v2831_v18, 8  ;;  %v1137_v19 = vpop.trf.xlu0 }
  0xfd   : > { %1154 = vrot.lane.b32.xlu1 %v1137_v19, %s3067_s14 }
 0x100   : > { %2410 = vxpose.xlu0.b32.start.end [1/1] (short) (narrow) %v2833_v20, 8  ;;  %v1176_v21 = vpop.trf.xlu0 }
 0x101   : > { %1193 = vrot.lane.b32.xlu1 %v1176_v21, %s3067_s14 }
 0x104   : > { %2449 = vxpose.xlu0.b32.start.end [1/1] (short) (narrow) %v2835_v22, 8  ;;  %v1215_v23 = vpop.trf.xlu0 }
 0x105   : > { %1232 = vrot.lane.b32.xlu1 %v1215_v23, %s3067_s14 }
 0x108   : > { %2488 = vxpose.xlu0.b32.start.end [1/1] (short) (narrow) %v2837_v24, 8  ;;  %v1254_v25 = vpop.trf.xlu0 }
 0x109   : > { %1271 = vrot.lane.b32.xlu1 %v1254_v25, %s3067_s14 }
 0x10c   : > { %2566 = vxpose.xlu0.b32.start.end [1/1] (short) (narrow) %v2841_v26, 8  ;;  %v1293_v27 = vpop.trf.xlu0 }
 0x10d   : > { %1310 = vrot.lane.b32.xlu1 %v1293_v27, %s3067_s14 }
 0x110   : > { %v1332_v28 = vpop.trf.xlu0 }
 0x111   : > { %1349 = vrot.lane.b32.xlu1 %v1332_v28, %s3067_s14 }
 0x114   : > { %v1371_v29 = vpop.trf.xlu0 }
 0x115   : > { %1388 = vrot.lane.b32.xlu1 %v1371_v29, %s3068_s18 }
 0x118   : > { %v1411_v30 = vpop.trf.xlu0 }
 0x119   : > { %1428 = vrot.lane.b32.xlu1 %v1411_v30, %s3068_s18 }
 0x11c   : > { %v1450_v31 = vpop.trf.xlu0 }
 0x11d   : > { %1467 = vrot.lane.b32.xlu1 %v1450_v31, %s3068_s18 }
 0x120   : > { %v1489_v32 = vpop.trf.xlu0 }
 0x121   : > { %1506 = vrot.lane.b32.xlu1 %v1489_v32, %s3068_s18 }
 0x124   : > { %v1528_v33 = vpop.trf.xlu0 }
 0x125   : > { %1545 = vrot.lane.b32.xlu1 %v1528_v33, %s3068_s18 }
 0x128   : > { %v1567_v34 = vpop.trf.xlu0 }
 0x129   : > { %1584 = vrot.lane.b32.xlu1 %v1567_v34, %s3068_s18 }
 0x12c   : > { %v1606_v35 = vpop.trf.xlu0 }
 0x12d   : > { %1623 = vrot.lane.b32.xlu1 %v1606_v35, %s3068_s18 }
 0x130   : > { %v1645_v36 = vpop.trf.xlu0 }
 0x131   : > { %1662 = vrot.lane.b32.xlu1 %v1645_v36, %s3068_s18 }
 0x134   : > { %v1684_v37 = vpop.trf.xlu0 }
 0x135   : > { %803 = vrot.lane.b32.xlu0 %v786_v7, %s3067_s14  ;;  %1701 = vrot.lane.b32.xlu1 %v1684_v37, %s3068_s18 }
 0x138   : > { %v1723_v39 = vpop.trf.xlu0 }
 0x139   : > { %842 = vrot.lane.b32.xlu0 %v825_v38, %s3067_s14  ;;  %1740 = vrot.lane.b32.xlu1 %v1723_v39, %s3068_s18 }
 0x13c   : > { %v1762_v40 = vpop.trf.xlu0 }
 0x13d   : > { %920 = vrot.lane.b32.xlu0 %v903_v11, %s3067_s14  ;;  %1779 = vrot.lane.b32.xlu1 %v1762_v40, %s3068_s18 }
 0x140   : > { %v1801_v42 = vpop.trf.xlu0 }
 0x141   : > { %959 = vrot.lane.b32.xlu0 %v942_v41, %s3067_s14  ;;  %1818 = vrot.lane.b32.xlu1 %v1801_v42, %s3068_s18 }
 0x144   : > { %v1840_v43 = vpop.trf.xlu0 }
 0x145   : > { %1037 = vrot.lane.b32.xlu0 %v1020_v15, %s3067_s14  ;;  %1857 = vrot.lane.b32.xlu1 %v1840_v43, %s3068_s18 }
 0x148   : > { %v1879_v45 = vpop.trf.xlu0 }
 0x149   : > { %1076 = vrot.lane.b32.xlu0 %v1059_v44, %s3067_s14  ;;  %1896 = vrot.lane.b32.xlu1 %v1879_v45, %s3068_s18 }
 0x14c   : > { %v1918_v46 = vpop.trf.xlu0 }
 0x14d   : > { %1935 = vrot.lane.b32.xlu1 %v1918_v46, %s3068_s18 }
 0x150   : > { %v1957_v48 = vpop.trf.xlu0 }
 0x151   : > { %1974 = vrot.lane.b32.xlu1 %v1957_v48, %s3068_s18 }
 0x153   : > { %v764_v49 = vpop.permute.xlu1 %763 }
 0x154   : > { %767 = vst.msk [vmem:[%s3264_s3] sm:$0xff] %vm766_vm1, %v764_v49  ;;  %v1996_v50 = vpop.trf.xlu0 }
 0x155   : > { %2013 = vrot.lane.b32.xlu1 %v1996_v50, %s3069_s23 }
 0x158   : > { %v2036_v51 = vpop.trf.xlu0 }
 0x159   : > { %2053 = vrot.lane.b32.xlu1 %v2036_v51, %s3069_s23 }
 0x15b   : > { %v882_v52 = vpop.permute.xlu1 %881 }
 0x15c   : > { %2756 = vst.msk [vmem:[%s3264_s3 + $0x18] sm:$0xff] %vm766_vm1, %v882_v52  ;;  %v2075_v53 = vpop.trf.xlu0 }
 0x15d   : > { %2092 = vrot.lane.b32.xlu1 %v2075_v53, %s3069_s23 }
 0x160   : > { %v2114_v54 = vpop.trf.xlu0 }
 0x161   : > { %2131 = vrot.lane.b32.xlu1 %v2114_v54, %s3069_s23 }
 0x163   : > { %v999_v55 = vpop.permute.xlu1 %998 }
 0x164   : > { %2762 = vst.msk [vmem:[%s3264_s3 + $0x30] sm:$0xff] %vm766_vm1, %v999_v55  ;;  %v2153_v56 = vpop.trf.xlu0 }
 0x165   : > { %2170 = vrot.lane.b32.xlu1 %v2153_v56, %s3069_s23 }
 0x168   : > { %v2192_v57 = vpop.trf.xlu0 }
 0x169   : > { %2209 = vrot.lane.b32.xlu1 %v2192_v57, %s3069_s23 }
 0x16b   : > { %v1116_v58 = vpop.permute.xlu1 %1115 }
 0x16c   : > { %2768 = vst.msk [vmem:[%s3264_s3 + $0x48] sm:$0xff] %vm766_vm1, %v1116_v58  ;;  %v2231_v59 = vpop.trf.xlu0 }
 0x16d   : > { %2248 = vrot.lane.b32.xlu1 %v2231_v59, %s3069_s23 }
 0x16f   : > { %v1155_v60 = vpop.permute.xlu1 %1154 }
 0x170   : > { %2770 = vst.msk [vmem:[%s3264_s3 + $0x50] sm:$0xff] %vm766_vm1, %v1155_v60  ;;  %v2270_v61 = vpop.trf.xlu0 }
 0x171   : > { %2287 = vrot.lane.b32.xlu1 %v2270_v61, %s3069_s23 }
 0x173   : > { %v1194_v62 = vpop.permute.xlu1 %1193 }
 0x174   : > { %2772 = vst.msk [vmem:[%s3264_s3 + $0x58] sm:$0xff] %vm766_vm1, %v1194_v62  ;;  %v2309_v63 = vpop.trf.xlu0 }
 0x175   : > { %2326 = vrot.lane.b32.xlu1 %v2309_v63, %s3069_s23 }
 0x177   : > { %v1233_v0 = vpop.permute.xlu1 %1232 }
 0x178   : > { %2774 = vst.msk [vmem:[%s3264_s3 + $0x60] sm:$0xff] %vm766_vm1, %v1233_v0  ;;  %v2348_v1 = vpop.trf.xlu0 }
 0x179   : > { %2365 = vrot.lane.b32.xlu1 %v2348_v1, %s3069_s23 }
 0x17b   : > { %v1272_v2 = vpop.permute.xlu1 %1271 }
 0x17c   : > { %2776 = vst.msk [vmem:[%s3264_s3 + $0x68] sm:$0xff] %vm766_vm1, %v1272_v2  ;;  %v2387_v3 = vpop.trf.xlu0 }
 0x17d   : > { %2404 = vrot.lane.b32.xlu1 %v2387_v3, %s3069_s23 }
 0x17f   : > { %v1311_v4 = vpop.permute.xlu1 %1310 }
 0x180   : > { %2778 = vst.msk [vmem:[%s3264_s3 + $0x70] sm:$0xff] %vm766_vm1, %v1311_v4  ;;  %v2426_v5 = vpop.trf.xlu0 }
 0x181   : > { %2443 = vrot.lane.b32.xlu1 %v2426_v5, %s3069_s23 }
 0x183   : > { %v1350_v6 = vpop.permute.xlu1 %1349 }
 0x184   : > { %2780 = vst.msk [vmem:[%s3264_s3 + $0x78] sm:$0xff] %vm766_vm1, %v1350_v6  ;;  %v2465_v7 = vpop.trf.xlu0 }
 0x185   : > { %2482 = vrot.lane.b32.xlu1 %v2465_v7, %s3069_s23 }
 0x187   : > { %v1389_v8 = vpop.permute.xlu1 %1388 }
 0x188   : > { %1392 = vst.msk [vmem:[%s3264_s3] sm:$0xff] %vm1391_vm2, %v1389_v8  ;;  %v2504_v9 = vpop.trf.xlu0 }
 0x189   : > { %2560 = vrot.lane.b32.xlu1 %v2543_v47, %s3069_s23  ;;  %2521 = vrot.lane.b32.xlu0 %v2504_v9, %s3069_s23 }
 0x18b   : > { %v1429_v10 = vpop.permute.xlu1 %1428 }
 0x18c   : > { %v2582_v11 = vpop.trf.xlu0 }
 0x18d   : > { %2599 = vrot.lane.b32.xlu0 %v2582_v11, %s3069_s23 }
 0x18f   : > { %v1468_v12 = vpop.permute.xlu1 %1467 }
 0x193   : > { %v1507_v13 = vpop.permute.xlu1 %1506 }
 0x194   : > { %2787 = vst.msk [vmem:[%s3264_s3 + $0x18] sm:$0xff] %vm1391_vm2, %v1507_v13 }
 0x197   : > { %v1546_v14 = vpop.permute.xlu1 %1545 }
 0x19b   : > { %v1585_v15 = vpop.permute.xlu1 %1584 }
 0x19f   : > { %v1624_v16 = vpop.permute.xlu1 %1623 }
 0x1a0   : > { %2793 = vst.msk [vmem:[%s3264_s3 + $0x30] sm:$0xff] %vm1391_vm2, %v1624_v16 }
 0x1a3   : > { %v1663_v17 = vpop.permute.xlu1 %1662 }
 0x1a7   : > { %v1702_v18 = vpop.permute.xlu1 %1701  ;;  %v804_v19 = vpop.permute.xlu0 %803 }
 0x1a8   : > { %2752 = vst.msk [vmem:[%s3264_s3 + $0x8] sm:$0xff] %vm766_vm1, %v804_v19 }
 0x1a9   : > { %2783 = vst.msk [vmem:[%s3264_s3 + $0x8] sm:$0xff] %vm1391_vm2, %v1429_v10 }
 0x1ab   : > { %v1741_v20 = vpop.permute.xlu1 %1740  ;;  %v843_v21 = vpop.permute.xlu0 %842 }
 0x1ac   : > { %2799 = vst.msk [vmem:[%s3264_s3 + $0x48] sm:$0xff] %vm1391_vm2, %v1741_v20 }
 0x1ad   : > { %2754 = vst.msk [vmem:[%s3264_s3 + $0x10] sm:$0xff] %vm766_vm1, %v843_v21 }
 0x1ae   : > { %2785 = vst.msk [vmem:[%s3264_s3 + $0x10] sm:$0xff] %vm1391_vm2, %v1468_v12 }
 0x1af   : > { %v1780_v22 = vpop.permute.xlu1 %1779  ;;  %v921_v23 = vpop.permute.xlu0 %920 }
 0x1b0   : > { %2801 = vst.msk [vmem:[%s3264_s3 + $0x50] sm:$0xff] %vm1391_vm2, %v1780_v22 }
 0x1b1   : > { %2758 = vst.msk [vmem:[%s3264_s3 + $0x20] sm:$0xff] %vm766_vm1, %v921_v23 }
 0x1b2   : > { %2789 = vst.msk [vmem:[%s3264_s3 + $0x20] sm:$0xff] %vm1391_vm2, %v1546_v14 }
 0x1b3   : > { %v1819_v24 = vpop.permute.xlu1 %1818  ;;  %v960_v25 = vpop.permute.xlu0 %959 }
 0x1b4   : > { %2803 = vst.msk [vmem:[%s3264_s3 + $0x58] sm:$0xff] %vm1391_vm2, %v1819_v24 }
 0x1b5   : > { %2760 = vst.msk [vmem:[%s3264_s3 + $0x28] sm:$0xff] %vm766_vm1, %v960_v25 }
 0x1b6   : > { %2791 = vst.msk [vmem:[%s3264_s3 + $0x28] sm:$0xff] %vm1391_vm2, %v1585_v15 }
 0x1b7   : > { %v1858_v26 = vpop.permute.xlu1 %1857  ;;  %v1038_v27 = vpop.permute.xlu0 %1037 }
 0x1b8   : > { %2805 = vst.msk [vmem:[%s3264_s3 + $0x60] sm:$0xff] %vm1391_vm2, %v1858_v26 }
 0x1b9   : > { %2764 = vst.msk [vmem:[%s3264_s3 + $0x38] sm:$0xff] %vm766_vm1, %v1038_v27 }
 0x1ba   : > { %2795 = vst.msk [vmem:[%s3264_s3 + $0x38] sm:$0xff] %vm1391_vm2, %v1663_v17 }
 0x1bb   : > { %v1897_v28 = vpop.permute.xlu1 %1896  ;;  %v1077_v29 = vpop.permute.xlu0 %1076 }
 0x1bc   : > { %2807 = vst.msk [vmem:[%s3264_s3 + $0x68] sm:$0xff] %vm1391_vm2, %v1897_v28 }
 0x1bd   : > { %2766 = vst.msk [vmem:[%s3264_s3 + $0x40] sm:$0xff] %vm766_vm1, %v1077_v29 }
 0x1be   : > { %2797 = vst.msk [vmem:[%s3264_s3 + $0x40] sm:$0xff] %vm1391_vm2, %v1702_v18 }
 0x1bf   : > { %v1936_v30 = vpop.permute.xlu1 %1935 }
 0x1c0   : > { %2809 = vst.msk [vmem:[%s3264_s3 + $0x70] sm:$0xff] %vm1391_vm2, %v1936_v30 }
 0x1c3   : > { %v1975_v31 = vpop.permute.xlu1 %1974 }
 0x1c4   : > { %2811 = vst.msk [vmem:[%s3264_s3 + $0x78] sm:$0xff] %vm1391_vm2, %v1975_v31 }
 0x1c7   : > { %v2014_v32 = vpop.permute.xlu1 %2013 }
 0x1c8   : > { %2017 = vst.msk [vmem:[%s3264_s3] sm:$0xff] %vm2016_vm3, %v2014_v32 }
 0x1cb   : > { %v2054_v33 = vpop.permute.xlu1 %2053 }
 0x1cc   : > { %2814 = vst.msk [vmem:[%s3264_s3 + $0x8] sm:$0xff] %vm2016_vm3, %v2054_v33 }
 0x1cf   : > { %v2093_v34 = vpop.permute.xlu1 %2092 }
 0x1d0   : > { %2816 = vst.msk [vmem:[%s3264_s3 + $0x10] sm:$0xff] %vm2016_vm3, %v2093_v34 }
 0x1d3   : > { %v2132_v35 = vpop.permute.xlu1 %2131 }
 0x1d4   : > { %2818 = vst.msk [vmem:[%s3264_s3 + $0x18] sm:$0xff] %vm2016_vm3, %v2132_v35 }
 0x1d7   : > { %v2171_v36 = vpop.permute.xlu1 %2170 }
 0x1d8   : > { %2820 = vst.msk [vmem:[%s3264_s3 + $0x20] sm:$0xff] %vm2016_vm3, %v2171_v36 }
 0x1db   : > { %v2210_v37 = vpop.permute.xlu1 %2209 }
 0x1dc   : > { %2822 = vst.msk [vmem:[%s3264_s3 + $0x28] sm:$0xff] %vm2016_vm3, %v2210_v37 }
 0x1df   : > { %v2249_v38 = vpop.permute.xlu1 %2248 }
 0x1e0   : > { %2824 = vst.msk [vmem:[%s3264_s3 + $0x30] sm:$0xff] %vm2016_vm3, %v2249_v38 }
 0x1e3   : > { %v2288_v39 = vpop.permute.xlu1 %2287 }
 0x1e4   : > { %2826 = vst.msk [vmem:[%s3264_s3 + $0x38] sm:$0xff] %vm2016_vm3, %v2288_v39 }
 0x1e7   : > { %v2327_v40 = vpop.permute.xlu1 %2326 }
 0x1e8   : > { %2828 = vst.msk [vmem:[%s3264_s3 + $0x40] sm:$0xff] %vm2016_vm3, %v2327_v40 }
 0x1eb   : > { %v2366_v41 = vpop.permute.xlu1 %2365 }
 0x1ec   : > { %2830 = vst.msk [vmem:[%s3264_s3 + $0x48] sm:$0xff] %vm2016_vm3, %v2366_v41 }
 0x1ef   : > { %v2405_v42 = vpop.permute.xlu1 %2404 }
 0x1f0   : > { %2832 = vst.msk [vmem:[%s3264_s3 + $0x50] sm:$0xff] %vm2016_vm3, %v2405_v42 }
 0x1f3   : > { %v2444_v43 = vpop.permute.xlu1 %2443 }
 0x1f4   : > { %2834 = vst.msk [vmem:[%s3264_s3 + $0x58] sm:$0xff] %vm2016_vm3, %v2444_v43 }
 0x1f7   : > { %v2483_v44 = vpop.permute.xlu1 %2482 }
 0x1f8   : > { %2836 = vst.msk [vmem:[%s3264_s3 + $0x60] sm:$0xff] %vm2016_vm3, %v2483_v44 }
 0x1fb   : > { %v2561_v45 = vpop.permute.xlu1 %2560  ;;  %v2522_v46 = vpop.permute.xlu0 %2521 }
 0x1fc   : > { %2840 = vst.msk [vmem:[%s3264_s3 + $0x70] sm:$0xff] %vm2016_vm3, %v2561_v45  ;;  %2838 = vst.msk [vmem:[%s3264_s3 + $0x68] sm:$0xff] %vm2016_vm3, %v2522_v46 }
 0x1ff   : > { %v2600_v47 = vpop.permute.xlu0 %2599 }
 0x200   : > { %2842 = vst.msk [vmem:[%s3264_s3 + $0x78] sm:$0xff] %vm2016_vm3, %v2600_v47 }
 0x201   : > { %2977 = shalt.err (!%p2974_p3)
}
 0x202   : > { %s2978_s3 = scalar_lea.hbm %s3465_s28, 2048  ;;  %s2982_s2 = scalar_lea.hbm %s3525_s1, 8192 }
 0x203   : > { %p2979_p5 = scmp.ne.s32.totalorder %s3465_s28, %s2978_s3  ;;  %p2983_p2 = scmp.lt.u32.totalorder %s3465_s28, %s3525_s1 }
 0x204   : > { %p2984_p4 = scmp.lt.u32.totalorder %s2982_s2, %s2978_s3  ;;  %p2986_p8 = scmp.lt.u32.totalorder %s2978_s3, %s3465_s28 }
 0x205   : > { %p2980_p6 = pnand %p2979_p5, %p3532_p9 }
 0x206   : > { %p2985_p10 = por %p2984_p4, %p2983_p2 }
 0x207   : > { %p2981_p7 = pneg %p2980_p6 }
 0x208   : > { %p2987_p12 = por %p2986_p8, %p2985_p10 }
 0x20a   : > { %p2988_p0 = pnand %p2987_p12, %p2981_p7 }
 0x20c   : > { %2991 = shalt.err (!%p2988_p0)
}
 0x20d   : > { %s3071_s5 = smov 128  }
 0x20e   : > { %2851 = dma.vmem_to_hbm [thread:$0]  (%p3532_p9), %s3467_s15, 2048, %s3465_s28, %s2604_s9, %s3071_s5, %s3071_s5, %s3067_s14  }
 0x20f PF: > { %p2862_p11 = scmp.ge.s32.totalorder %s3062_s13, 2  ;;  %s2634_s19 = sand.u32 1, %s3034_s6  }
 0x210   : > { %p3533_p13 = scmp.ne.s32.totalorder %s3530_s25, 0  ;;  %s2635_s24 = scalar_lea.sflag [#allocation4], %s2634_s19 }
 0x212   : > { %p2858_p1 = pnand %p2862_p11, %p3533_p13 }
 0x214   : > { %3029 = dma.done.wait (!%p2858_p1), %s2635_s24, 2048  }
 0x215   : > { %3031 = vsyncadd (!%p2858_p1), %s2635_s24, 4294965248  ;;  %s17_s13 = sadd.s32 1, %s3062_s13   ;;  %s3534_s6 = smov %s3038_s7 }
 0x216   : > { %p14_p3 = scmp.ge.s32.totalorder %s17_s13, 6   ;;  %s3535_s7 = smov %s3042_s8 }
 0x217   : > { %s3536_s8 = smov %s3160_s27  ;;  %s3537_s9 = smov %s3054_s11 }
 0x218   : > { %s3538_s10 = smov %s3058_s12  ;;  %s3539_s11 = smov %s3542_s16 }
 0x219   : > { %s3540_s12 = smov %s3546_s17  ;;  %16 = sbr.rel (!%p14_p3) target bundleno = 7 (0x7), region = 147 }
 0x220   :  { %2640 = vsyncpa [#allocation3], 1 }
 0x221   :  { %2642 = vsyncpa [#allocation3 + $0x1], 1 }
 0x222   :  { %2643 = vsyncpa [#allocation4], 1 }
 0x223   :  { %2645 = vsyncpa [#allocation4 + $0x1], 1 }

</bundles_post_ra>
